<compile_context>
chip_gen: v5e
topology: v5e:2x2
jax: 0.10.0
libtpu: 0.0.40
codegen_flags: <defaults>
</compile_context>

<pallas_src>
import functools
import math

import jax
import jax.numpy as jnp
from jax.experimental import pallas as pl
from jax.experimental.pallas import tpu as pltpu

_EPS = 1e-5
_INV_SQRT2 = 1.0 / math.sqrt(2.0)


# ----------------------------------------------------------------------------
# small helpers
# ----------------------------------------------------------------------------
def _round_up(x, m):
    return ((x + m - 1) // m) * m


@functools.lru_cache(maxsize=None)
def _vmem_limit_bytes():
    # Generation-aware scoped-VMEM limit: ~55% of physical, clipped to
    # [32 MiB, 96 MiB].  v7x (64 MiB physical) -> ~35 MiB, v5e/v6e (128 MiB) -> ~70 MiB.
    try:
        info = pltpu.get_tpu_info()
        phys = getattr(info, "vmem_capacity_bytes", None)
        if phys:
            return int(min(max(0.55 * phys, 32 * 2**20), 96 * 2**20))
    except Exception:
        pass
    return 32 * 2**20  # safe on every generation


@functools.lru_cache(maxsize=None)
def _max_row_tile():
    # Bigger row tiles when VMEM headroom allows (v5e/v6e), 256 otherwise (v7x).
    return 512 if _vmem_limit_bytes() >= 64 * 2**20 else 256


def _row_tiling(m):
    """Return (row_tile, padded_rows).  When M is already a multiple of 8 the tile
    divides M exactly, so no per-op padding/slicing is materialized at all."""
    mx = _max_row_tile()
    if m % 8 == 0:
        tm = min(m, mx)
        while m % tm:
            tm -= 8
        return tm, m
    mp = _round_up(max(m, 8), 8)
    return mp, mp


def _col_tile(n):
    """Lane-dense N tile (multiple of 128, <=512) with >=2 blocks when possible
    (gives v7x's two TensorCores a parallel axis and bounds VMEM for big N)."""
    if n % 128 != 0:
        return n
    for tn in (512, 256, 128):
        if n % tn == 0 and n // tn >= 2:
            return tn
    return n  # n == 128


def _pad_rows(x, mp):
    m = x.shape[0]
    if mp != m:
        x = jnp.pad(x, ((0, mp - m), (0, 0)))
    return x


def _cparams(dim_sem):
    return pltpu.CompilerParams(dimension_semantics=dim_sem,
                                vmem_limit_bytes=_vmem_limit_bytes())


# ----------------------------------------------------------------------------
# kernel bodies
# ----------------------------------------------------------------------------
def _gelu_exact(x):
    # torch nn.GELU() default: 0.5*x*(1+erf(x/sqrt(2))).
    # TODO(synk): tanh-approx GELU would move work to the EUP but changes numerics.
    return 0.5 * x * (1.0 + jax.lax.erf(x * jnp.float32(_INV_SQRT2)))


def _ln(x, gamma, beta):
    mean = jnp.mean(x, axis=-1, keepdims=True)
    c = x - mean
    var = jnp.mean(c * c, axis=-1, keepdims=True)
    return c * (jax.lax.rsqrt(var + jnp.float32(_EPS)) * gamma) + beta


def _ln_kernel(x_ref, g_ref, b_ref, o_ref):
    # Standalone LayerNorm (only used for the post-embedding LN, whose output IS
    # the residual stream and therefore cannot be fused into a consumer).
    x = x_ref[...].astype(jnp.float32)
    o_ref[...] = _ln(x, g_ref[...], b_ref[...]).astype(o_ref.dtype)


def _ln_linear_kernel(x_ref, g_ref, be_ref, wt_ref, b_ref, o_ref, *, gelu):
    # Fused: LayerNorm(x) @ W^T + b  [optionally -> exact GELU].
    x = x_ref[...].astype(jnp.float32)
    xn = _ln(x, g_ref[...], be_ref[...]).astype(jnp.bfloat16)
    h = jnp.dot(xn, wt_ref[...], preferred_element_type=jnp.float32) + b_ref[...]
    if gelu:
        h = _gelu_exact(h)
    o_ref[...] = h.astype(o_ref.dtype)


def _linear_resid_kernel(x_ref, wt_ref, b_ref, res_ref, o_ref):
    # Fused: residual + (x @ W^T + b)   (residual add hides under the MXU).
    x = x_ref[...].astype(jnp.bfloat16)
    h = jnp.dot(x, wt_ref[...], preferred_element_type=jnp.float32) + b_ref[...]
    o_ref[...] = (res_ref[...].astype(jnp.float32) + h).astype(o_ref.dtype)


def _mlm_kernel(x_ref, wt_ref, b_ref, g_ref, be_ref, o_ref):
    # MlmLayer: Linear -> GELU -> LayerNorm (LN over the output dim -> N untiled).
    x = x_ref[...].astype(jnp.bfloat16)
    h = jnp.dot(x, wt_ref[...], preferred_element_type=jnp.float32) + b_ref[...]
    h = _gelu_exact(h)
    o_ref[...] = _ln(h, g_ref[...], be_ref[...]).astype(o_ref.dtype)


def _head_kernel(x_ref, wt_ref, bias_ref, o_ref):
    # Tied-embedding logits: x @ tk_emb^T + positional bias (fused in-kernel).
    h = jnp.dot(x_ref[...], wt_ref[...], preferred_element_type=jnp.float32)
    o_ref[...] = (h + bias_ref[...]).astype(o_ref.dtype)


def _attn_kernel(qkv_ref, o_ref, *, n_heads, scale):
    # One batch element.  qkv_ref: (T, 3E) bf16 laid out [Q heads | K heads | V heads].
    # Heads are looped in-kernel and the output is written head-concatenated into a
    # single lane-dense (T, E) tile (no XLA-side transposes / reshapes, no masked
    # per-head HBM writeback).  MaskGIT attention is bidirectional (no mask).
    t, te = qkv_ref.shape
    e = te // 3
    dh = e // n_heads
    qkv = qkv_ref[...]
    for h in range(n_heads):
        q = qkv[:, h * dh:(h + 1) * dh]
        k = qkv[:, e + h * dh:e + (h + 1) * dh]
        v = qkv[:, 2 * e + h * dh:2 * e + (h + 1) * dh]
        s = jax.lax.dot_general(q, k, (((1,), (1,)), ((), ())),
                                preferred_element_type=jnp.float32)
        s = s * jnp.float32(scale)
        s = s - jnp.max(s, axis=-1, keepdims=True)
        p = jnp.exp(s)
        inv = pl.reciprocal(jnp.sum(p, axis=-1, keepdims=True), approx=False)
        att = (p * inv).astype(jnp.bfloat16)
        out_h = jnp.dot(att, v, preferred_element_type=jnp.float32)
        o_ref[:, h * dh:(h + 1) * dh] = out_h.astype(o_ref.dtype)


# ----------------------------------------------------------------------------
# pallas_call wrappers
# ----------------------------------------------------------------------------
# TODO(synk): single-buffer the constant-index operands (weights/biases/LN params)
# with pipeline_mode=pl.Buffered(1) once confirmed supported by the target JAX.

def layer_norm(x2d, gamma, beta):
    m, e = x2d.shape
    tm, mp = _row_tiling(m)
    xp = _pad_rows(x2d, mp)
    out = pl.pallas_call(
        _ln_kernel,
        out_shape=jax.ShapeDtypeStruct((mp, e), jnp.float32),
        grid_spec=pltpu.PrefetchScalarGridSpec(
            num_scalar_prefetch=0,
            grid=(mp // tm,),
            in_specs=[
                pl.BlockSpec((tm, e), lambda i: (i, 0)),
                pl.BlockSpec((1, e), lambda i: (0, 0)),
                pl.BlockSpec((1, e), lambda i: (0, 0)),
            ],
            out_specs=pl.BlockSpec((tm, e), lambda i: (i, 0)),
        ),
        compiler_params=_cparams(("parallel",)),
        cost_estimate=pl.CostEstimate(
            flops=int(8 * mp * e), transcendentals=int(mp),
            bytes_accessed=int(8 * mp * e + 8 * e)),
    )(xp, gamma, beta)
    return out if mp == m else out[:m]


def ln_linear(x2d, gamma, beta, wt, bias, *, gelu, out_dtype):
    # Fused LayerNorm -> Linear (-> GELU).  wt is pre-transposed bf16 (K, N).
    m, k = x2d.shape
    n = wt.shape[1]
    tm, mp = _row_tiling(m)
    tn = _col_tile(n)
    ncols = n // tn
    xp = _pad_rows(x2d, mp)
    osz = jnp.dtype(out_dtype).itemsize
    out = pl.pallas_call(
        functools.partial(_ln_linear_kernel, gelu=gelu),
        out_shape=jax.ShapeDtypeStruct((mp, n), out_dtype),
        grid_spec=pltpu.PrefetchScalarGridSpec(
            num_scalar_prefetch=0,
            grid=(mp // tm, ncols),
            in_specs=[
                pl.BlockSpec((tm, k), lambda i, j: (i, 0)),
                pl.BlockSpec((1, k), lambda i, j: (0, 0)),
                pl.BlockSpec((1, k), lambda i, j: (0, 0)),
                pl.BlockSpec((k, tn), lambda i, j: (0, j)),
                pl.BlockSpec((1, tn), lambda i, j: (0, j)),
            ],
            out_specs=pl.BlockSpec((tm, tn), lambda i, j: (i, j)),
        ),
        compiler_params=_cparams(("parallel", "parallel")),
        cost_estimate=pl.CostEstimate(
            flops=int(2 * mp * k * n + 10 * mp * k * ncols),
            transcendentals=int(mp * n if gelu else 0),
            bytes_accessed=int(4 * mp * k * ncols + 2 * k * n + 4 * n
                               + osz * mp * n)),
    )(xp, gamma, beta, wt, bias)
    return out if mp == m else out[:m]


def linear_residual(x2d, wt, bias, resid):
    # Fused Linear + residual add; output dtype follows the residual stream (f32).
    m, k = x2d.shape
    n = wt.shape[1]
    tm, mp = _row_tiling(m)
    tn = _col_tile(n)
    ncols = n // tn
    xp = _pad_rows(x2d, mp)
    rp = _pad_rows(resid, mp)
    xsz = jnp.dtype(x2d.dtype).itemsize
    out = pl.pallas_call(
        _linear_resid_kernel,
        out_shape=jax.ShapeDtypeStruct((mp, n), jnp.float32),
        grid_spec=pltpu.PrefetchScalarGridSpec(
            num_scalar_prefetch=0,
            grid=(mp // tm, ncols),
            in_specs=[
                pl.BlockSpec((tm, k), lambda i, j: (i, 0)),
                pl.BlockSpec((k, tn), lambda i, j: (0, j)),
                pl.BlockSpec((1, tn), lambda i, j: (0, j)),
                pl.BlockSpec((tm, tn), lambda i, j: (i, j)),
            ],
            out_specs=pl.BlockSpec((tm, tn), lambda i, j: (i, j)),
        ),
        compiler_params=_cparams(("parallel", "parallel")),
        cost_estimate=pl.CostEstimate(
            flops=int(2 * mp * k * n + mp * n),
            transcendentals=0,
            bytes_accessed=int(xsz * mp * k * ncols + 2 * k * n + 4 * n
                               + 8 * mp * n)),
    )(xp, wt, bias, rp)
    return out if mp == m else out[:m]


def mlm_layer(x2d, wt, bias, gamma, beta):
    # Linear -> GELU -> LayerNorm, fused.  N cannot be tiled (LN spans all of E).
    m, e = x2d.shape
    tm, mp = _row_tiling(m)
    xp = _pad_rows(x2d, mp)
    out = pl.pallas_call(
        _mlm_kernel,
        out_shape=jax.ShapeDtypeStruct((mp, e), jnp.bfloat16),
        grid_spec=pltpu.PrefetchScalarGridSpec(
            num_scalar_prefetch=0,
            grid=(mp // tm,),
            in_specs=[
                pl.BlockSpec((tm, e), lambda i: (i, 0)),
                pl.BlockSpec((e, e), lambda i: (0, 0)),
                pl.BlockSpec((1, e), lambda i: (0, 0)),
                pl.BlockSpec((1, e), lambda i: (0, 0)),
                pl.BlockSpec((1, e), lambda i: (0, 0)),
            ],
            out_specs=pl.BlockSpec((tm, e), lambda i: (i, 0)),
        ),
        compiler_params=_cparams(("parallel",)),
        cost_estimate=pl.CostEstimate(
            flops=int(2 * mp * e * e + 12 * mp * e),
            transcendentals=int(mp * e + mp),
            bytes_accessed=int(6 * mp * e + 2 * e * e + 12 * e)),
    )(xp, wt, bias, gamma, beta)
    return out if mp == m else out[:m]


def attention(qkv3d, *, n_heads):
    # qkv3d: (B, T, 3E) bf16 -> (B, T, E) bf16, heads handled in-kernel.
    b, t, te = qkv3d.shape
    e = te // 3
    dh = e // n_heads
    return pl.pallas_call(
        functools.partial(_attn_kernel, n_heads=n_heads, scale=1.0 / math.sqrt(dh)),
        out_shape=jax.ShapeDtypeStruct((b, t, e), jnp.bfloat16),
        grid_spec=pltpu.PrefetchScalarGridSpec(
            num_scalar_prefetch=0,
            grid=(b,),
            in_specs=[pl.BlockSpec((None, t, te), lambda i: (i, 0, 0))],
            out_specs=pl.BlockSpec((None, t, e), lambda i: (i, 0, 0)),
        ),
        compiler_params=_cparams(("parallel",)),
        cost_estimate=pl.CostEstimate(
            flops=int(4 * b * t * t * e),
            transcendentals=int(b * n_heads * t * t),
            bytes_accessed=int(2 * b * t * (te + e))),
    )(qkv3d)


def logits_head(x3d, wt, bias2d):
    # x3d: (B, T, E) bf16, wt: (E, V) bf16 (tied tk_emb^T), bias2d: (T, V) f32.
    b, t, e = x3d.shape
    v = wt.shape[1]
    tv = _col_tile(v)
    return pl.pallas_call(
        _head_kernel,
        out_shape=jax.ShapeDtypeStruct((b, t, v), jnp.float32),
        grid_spec=pltpu.PrefetchScalarGridSpec(
            num_scalar_prefetch=0,
            grid=(b, v // tv),
            in_specs=[
                pl.BlockSpec((None, t, e), lambda i, j: (i, 0, 0)),
                pl.BlockSpec((e, tv), lambda i, j: (0, j)),
                pl.BlockSpec((t, tv), lambda i, j: (0, j)),
            ],
            out_specs=pl.BlockSpec((None, t, tv), lambda i, j: (i, 0, j)),
        ),
        compiler_params=_cparams(("parallel", "parallel")),
        cost_estimate=pl.CostEstimate(
            flops=int(2 * b * t * e * v),
            transcendentals=0,
            bytes_accessed=int(2 * b * t * e * (v // tv) + 2 * e * v + 4 * t * v
                               + 4 * b * t * v)),
    )(x3d, wt, bias2d)


# ----------------------------------------------------------------------------
# model forward
# ----------------------------------------------------------------------------
def transformer_block(x2d, bp, *, batch, seq, n_heads):
    e = x2d.shape[1]
    # pre-LN multi-head self-attention (LN1 fused into the QKV projection)
    qkv = ln_linear(x2d, bp["ln1_g"], bp["ln1_b"], bp["wT_qkv"], bp["b_qkv"],
                    gelu=False, out_dtype=jnp.bfloat16)            # (M, 3E)
    a = attention(qkv.reshape(batch, seq, 3 * e), n_heads=n_heads)  # (B, T, E)
    x2d = linear_residual(a.reshape(batch * seq, e), bp["wT_o"], bp["b_o"], x2d)
    # pre-LN feed-forward (LN2 + GELU fused into FF1, residual fused into FF2)
    h = ln_linear(x2d, bp["ln2_g"], bp["ln2_b"], bp["wT_ff1"], bp["b_ff1"],
                  gelu=True, out_dtype=jnp.bfloat16)               # (M, 4E) bf16
    x2d = linear_residual(h, bp["wT_ff2"], bp["b_ff2"], x2d)
    return x2d


@functools.partial(jax.jit, static_argnames=("n_heads",))
def maskgit_forward(dp, idx, *, n_heads):
    batch, seq = idx.shape
    e = dp["tk_emb"].shape[1]
    tok = jnp.take(dp["tk_emb"], idx, axis=0)                        # (B,T,E)
    pos = jnp.take(dp["pos_emb"], jnp.arange(seq), axis=0)[None]     # (1,T,E)
    x = (tok + pos).astype(jnp.float32).reshape(batch * seq, e)
    x = layer_norm(x, dp["ln0_g"], dp["ln0_b"])                      # residual stream f32
    # TODO(synk): dropout layers are inference-mode identities (no RNG masking).
    for bp in dp["blocks"]:
        x = transformer_block(x, bp, batch=batch, seq=seq, n_heads=n_heads)
    h = mlm_layer(x, dp["wT_mlm"], dp["b_mlm"], dp["mlm_g"], dp["mlm_be"])  # (M,E) bf16
    return logits_head(h.reshape(batch, seq, e), dp["tk_embT"], dp["bias"][:seq])


# ----------------------------------------------------------------------------
# one-time parameter preparation (outside jit: no per-call transpose/cast pass)
# ----------------------------------------------------------------------------
def prepare_params(p):
    def lin(w, b):
        return (jnp.asarray(w).T.astype(jnp.bfloat16),
                jnp.asarray(b).reshape(1, -1).astype(jnp.float32))

    def vec(v):
        return jnp.asarray(v).reshape(1, -1).astype(jnp.float32)

    dp = {
        "tk_emb": jnp.asarray(p["tk_emb"], jnp.float32),
        "pos_emb": jnp.asarray(p["pos_emb"], jnp.float32),
        "tk_embT": jnp.asarray(p["tk_emb"]).T.astype(jnp.bfloat16),
        "ln0_g": vec(p["ln0_g"]), "ln0_b": vec(p["ln0_b"]),
        "mlm_g": vec(p["mlm_g"]), "mlm_be": vec(p["mlm_be"]),
        "bias": jnp.asarray(p["bias"], jnp.float32),
    }
    dp["wT_mlm"], dp["b_mlm"] = lin(p["mlm_w"], p["mlm_b"])
    dp["blocks"] = []
    for bp in p["blocks"]:
        nb = {"ln1_g": vec(bp["ln1_g"]), "ln1_b": vec(bp["ln1_b"]),
              "ln2_g": vec(bp["ln2_g"]), "ln2_b": vec(bp["ln2_b"])}
        nb["wT_qkv"], nb["b_qkv"] = lin(bp["w_qkv"], bp["b_qkv"])
        nb["wT_o"], nb["b_o"] = lin(bp["w_o"], bp["b_o"])
        nb["wT_ff1"], nb["b_ff1"] = lin(bp["w_ff1"], bp["b_ff1"])
        nb["wT_ff2"], nb["b_ff2"] = lin(bp["w_ff2"], bp["b_ff2"])
        dp["blocks"].append(nb)
    return dp


# ----------------------------------------------------------------------------
# pure-JAX reference (same math, same bf16-fed matmuls)
# ----------------------------------------------------------------------------
def _ref_dot(a, b):
    return jnp.dot(a.astype(jnp.bfloat16), b.astype(jnp.bfloat16),
                   preferred_element_type=jnp.float32)


def _ref_linear(x, w, b):
    return _ref_dot(x, w.T) + b


def _ref_gelu(x):
    return 0.5 * x * (1.0 + jax.lax.erf(x * _INV_SQRT2))


def _ref_ln(x, g, b):
    mean = jnp.mean(x, axis=-1, keepdims=True)
    c = x - mean
    var = jnp.mean(c * c, axis=-1, keepdims=True)
    return c * (jax.lax.rsqrt(var + _EPS) * g) + b


def reference_forward(params, idx, *, n_heads):
    batch, seq = idx.shape
    e = params["tk_emb"].shape[1]
    dh = e // n_heads
    tok = jnp.take(params["tk_emb"], idx, axis=0)
    pos = jnp.take(params["pos_emb"], jnp.arange(seq), axis=0)[None]
    x = _ref_ln((tok + pos).astype(jnp.float32),
                params["ln0_g"], params["ln0_b"])
    for bp in params["blocks"]:
        h = _ref_ln(x, bp["ln1_g"], bp["ln1_b"])
        qkv = _ref_linear(h, bp["w_qkv"], bp["b_qkv"])
        qkv = qkv.reshape(batch, seq, 3, n_heads, dh)
        q = jnp.transpose(qkv[:, :, 0], (0, 2, 1, 3))
        k = jnp.transpose(qkv[:, :, 1], (0, 2, 1, 3))
        v = jnp.transpose(qkv[:, :, 2], (0, 2, 1, 3))
        s = jnp.einsum("bhqd,bhkd->bhqk", q.astype(jnp.bfloat16),
                       k.astype(jnp.bfloat16),
                       preferred_element_type=jnp.float32) * (1.0 / math.sqrt(dh))
        att = jax.nn.softmax(s, axis=-1)
        a = jnp.einsum("bhqk,bhkd->bhqd", att.astype(jnp.bfloat16),
                       v.astype(jnp.bfloat16),
                       preferred_element_type=jnp.float32)
        a = jnp.transpose(a, (0, 2, 1, 3)).reshape(batch, seq, e)
        x = x + _ref_linear(a, bp["w_o"], bp["b_o"])
        h = _ref_ln(x, bp["ln2_g"], bp["ln2_b"])
        x = x + _ref_linear(_ref_gelu(_ref_linear(h, bp["w_ff1"], bp["b_ff1"])),
                            bp["w_ff2"], bp["b_ff2"])
    h = _ref_ln(_ref_gelu(_ref_linear(x, params["mlm_w"], params["mlm_b"])),
                params["mlm_g"], params["mlm_be"])
    return _ref_dot(h, params["tk_emb"].T) + params["bias"][:seq][None]


# ----------------------------------------------------------------------------
# parameters (torch layouts: Linear weights are (out_features, in_features))
# ----------------------------------------------------------------------------
def init_params(key, *, vocab_size, block_size, embedding_dim, n_heads,
                n_layers):
    del n_heads  # per-head Q/K/V linears are packed head-major into (3E, E)
    e = embedding_dim

    def linear_init(k, n_out, n_in):
        bound = 1.0 / math.sqrt(n_in)
        kw, kb = jax.random.split(k)
        w = jax.random.uniform(kw, (n_out, n_in), minval=-bound, maxval=bound,
                               dtype=jnp.float32)
        b = jax.random.uniform(kb, (n_out,), minval=-bound, maxval=bound,
                               dtype=jnp.float32)
        return w, b

    keys = jax.random.split(key, n_layers + 3)
    p = {
        "tk_emb": 0.02 * jax.random.normal(keys[0], (vocab_size, e), jnp.float32),
        # NOTE: the torch module declares pos_emb as nn.Embedding(vocab_size, E);
        # kept identical here (only the first `seq` rows are ever gathered).
        "pos_emb": 0.02 * jax.random.normal(keys[1], (vocab_size, e), jnp.float32),
        "ln0_g": jnp.ones((e,), jnp.float32),
        "ln0_b": jnp.zeros((e,), jnp.float32),
        "mlm_g": jnp.ones((e,), jnp.float32),
        "mlm_be": jnp.zeros((e,), jnp.float32),
        "bias": jnp.zeros((block_size, vocab_size), jnp.float32),
    }
    p["mlm_w"], p["mlm_b"] = linear_init(keys[2], e, e)
    blocks = []
    for i in range(n_layers):
        kq, ko, kf1, kf2 = jax.random.split(keys[3 + i], 4)
        bp = {
            "ln1_g": jnp.ones((e,), jnp.float32),
            "ln1_b": jnp.zeros((e,), jnp.float32),
            "ln2_g": jnp.ones((e,), jnp.float32),
            "ln2_b": jnp.zeros((e,), jnp.float32),
        }
        bp["w_qkv"], bp["b_qkv"] = linear_init(kq, 3 * e, e)
        bp["w_o"], bp["b_o"] = linear_init(ko, e, e)
        bp["w_ff1"], bp["b_ff1"] = linear_init(kf1, 4 * e, e)
        bp["w_ff2"], bp["b_ff2"] = linear_init(kf2, e, 4 * e)
        blocks.append(bp)
    p["blocks"] = blocks
    return p


if __name__ == "__main__":
    # Small config: batch=2, seq=block_size=16, embedding_dim=128 (lane-dense),
    # 4 heads (head_dim=32), 2 layers, vocab=256.
    B, T, E, H, L, V = 2, 16, 128, 4, 2, 256

    key = jax.random.PRNGKey(0)
    params = init_params(key, vocab_size=V, block_size=T, embedding_dim=E,
                         n_heads=H, n_layers=L)
    dparams = prepare_params(params)   # one-time weight transpose + bf16 cast
    idx = jax.random.randint(jax.random.fold_in(key, 1234), (B, T), 0, V)

    logits = maskgit_forward(dparams, idx, n_heads=H)
    jax.block_until_ready(logits)

    ref = reference_forward(params, idx, n_heads=H)
    assert logits.shape == (B, T, V), logits.shape
    assert bool(jnp.all(jnp.isfinite(logits)))
    max_err = float(jnp.max(jnp.abs(logits - ref)))
    assert jnp.allclose(logits, ref, atol=1e-2, rtol=1e-2), f"max err {max_err}"

    print("KERNEL_OK")
</pallas_src>

<mosaic_0001>
module attributes {stable_mosaic.version = 11 : i64} {
  func.func @_attn_kernel(%arg0: i32, %arg1: memref<1x16x384xbf16, #tpu.memory_space<vmem>>, %arg2: memref<1x16x128xbf16, #tpu.memory_space<vmem>>) attributes {dimension_semantics = [#tpu.dimension_semantics<parallel>], iteration_bounds = array<i64: 2>, scalar_prefetch = 0 : i64, scratch_operands = 0 : i64, tpu.core_type = #tpu.core_type<tc>, window_params = [{transform_indices = @transform_0, window_bounds = array<i64: 1, 16, 384>}, {transform_indices = @transform_1, window_bounds = array<i64: 1, 16, 128>}]} {
    %c0 = arith.constant 0 : index
    %c0_0 = arith.constant 0 : index
    %c0_1 = arith.constant 0 : index
    %0 = vector.load %arg1[%c0, %c0_0, %c0_1] : memref<1x16x384xbf16, #tpu.memory_space<vmem>>, vector<1x16x384xbf16>
    %1 = vector.shape_cast %0 : vector<1x16x384xbf16> to vector<16x384xbf16>
    %2 = vector.extract_strided_slice %1 {offsets = [0, 0], sizes = [16, 32], strides = [1, 1]} : vector<16x384xbf16> to vector<16x32xbf16>
    %3 = vector.extract_strided_slice %1 {offsets = [0, 128], sizes = [16, 32], strides = [1, 1]} : vector<16x384xbf16> to vector<16x32xbf16>
    %4 = vector.extract_strided_slice %1 {offsets = [0, 256], sizes = [16, 32], strides = [1, 1]} : vector<16x384xbf16> to vector<16x32xbf16>
    %cst = arith.constant dense<0.000000e+00> : vector<16x16xf32>
    %5 = tpu.matmul %2, %3, %cst {dimension_numbers = #tpu.dot_dimension_numbers<[1], [1], [0], [0], [0, 0, 1, 0], [], []>} : vector<16x32xbf16>, vector<16x32xbf16>, vector<16x16xf32> -> vector<16x16xf32>
    %cst_2 = arith.constant 0.176776692 : f32
    %6 = vector.broadcast %cst_2 : f32 to vector<16x16xf32>
    %7 = arith.mulf %5, %6 : vector<16x16xf32>
    %cst_3 = arith.constant dense<0xFF800000> : vector<16xf32>
    %8 = vector.multi_reduction <maximumf>, %7, %cst_3 [1] : vector<16x16xf32> to vector<16xf32>
    %9 = vector.shape_cast %8 : vector<16xf32> to vector<16x1xf32>
    %10 = vector.broadcast %9 : vector<16x1xf32> to vector<16x16xf32>
    %11 = arith.subf %7, %10 : vector<16x16xf32>
    %12 = math.exp %11 : vector<16x16xf32>
    %cst_4 = arith.constant dense<0.000000e+00> : vector<16xf32>
    %13 = vector.multi_reduction <add>, %12, %cst_4 [1] : vector<16x16xf32> to vector<16xf32>
    %14 = vector.shape_cast %13 : vector<16xf32> to vector<16x1xf32>
    %15 = tpu.reciprocal %14 : vector<16x1xf32> -> vector<16x1xf32>
    %16 = vector.broadcast %15 : vector<16x1xf32> to vector<16x16xf32>
    %17 = arith.mulf %12, %16 : vector<16x16xf32>
    %18 = arith.truncf %17 : vector<16x16xf32> to vector<16x16xbf16>
    %cst_5 = arith.constant dense<0.000000e+00> : vector<16x32xf32>
    %19 = tpu.matmul %18, %4, %cst_5 {dimension_numbers = #tpu.dot_dimension_numbers<[1], [0], [0], [1], [0, 0, 1, 1], [], []>} : vector<16x16xbf16>, vector<16x32xbf16>, vector<16x32xf32> -> vector<16x32xf32>
    %20 = arith.truncf %19 : vector<16x32xf32> to vector<16x32xbf16>
    %c0_6 = arith.constant 0 : index
    %c0_7 = arith.constant 0 : index
    %c0_8 = arith.constant 0 : index
    %21 = vector.load %arg2[%c0_6, %c0_7, %c0_8] : memref<1x16x128xbf16, #tpu.memory_space<vmem>>, vector<1x16x32xbf16>
    %22 = vector.shape_cast %21 : vector<1x16x32xbf16> to vector<16x32xbf16>
    %23 = vector.shape_cast %20 : vector<16x32xbf16> to vector<1x16x32xbf16>
    tpu.vector_store %arg2[%c0_6, %c0_7, %c0_8], %23 {strides = array<i32>} : memref<1x16x128xbf16, #tpu.memory_space<vmem>>, vector<1x16x32xbf16>,
    %24 = vector.extract_strided_slice %1 {offsets = [0, 32], sizes = [16, 32], strides = [1, 1]} : vector<16x384xbf16> to vector<16x32xbf16>
    %25 = vector.extract_strided_slice %1 {offsets = [0, 160], sizes = [16, 32], strides = [1, 1]} : vector<16x384xbf16> to vector<16x32xbf16>
    %26 = vector.extract_strided_slice %1 {offsets = [0, 288], sizes = [16, 32], strides = [1, 1]} : vector<16x384xbf16> to vector<16x32xbf16>
    %cst_9 = arith.constant dense<0.000000e+00> : vector<16x16xf32>
    %27 = tpu.matmul %24, %25, %cst_9 {dimension_numbers = #tpu.dot_dimension_numbers<[1], [1], [0], [0], [0, 0, 1, 0], [], []>} : vector<16x32xbf16>, vector<16x32xbf16>, vector<16x16xf32> -> vector<16x16xf32>
    %cst_10 = arith.constant 0.176776692 : f32
    %28 = vector.broadcast %cst_10 : f32 to vector<16x16xf32>
    %29 = arith.mulf %27, %28 : vector<16x16xf32>
    %cst_11 = arith.constant dense<0xFF800000> : vector<16xf32>
    %30 = vector.multi_reduction <maximumf>, %29, %cst_11 [1] : vector<16x16xf32> to vector<16xf32>
    %31 = vector.shape_cast %30 : vector<16xf32> to vector<16x1xf32>
    %32 = vector.broadcast %31 : vector<16x1xf32> to vector<16x16xf32>
    %33 = arith.subf %29, %32 : vector<16x16xf32>
    %34 = math.exp %33 : vector<16x16xf32>
    %cst_12 = arith.constant dense<0.000000e+00> : vector<16xf32>
    %35 = vector.multi_reduction <add>, %34, %cst_12 [1] : vector<16x16xf32> to vector<16xf32>
    %36 = vector.shape_cast %35 : vector<16xf32> to vector<16x1xf32>
    %37 = tpu.reciprocal %36 : vector<16x1xf32> -> vector<16x1xf32>
    %38 = vector.broadcast %37 : vector<16x1xf32> to vector<16x16xf32>
    %39 = arith.mulf %34, %38 : vector<16x16xf32>
    %40 = arith.truncf %39 : vector<16x16xf32> to vector<16x16xbf16>
    %cst_13 = arith.constant dense<0.000000e+00> : vector<16x32xf32>
    %41 = tpu.matmul %40, %26, %cst_13 {dimension_numbers = #tpu.dot_dimension_numbers<[1], [0], [0], [1], [0, 0, 1, 1], [], []>} : vector<16x16xbf16>, vector<16x32xbf16>, vector<16x32xf32> -> vector<16x32xf32>
    %42 = arith.truncf %41 : vector<16x32xf32> to vector<16x32xbf16>
    %c0_14 = arith.constant 0 : index
    %c0_15 = arith.constant 0 : index
    %c32 = arith.constant 32 : index
    %43 = vector.load %arg2[%c0_14, %c0_15, %c32] : memref<1x16x128xbf16, #tpu.memory_space<vmem>>, vector<1x16x32xbf16>
    %44 = vector.shape_cast %43 : vector<1x16x32xbf16> to vector<16x32xbf16>
    %45 = vector.shape_cast %42 : vector<16x32xbf16> to vector<1x16x32xbf16>
    tpu.vector_store %arg2[%c0_14, %c0_15, %c32], %45 {strides = array<i32>} : memref<1x16x128xbf16, #tpu.memory_space<vmem>>, vector<1x16x32xbf16>,
    %46 = vector.extract_strided_slice %1 {offsets = [0, 64], sizes = [16, 32], strides = [1, 1]} : vector<16x384xbf16> to vector<16x32xbf16>
    %47 = vector.extract_strided_slice %1 {offsets = [0, 192], sizes = [16, 32], strides = [1, 1]} : vector<16x384xbf16> to vector<16x32xbf16>
    %48 = vector.extract_strided_slice %1 {offsets = [0, 320], sizes = [16, 32], strides = [1, 1]} : vector<16x384xbf16> to vector<16x32xbf16>
    %cst_16 = arith.constant dense<0.000000e+00> : vector<16x16xf32>
    %49 = tpu.matmul %46, %47, %cst_16 {dimension_numbers = #tpu.dot_dimension_numbers<[1], [1], [0], [0], [0, 0, 1, 0], [], []>} : vector<16x32xbf16>, vector<16x32xbf16>, vector<16x16xf32> -> vector<16x16xf32>
    %cst_17 = arith.constant 0.176776692 : f32
    %50 = vector.broadcast %cst_17 : f32 to vector<16x16xf32>
    %51 = arith.mulf %49, %50 : vector<16x16xf32>
    %cst_18 = arith.constant dense<0xFF800000> : vector<16xf32>
    %52 = vector.multi_reduction <maximumf>, %51, %cst_18 [1] : vector<16x16xf32> to vector<16xf32>
    %53 = vector.shape_cast %52 : vector<16xf32> to vector<16x1xf32>
    %54 = vector.broadcast %53 : vector<16x1xf32> to vector<16x16xf32>
    %55 = arith.subf %51, %54 : vector<16x16xf32>
    %56 = math.exp %55 : vector<16x16xf32>
    %cst_19 = arith.constant dense<0.000000e+00> : vector<16xf32>
    %57 = vector.multi_reduction <add>, %56, %cst_19 [1] : vector<16x16xf32> to vector<16xf32>
    %58 = vector.shape_cast %57 : vector<16xf32> to vector<16x1xf32>
    %59 = tpu.reciprocal %58 : vector<16x1xf32> -> vector<16x1xf32>
    %60 = vector.broadcast %59 : vector<16x1xf32> to vector<16x16xf32>
    %61 = arith.mulf %56, %60 : vector<16x16xf32>
    %62 = arith.truncf %61 : vector<16x16xf32> to vector<16x16xbf16>
    %cst_20 = arith.constant dense<0.000000e+00> : vector<16x32xf32>
    %63 = tpu.matmul %62, %48, %cst_20 {dimension_numbers = #tpu.dot_dimension_numbers<[1], [0], [0], [1], [0, 0, 1, 1], [], []>} : vector<16x16xbf16>, vector<16x32xbf16>, vector<16x32xf32> -> vector<16x32xf32>
    %64 = arith.truncf %63 : vector<16x32xf32> to vector<16x32xbf16>
    %c0_21 = arith.constant 0 : index
    %c0_22 = arith.constant 0 : index
    %c64 = arith.constant 64 : index
    %65 = vector.load %arg2[%c0_21, %c0_22, %c64] : memref<1x16x128xbf16, #tpu.memory_space<vmem>>, vector<1x16x32xbf16>
    %66 = vector.shape_cast %65 : vector<1x16x32xbf16> to vector<16x32xbf16>
    %67 = vector.shape_cast %64 : vector<16x32xbf16> to vector<1x16x32xbf16>
    tpu.vector_store %arg2[%c0_21, %c0_22, %c64], %67 {strides = array<i32>} : memref<1x16x128xbf16, #tpu.memory_space<vmem>>, vector<1x16x32xbf16>,
    %68 = vector.extract_strided_slice %1 {offsets = [0, 96], sizes = [16, 32], strides = [1, 1]} : vector<16x384xbf16> to vector<16x32xbf16>
    %69 = vector.extract_strided_slice %1 {offsets = [0, 224], sizes = [16, 32], strides = [1, 1]} : vector<16x384xbf16> to vector<16x32xbf16>
    %70 = vector.extract_strided_slice %1 {offsets = [0, 352], sizes = [16, 32], strides = [1, 1]} : vector<16x384xbf16> to vector<16x32xbf16>
    %cst_23 = arith.constant dense<0.000000e+00> : vector<16x16xf32>
    %71 = tpu.matmul %68, %69, %cst_23 {dimension_numbers = #tpu.dot_dimension_numbers<[1], [1], [0], [0], [0, 0, 1, 0], [], []>} : vector<16x32xbf16>, vector<16x32xbf16>, vector<16x16xf32> -> vector<16x16xf32>
    %cst_24 = arith.constant 0.176776692 : f32
    %72 = vector.broadcast %cst_24 : f32 to vector<16x16xf32>
    %73 = arith.mulf %71, %72 : vector<16x16xf32>
    %cst_25 = arith.constant dense<0xFF800000> : vector<16xf32>
    %74 = vector.multi_reduction <maximumf>, %73, %cst_25 [1] : vector<16x16xf32> to vector<16xf32>
    %75 = vector.shape_cast %74 : vector<16xf32> to vector<16x1xf32>
    %76 = vector.broadcast %75 : vector<16x1xf32> to vector<16x16xf32>
    %77 = arith.subf %73, %76 : vector<16x16xf32>
    %78 = math.exp %77 : vector<16x16xf32>
    %cst_26 = arith.constant dense<0.000000e+00> : vector<16xf32>
    %79 = vector.multi_reduction <add>, %78, %cst_26 [1] : vector<16x16xf32> to vector<16xf32>
    %80 = vector.shape_cast %79 : vector<16xf32> to vector<16x1xf32>
    %81 = tpu.reciprocal %80 : vector<16x1xf32> -> vector<16x1xf32>
    %82 = vector.broadcast %81 : vector<16x1xf32> to vector<16x16xf32>
    %83 = arith.mulf %78, %82 : vector<16x16xf32>
    %84 = arith.truncf %83 : vector<16x16xf32> to vector<16x16xbf16>
    %cst_27 = arith.constant dense<0.000000e+00> : vector<16x32xf32>
    %85 = tpu.matmul %84, %70, %cst_27 {dimension_numbers = #tpu.dot_dimension_numbers<[1], [0], [0], [1], [0, 0, 1, 1], [], []>} : vector<16x16xbf16>, vector<16x32xbf16>, vector<16x32xf32> -> vector<16x32xf32>
    %86 = arith.truncf %85 : vector<16x32xf32> to vector<16x32xbf16>
    %c0_28 = arith.constant 0 : index
    %c0_29 = arith.constant 0 : index
    %c96 = arith.constant 96 : index
    %87 = vector.load %arg2[%c0_28, %c0_29, %c96] : memref<1x16x128xbf16, #tpu.memory_space<vmem>>, vector<1x16x32xbf16>
    %88 = vector.shape_cast %87 : vector<1x16x32xbf16> to vector<16x32xbf16>
    %89 = vector.shape_cast %86 : vector<16x32xbf16> to vector<1x16x32xbf16>
    tpu.vector_store %arg2[%c0_28, %c0_29, %c96], %89 {strides = array<i32>} : memref<1x16x128xbf16, #tpu.memory_space<vmem>>, vector<1x16x32xbf16>,
    return
  }
  func.func @transform_0(%arg0: i32) -> (i32, i32, i32) {
    %c0_i32 = arith.constant 0 : i32
    %c0_i32_0 = arith.constant 0 : i32
    %c0_i32_1 = arith.constant 0 : i32
    return %arg0, %c0_i32, %c0_i32_0 : i32, i32, i32
  }
  func.func @transform_1(%arg0: i32) -> (i32, i32, i32) {
    %c0_i32 = arith.constant 0 : i32
    %c0_i32_0 = arith.constant 0 : i32
    %c0_i32_1 = arith.constant 0 : i32
    return %arg0, %c0_i32, %c0_i32_0 : i32, i32, i32
  }
}

module attributes {stable_mosaic.version = 11 : i64} {
  func.func @_ln_linear_kernel(%arg0: i32, %arg1: i32, %arg2: memref<32x128xf32, #tpu.memory_space<vmem>>, %arg3: memref<1x128xf32, #tpu.memory_space<vmem>>, %arg4: memref<1x128xf32, #tpu.memory_space<vmem>>, %arg5: memref<128x128xbf16, #tpu.memory_space<vmem>>, %arg6: memref<1x128xf32, #tpu.memory_space<vmem>>, %arg7: memref<32x128xbf16, #tpu.memory_space<vmem>>) attributes {dimension_semantics = [#tpu.dimension_semantics<parallel>, #tpu.dimension_semantics<parallel>], iteration_bounds = array<i64: 1, 3>, scalar_prefetch = 0 : i64, scratch_operands = 0 : i64, tpu.core_type = #tpu.core_type<tc>, window_params = [{transform_indices = @transform_0, window_bounds = array<i64: 32, 128>}, {pipeline_mode = #tpu.pipeline_mode<synchronous>, transform_indices = @transform_1, window_bounds = array<i64: 1, 128>}, {pipeline_mode = #tpu.pipeline_mode<synchronous>, transform_indices = @transform_2, window_bounds = array<i64: 1, 128>}, {transform_indices = @transform_3, window_bounds = array<i64: 128, 128>}, {transform_indices = @transform_4, window_bounds = array<i64: 1, 128>}, {transform_indices = @transform_5, window_bounds = array<i64: 32, 128>}]} {
    %c0 = arith.constant 0 : index
    %c0_0 = arith.constant 0 : index
    %0 = vector.load %arg2[%c0, %c0_0] : memref<32x128xf32, #tpu.memory_space<vmem>>, vector<32x128xf32>
    %c0_1 = arith.constant 0 : index
    %c0_2 = arith.constant 0 : index
    %1 = vector.load %arg3[%c0_1, %c0_2] : memref<1x128xf32, #tpu.memory_space<vmem>>, vector<1x128xf32>
    %c0_3 = arith.constant 0 : index
    %c0_4 = arith.constant 0 : index
    %2 = vector.load %arg4[%c0_3, %c0_4] : memref<1x128xf32, #tpu.memory_space<vmem>>, vector<1x128xf32>
    %cst = arith.constant dense<0.000000e+00> : vector<32xf32>
    %3 = vector.multi_reduction <add>, %0, %cst [1] : vector<32x128xf32> to vector<32xf32>
    %4 = vector.shape_cast %3 : vector<32xf32> to vector<32x1xf32>
    %cst_5 = arith.constant 1.280000e+02 : f32
    %5 = vector.broadcast %cst_5 : f32 to vector<32x1xf32>
    %6 = arith.divf %4, %5 : vector<32x1xf32>
    %7 = vector.broadcast %6 : vector<32x1xf32> to vector<32x128xf32>
    %8 = arith.subf %0, %7 : vector<32x128xf32>
    %9 = arith.mulf %8, %8 : vector<32x128xf32>
    %cst_6 = arith.constant dense<0.000000e+00> : vector<32xf32>
    %10 = vector.multi_reduction <add>, %9, %cst_6 [1] : vector<32x128xf32> to vector<32xf32>
    %11 = vector.shape_cast %10 : vector<32xf32> to vector<32x1xf32>
    %cst_7 = arith.constant 1.280000e+02 : f32
    %12 = vector.broadcast %cst_7 : f32 to vector<32x1xf32>
    %13 = arith.divf %11, %12 : vector<32x1xf32>
    %cst_8 = arith.constant 9.99999974E-6 : f32
    %14 = vector.broadcast %cst_8 : f32 to vector<32x1xf32>
    %15 = arith.addf %13, %14 : vector<32x1xf32>
    %16 = math.rsqrt %15 : vector<32x1xf32>
    %17 = vector.broadcast %16 : vector<32x1xf32> to vector<32x128xf32>
    %18 = vector.broadcast %1 : vector<1x128xf32> to vector<32x128xf32>
    %19 = arith.mulf %17, %18 : vector<32x128xf32>
    %20 = arith.mulf %8, %19 : vector<32x128xf32>
    %21 = vector.broadcast %2 : vector<1x128xf32> to vector<32x128xf32>
    %22 = arith.addf %20, %21 : vector<32x128xf32>
    %23 = arith.truncf %22 : vector<32x128xf32> to vector<32x128xbf16>
    %c0_9 = arith.constant 0 : index
    %c0_10 = arith.constant 0 : index
    %24 = vector.load %arg5[%c0_9, %c0_10] : memref<128x128xbf16, #tpu.memory_space<vmem>>, vector<128x128xbf16>
    %cst_11 = arith.constant dense<0.000000e+00> : vector<32x128xf32>
    %25 = tpu.matmul %23, %24, %cst_11 {dimension_numbers = #tpu.dot_dimension_numbers<[1], [0], [0], [1], [0, 0, 1, 1], [], []>} : vector<32x128xbf16>, vector<128x128xbf16>, vector<32x128xf32> -> vector<32x128xf32>
    %c0_12 = arith.constant 0 : index
    %c0_13 = arith.constant 0 : index
    %26 = vector.load %arg6[%c0_12, %c0_13] : memref<1x128xf32, #tpu.memory_space<vmem>>, vector<1x128xf32>
    %27 = vector.broadcast %26 : vector<1x128xf32> to vector<32x128xf32>
    %28 = arith.addf %25, %27 : vector<32x128xf32>
    %29 = arith.truncf %28 : vector<32x128xf32> to vector<32x128xbf16>
    %c0_14 = arith.constant 0 : index
    %c0_15 = arith.constant 0 : index
    %30 = vector.load %arg7[%c0_14, %c0_15] : memref<32x128xbf16, #tpu.memory_space<vmem>>, vector<32x128xbf16>
    tpu.vector_store %arg7[%c0_14, %c0_15], %29 {strides = array<i32>} : memref<32x128xbf16, #tpu.memory_space<vmem>>, vector<32x128xbf16>,
    return
  }
  func.func @transform_0(%arg0: i32, %arg1: i32) -> (i32, i32) {
    %c0_i32 = arith.constant 0 : i32
    %c0_i32_0 = arith.constant 0 : i32
    return %arg0, %c0_i32 : i32, i32
  }
  func.func @transform_1(%arg0: i32, %arg1: i32) -> (i32, i32) {
    %c0_i32 = arith.constant 0 : i32
    %c0_i32_0 = arith.constant 0 : i32
    %c0_i32_1 = arith.constant 0 : i32
    return %c0_i32, %c0_i32_0 : i32, i32
  }
  func.func @transform_2(%arg0: i32, %arg1: i32) -> (i32, i32) {
    %c0_i32 = arith.constant 0 : i32
    %c0_i32_0 = arith.constant 0 : i32
    %c0_i32_1 = arith.constant 0 : i32
    return %c0_i32, %c0_i32_0 : i32, i32
  }
  func.func @transform_3(%arg0: i32, %arg1: i32) -> (i32, i32) {
    %c0_i32 = arith.constant 0 : i32
    %c0_i32_0 = arith.constant 0 : i32
    return %c0_i32, %arg1 : i32, i32
  }
  func.func @transform_4(%arg0: i32, %arg1: i32) -> (i32, i32) {
    %c0_i32 = arith.constant 0 : i32
    %c0_i32_0 = arith.constant 0 : i32
    return %c0_i32, %arg1 : i32, i32
  }
  func.func @transform_5(%arg0: i32, %arg1: i32) -> (i32, i32) {
    %c0_i32 = arith.constant 0 : i32
    return %arg0, %arg1 : i32, i32
  }
}

module attributes {stable_mosaic.version = 11 : i64} {
  func.func @_ln_kernel(%arg0: i32, %arg1: memref<32x128xf32, #tpu.memory_space<vmem>>, %arg2: memref<1x128xf32, #tpu.memory_space<vmem>>, %arg3: memref<1x128xf32, #tpu.memory_space<vmem>>, %arg4: memref<32x128xf32, #tpu.memory_space<vmem>>) attributes {dimension_semantics = [#tpu.dimension_semantics<parallel>], iteration_bounds = array<i64: 1>, scalar_prefetch = 0 : i64, scratch_operands = 0 : i64, tpu.core_type = #tpu.core_type<tc>, window_params = [{transform_indices = @transform_0, window_bounds = array<i64: 32, 128>}, {pipeline_mode = #tpu.pipeline_mode<synchronous>, transform_indices = @transform_1, window_bounds = array<i64: 1, 128>}, {pipeline_mode = #tpu.pipeline_mode<synchronous>, transform_indices = @transform_2, window_bounds = array<i64: 1, 128>}, {transform_indices = @transform_3, window_bounds = array<i64: 32, 128>}]} {
    %c0 = arith.constant 0 : index
    %c0_0 = arith.constant 0 : index
    %0 = vector.load %arg1[%c0, %c0_0] : memref<32x128xf32, #tpu.memory_space<vmem>>, vector<32x128xf32>
    %c0_1 = arith.constant 0 : index
    %c0_2 = arith.constant 0 : index
    %1 = vector.load %arg2[%c0_1, %c0_2] : memref<1x128xf32, #tpu.memory_space<vmem>>, vector<1x128xf32>
    %c0_3 = arith.constant 0 : index
    %c0_4 = arith.constant 0 : index
    %2 = vector.load %arg3[%c0_3, %c0_4] : memref<1x128xf32, #tpu.memory_space<vmem>>, vector<1x128xf32>
    %cst = arith.constant dense<0.000000e+00> : vector<32xf32>
    %3 = vector.multi_reduction <add>, %0, %cst [1] : vector<32x128xf32> to vector<32xf32>
    %4 = vector.shape_cast %3 : vector<32xf32> to vector<32x1xf32>
    %cst_5 = arith.constant 1.280000e+02 : f32
    %5 = vector.broadcast %cst_5 : f32 to vector<32x1xf32>
    %6 = arith.divf %4, %5 : vector<32x1xf32>
    %7 = vector.broadcast %6 : vector<32x1xf32> to vector<32x128xf32>
    %8 = arith.subf %0, %7 : vector<32x128xf32>
    %9 = arith.mulf %8, %8 : vector<32x128xf32>
    %cst_6 = arith.constant dense<0.000000e+00> : vector<32xf32>
    %10 = vector.multi_reduction <add>, %9, %cst_6 [1] : vector<32x128xf32> to vector<32xf32>
    %11 = vector.shape_cast %10 : vector<32xf32> to vector<32x1xf32>
    %cst_7 = arith.constant 1.280000e+02 : f32
    %12 = vector.broadcast %cst_7 : f32 to vector<32x1xf32>
    %13 = arith.divf %11, %12 : vector<32x1xf32>
    %cst_8 = arith.constant 9.99999974E-6 : f32
    %14 = vector.broadcast %cst_8 : f32 to vector<32x1xf32>
    %15 = arith.addf %13, %14 : vector<32x1xf32>
    %16 = math.rsqrt %15 : vector<32x1xf32>
    %17 = vector.broadcast %16 : vector<32x1xf32> to vector<32x128xf32>
    %18 = vector.broadcast %1 : vector<1x128xf32> to vector<32x128xf32>
    %19 = arith.mulf %17, %18 : vector<32x128xf32>
    %20 = arith.mulf %8, %19 : vector<32x128xf32>
    %21 = vector.broadcast %2 : vector<1x128xf32> to vector<32x128xf32>
    %22 = arith.addf %20, %21 : vector<32x128xf32>
    %c0_9 = arith.constant 0 : index
    %c0_10 = arith.constant 0 : index
    %23 = vector.load %arg4[%c0_9, %c0_10] : memref<32x128xf32, #tpu.memory_space<vmem>>, vector<32x128xf32>
    tpu.vector_store %arg4[%c0_9, %c0_10], %22 {strides = array<i32>} : memref<32x128xf32, #tpu.memory_space<vmem>>, vector<32x128xf32>,
    return
  }
  func.func @transform_0(%arg0: i32) -> (i32, i32) {
    %c0_i32 = arith.constant 0 : i32
    %c0_i32_0 = arith.constant 0 : i32
    return %arg0, %c0_i32 : i32, i32
  }
  func.func @transform_1(%arg0: i32) -> (i32, i32) {
    %c0_i32 = arith.constant 0 : i32
    %c0_i32_0 = arith.constant 0 : i32
    %c0_i32_1 = arith.constant 0 : i32
    return %c0_i32, %c0_i32_0 : i32, i32
  }
  func.func @transform_2(%arg0: i32) -> (i32, i32) {
    %c0_i32 = arith.constant 0 : i32
    %c0_i32_0 = arith.constant 0 : i32
    %c0_i32_1 = arith.constant 0 : i32
    return %c0_i32, %c0_i32_0 : i32, i32
  }
  func.func @transform_3(%arg0: i32) -> (i32, i32) {
    %c0_i32 = arith.constant 0 : i32
    %c0_i32_0 = arith.constant 0 : i32
    return %arg0, %c0_i32 : i32, i32
  }
}

module attributes {stable_mosaic.version = 11 : i64} {
  func.func @_linear_resid_kernel(%arg0: i32, %arg1: i32, %arg2: memref<32x128xbf16, #tpu.memory_space<vmem>>, %arg3: memref<128x128xbf16, #tpu.memory_space<vmem>>, %arg4: memref<1x128xf32, #tpu.memory_space<vmem>>, %arg5: memref<32x128xf32, #tpu.memory_space<vmem>>, %arg6: memref<32x128xf32, #tpu.memory_space<vmem>>) attributes {dimension_semantics = [#tpu.dimension_semantics<parallel>, #tpu.dimension_semantics<parallel>], iteration_bounds = array<i64: 1, 1>, scalar_prefetch = 0 : i64, scratch_operands = 0 : i64, tpu.core_type = #tpu.core_type<tc>, window_params = [{transform_indices = @transform_0, window_bounds = array<i64: 32, 128>}, {transform_indices = @transform_1, window_bounds = array<i64: 128, 128>}, {transform_indices = @transform_2, window_bounds = array<i64: 1, 128>}, {transform_indices = @transform_3, window_bounds = array<i64: 32, 128>}, {transform_indices = @transform_4, window_bounds = array<i64: 32, 128>}]} {
    %c0 = arith.constant 0 : index
    %c0_0 = arith.constant 0 : index
    %0 = vector.load %arg2[%c0, %c0_0] : memref<32x128xbf16, #tpu.memory_space<vmem>>, vector<32x128xbf16>
    %c0_1 = arith.constant 0 : index
    %c0_2 = arith.constant 0 : index
    %1 = vector.load %arg3[%c0_1, %c0_2] : memref<128x128xbf16, #tpu.memory_space<vmem>>, vector<128x128xbf16>
    %cst = arith.constant dense<0.000000e+00> : vector<32x128xf32>
    %2 = tpu.matmul %0, %1, %cst {dimension_numbers = #tpu.dot_dimension_numbers<[1], [0], [0], [1], [0, 0, 1, 1], [], []>} : vector<32x128xbf16>, vector<128x128xbf16>, vector<32x128xf32> -> vector<32x128xf32>
    %c0_3 = arith.constant 0 : index
    %c0_4 = arith.constant 0 : index
    %3 = vector.load %arg4[%c0_3, %c0_4] : memref<1x128xf32, #tpu.memory_space<vmem>>, vector<1x128xf32>
    %4 = vector.broadcast %3 : vector<1x128xf32> to vector<32x128xf32>
    %5 = arith.addf %2, %4 : vector<32x128xf32>
    %c0_5 = arith.constant 0 : index
    %c0_6 = arith.constant 0 : index
    %6 = vector.load %arg5[%c0_5, %c0_6] : memref<32x128xf32, #tpu.memory_space<vmem>>, vector<32x128xf32>
    %7 = arith.addf %6, %5 : vector<32x128xf32>
    %c0_7 = arith.constant 0 : index
    %c0_8 = arith.constant 0 : index
    %8 = vector.load %arg6[%c0_7, %c0_8] : memref<32x128xf32, #tpu.memory_space<vmem>>, vector<32x128xf32>
    tpu.vector_store %arg6[%c0_7, %c0_8], %7 {strides = array<i32>} : memref<32x128xf32, #tpu.memory_space<vmem>>, vector<32x128xf32>,
    return
  }
  func.func @transform_0(%arg0: i32, %arg1: i32) -> (i32, i32) {
    %c0_i32 = arith.constant 0 : i32
    %c0_i32_0 = arith.constant 0 : i32
    return %arg0, %c0_i32 : i32, i32
  }
  func.func @transform_1(%arg0: i32, %arg1: i32) -> (i32, i32) {
    %c0_i32 = arith.constant 0 : i32
    %c0_i32_0 = arith.constant 0 : i32
    return %c0_i32, %arg1 : i32, i32
  }
  func.func @transform_2(%arg0: i32, %arg1: i32) -> (i32, i32) {
    %c0_i32 = arith.constant 0 : i32
    %c0_i32_0 = arith.constant 0 : i32
    return %c0_i32, %arg1 : i32, i32
  }
  func.func @transform_3(%arg0: i32, %arg1: i32) -> (i32, i32) {
    %c0_i32 = arith.constant 0 : i32
    return %arg0, %arg1 : i32, i32
  }
  func.func @transform_4(%arg0: i32, %arg1: i32) -> (i32, i32) {
    %c0_i32 = arith.constant 0 : i32
    return %arg0, %arg1 : i32, i32
  }
}

module attributes {stable_mosaic.version = 11 : i64} {
  func.func @_ln_linear_kernel(%arg0: i32, %arg1: i32, %arg2: memref<32x128xf32, #tpu.memory_space<vmem>>, %arg3: memref<1x128xf32, #tpu.memory_space<vmem>>, %arg4: memref<1x128xf32, #tpu.memory_space<vmem>>, %arg5: memref<128x256xbf16, #tpu.memory_space<vmem>>, %arg6: memref<1x256xf32, #tpu.memory_space<vmem>>, %arg7: memref<32x256xbf16, #tpu.memory_space<vmem>>) attributes {dimension_semantics = [#tpu.dimension_semantics<parallel>, #tpu.dimension_semantics<parallel>], iteration_bounds = array<i64: 1, 2>, scalar_prefetch = 0 : i64, scratch_operands = 0 : i64, tpu.core_type = #tpu.core_type<tc>, window_params = [{transform_indices = @transform_0, window_bounds = array<i64: 32, 128>}, {pipeline_mode = #tpu.pipeline_mode<synchronous>, transform_indices = @transform_1, window_bounds = array<i64: 1, 128>}, {pipeline_mode = #tpu.pipeline_mode<synchronous>, transform_indices = @transform_2, window_bounds = array<i64: 1, 128>}, {transform_indices = @transform_3, window_bounds = array<i64: 128, 256>}, {transform_indices = @transform_4, window_bounds = array<i64: 1, 256>}, {transform_indices = @transform_5, window_bounds = array<i64: 32, 256>}]} {
    %c0 = arith.constant 0 : index
    %c0_0 = arith.constant 0 : index
    %0 = vector.load %arg2[%c0, %c0_0] : memref<32x128xf32, #tpu.memory_space<vmem>>, vector<32x128xf32>
    %c0_1 = arith.constant 0 : index
    %c0_2 = arith.constant 0 : index
    %1 = vector.load %arg3[%c0_1, %c0_2] : memref<1x128xf32, #tpu.memory_space<vmem>>, vector<1x128xf32>
    %c0_3 = arith.constant 0 : index
    %c0_4 = arith.constant 0 : index
    %2 = vector.load %arg4[%c0_3, %c0_4] : memref<1x128xf32, #tpu.memory_space<vmem>>, vector<1x128xf32>
    %cst = arith.constant dense<0.000000e+00> : vector<32xf32>
    %3 = vector.multi_reduction <add>, %0, %cst [1] : vector<32x128xf32> to vector<32xf32>
    %4 = vector.shape_cast %3 : vector<32xf32> to vector<32x1xf32>
    %cst_5 = arith.constant 1.280000e+02 : f32
    %5 = vector.broadcast %cst_5 : f32 to vector<32x1xf32>
    %6 = arith.divf %4, %5 : vector<32x1xf32>
    %7 = vector.broadcast %6 : vector<32x1xf32> to vector<32x128xf32>
    %8 = arith.subf %0, %7 : vector<32x128xf32>
    %9 = arith.mulf %8, %8 : vector<32x128xf32>
    %cst_6 = arith.constant dense<0.000000e+00> : vector<32xf32>
    %10 = vector.multi_reduction <add>, %9, %cst_6 [1] : vector<32x128xf32> to vector<32xf32>
    %11 = vector.shape_cast %10 : vector<32xf32> to vector<32x1xf32>
    %cst_7 = arith.constant 1.280000e+02 : f32
    %12 = vector.broadcast %cst_7 : f32 to vector<32x1xf32>
    %13 = arith.divf %11, %12 : vector<32x1xf32>
    %cst_8 = arith.constant 9.99999974E-6 : f32
    %14 = vector.broadcast %cst_8 : f32 to vector<32x1xf32>
    %15 = arith.addf %13, %14 : vector<32x1xf32>
    %16 = math.rsqrt %15 : vector<32x1xf32>
    %17 = vector.broadcast %16 : vector<32x1xf32> to vector<32x128xf32>
    %18 = vector.broadcast %1 : vector<1x128xf32> to vector<32x128xf32>
    %19 = arith.mulf %17, %18 : vector<32x128xf32>
    %20 = arith.mulf %8, %19 : vector<32x128xf32>
    %21 = vector.broadcast %2 : vector<1x128xf32> to vector<32x128xf32>
    %22 = arith.addf %20, %21 : vector<32x128xf32>
    %23 = arith.truncf %22 : vector<32x128xf32> to vector<32x128xbf16>
    %c0_9 = arith.constant 0 : index
    %c0_10 = arith.constant 0 : index
    %24 = vector.load %arg5[%c0_9, %c0_10] : memref<128x256xbf16, #tpu.memory_space<vmem>>, vector<128x256xbf16>
    %cst_11 = arith.constant dense<0.000000e+00> : vector<32x256xf32>
    %25 = tpu.matmul %23, %24, %cst_11 {dimension_numbers = #tpu.dot_dimension_numbers<[1], [0], [0], [1], [0, 0, 1, 1], [], []>} : vector<32x128xbf16>, vector<128x256xbf16>, vector<32x256xf32> -> vector<32x256xf32>
    %c0_12 = arith.constant 0 : index
    %c0_13 = arith.constant 0 : index
    %26 = vector.load %arg6[%c0_12, %c0_13] : memref<1x256xf32, #tpu.memory_space<vmem>>, vector<1x256xf32>
    %27 = vector.broadcast %26 : vector<1x256xf32> to vector<32x256xf32>
    %28 = arith.addf %25, %27 : vector<32x256xf32>
    %cst_14 = arith.constant 5.000000e-01 : f32
    %29 = vector.broadcast %cst_14 : f32 to vector<32x256xf32>
    %30 = arith.mulf %29, %28 : vector<32x256xf32>
    %cst_15 = arith.constant 0.707106769 : f32
    %31 = vector.broadcast %cst_15 : f32 to vector<32x256xf32>
    %32 = arith.mulf %28, %31 : vector<32x256xf32>
    %33 = math.erf %32 : vector<32x256xf32>
    %cst_16 = arith.constant 1.000000e+00 : f32
    %34 = vector.broadcast %cst_16 : f32 to vector<32x256xf32>
    %35 = arith.addf %34, %33 : vector<32x256xf32>
    %36 = arith.mulf %30, %35 : vector<32x256xf32>
    %37 = arith.truncf %36 : vector<32x256xf32> to vector<32x256xbf16>
    %c0_17 = arith.constant 0 : index
    %c0_18 = arith.constant 0 : index
    %38 = vector.load %arg7[%c0_17, %c0_18] : memref<32x256xbf16, #tpu.memory_space<vmem>>, vector<32x256xbf16>
    tpu.vector_store %arg7[%c0_17, %c0_18], %37 {strides = array<i32>} : memref<32x256xbf16, #tpu.memory_space<vmem>>, vector<32x256xbf16>,
    return
  }
  func.func @transform_0(%arg0: i32, %arg1: i32) -> (i32, i32) {
    %c0_i32 = arith.constant 0 : i32
    %c0_i32_0 = arith.constant 0 : i32
    return %arg0, %c0_i32 : i32, i32
  }
  func.func @transform_1(%arg0: i32, %arg1: i32) -> (i32, i32) {
    %c0_i32 = arith.constant 0 : i32
    %c0_i32_0 = arith.constant 0 : i32
    %c0_i32_1 = arith.constant 0 : i32
    return %c0_i32, %c0_i32_0 : i32, i32
  }
  func.func @transform_2(%arg0: i32, %arg1: i32) -> (i32, i32) {
    %c0_i32 = arith.constant 0 : i32
    %c0_i32_0 = arith.constant 0 : i32
    %c0_i32_1 = arith.constant 0 : i32
    return %c0_i32, %c0_i32_0 : i32, i32
  }
  func.func @transform_3(%arg0: i32, %arg1: i32) -> (i32, i32) {
    %c0_i32 = arith.constant 0 : i32
    %c0_i32_0 = arith.constant 0 : i32
    return %c0_i32, %arg1 : i32, i32
  }
  func.func @transform_4(%arg0: i32, %arg1: i32) -> (i32, i32) {
    %c0_i32 = arith.constant 0 : i32
    %c0_i32_0 = arith.constant 0 : i32
    return %c0_i32, %arg1 : i32, i32
  }
  func.func @transform_5(%arg0: i32, %arg1: i32) -> (i32, i32) {
    %c0_i32 = arith.constant 0 : i32
    return %arg0, %arg1 : i32, i32
  }
}

module attributes {stable_mosaic.version = 11 : i64} {
  func.func @_head_kernel(%arg0: i32, %arg1: i32, %arg2: memref<1x16x128xbf16, #tpu.memory_space<vmem>>, %arg3: memref<128x128xbf16, #tpu.memory_space<vmem>>, %arg4: memref<16x128xf32, #tpu.memory_space<vmem>>, %arg5: memref<1x16x128xf32, #tpu.memory_space<vmem>>) attributes {dimension_semantics = [#tpu.dimension_semantics<parallel>, #tpu.dimension_semantics<parallel>], iteration_bounds = array<i64: 2, 2>, scalar_prefetch = 0 : i64, scratch_operands = 0 : i64, tpu.core_type = #tpu.core_type<tc>, window_params = [{transform_indices = @transform_0, window_bounds = array<i64: 1, 16, 128>}, {transform_indices = @transform_1, window_bounds = array<i64: 128, 128>}, {transform_indices = @transform_2, window_bounds = array<i64: 16, 128>}, {transform_indices = @transform_3, window_bounds = array<i64: 1, 16, 128>}]} {
    %c0 = arith.constant 0 : index
    %c0_0 = arith.constant 0 : index
    %c0_1 = arith.constant 0 : index
    %0 = vector.load %arg2[%c0, %c0_0, %c0_1] : memref<1x16x128xbf16, #tpu.memory_space<vmem>>, vector<1x16x128xbf16>
    %1 = vector.shape_cast %0 : vector<1x16x128xbf16> to vector<16x128xbf16>
    %c0_2 = arith.constant 0 : index
    %c0_3 = arith.constant 0 : index
    %2 = vector.load %arg3[%c0_2, %c0_3] : memref<128x128xbf16, #tpu.memory_space<vmem>>, vector<128x128xbf16>
    %cst = arith.constant dense<0.000000e+00> : vector<16x128xf32>
    %3 = tpu.matmul %1, %2, %cst {dimension_numbers = #tpu.dot_dimension_numbers<[1], [0], [0], [1], [0, 0, 1, 1], [], []>} : vector<16x128xbf16>, vector<128x128xbf16>, vector<16x128xf32> -> vector<16x128xf32>
    %c0_4 = arith.constant 0 : index
    %c0_5 = arith.constant 0 : index
    %4 = vector.load %arg4[%c0_4, %c0_5] : memref<16x128xf32, #tpu.memory_space<vmem>>, vector<16x128xf32>
    %5 = arith.addf %3, %4 : vector<16x128xf32>
    %c0_6 = arith.constant 0 : index
    %c0_7 = arith.constant 0 : index
    %c0_8 = arith.constant 0 : index
    %6 = vector.load %arg5[%c0_6, %c0_7, %c0_8] : memref<1x16x128xf32, #tpu.memory_space<vmem>>, vector<1x16x128xf32>
    %7 = vector.shape_cast %6 : vector<1x16x128xf32> to vector<16x128xf32>
    %8 = vector.shape_cast %5 : vector<16x128xf32> to vector<1x16x128xf32>
    tpu.vector_store %arg5[%c0_6, %c0_7, %c0_8], %8 {strides = array<i32>} : memref<1x16x128xf32, #tpu.memory_space<vmem>>, vector<1x16x128xf32>,
    return
  }
  func.func @transform_0(%arg0: i32, %arg1: i32) -> (i32, i32, i32) {
    %c0_i32 = arith.constant 0 : i32
    %c0_i32_0 = arith.constant 0 : i32
    %c0_i32_1 = arith.constant 0 : i32
    return %arg0, %c0_i32, %c0_i32_0 : i32, i32, i32
  }
  func.func @transform_1(%arg0: i32, %arg1: i32) -> (i32, i32) {
    %c0_i32 = arith.constant 0 : i32
    %c0_i32_0 = arith.constant 0 : i32
    return %c0_i32, %arg1 : i32, i32
  }
  func.func @transform_2(%arg0: i32, %arg1: i32) -> (i32, i32) {
    %c0_i32 = arith.constant 0 : i32
    %c0_i32_0 = arith.constant 0 : i32
    return %c0_i32, %arg1 : i32, i32
  }
  func.func @transform_3(%arg0: i32, %arg1: i32) -> (i32, i32, i32) {
    %c0_i32 = arith.constant 0 : i32
    %c0_i32_0 = arith.constant 0 : i32
    return %arg0, %c0_i32, %arg1 : i32, i32, i32
  }
}

module attributes {stable_mosaic.version = 11 : i64} {
  func.func @_linear_resid_kernel(%arg0: i32, %arg1: i32, %arg2: memref<32x512xbf16, #tpu.memory_space<vmem>>, %arg3: memref<512x128xbf16, #tpu.memory_space<vmem>>, %arg4: memref<1x128xf32, #tpu.memory_space<vmem>>, %arg5: memref<32x128xf32, #tpu.memory_space<vmem>>, %arg6: memref<32x128xf32, #tpu.memory_space<vmem>>) attributes {dimension_semantics = [#tpu.dimension_semantics<parallel>, #tpu.dimension_semantics<parallel>], iteration_bounds = array<i64: 1, 1>, scalar_prefetch = 0 : i64, scratch_operands = 0 : i64, tpu.core_type = #tpu.core_type<tc>, window_params = [{transform_indices = @transform_0, window_bounds = array<i64: 32, 512>}, {transform_indices = @transform_1, window_bounds = array<i64: 512, 128>}, {transform_indices = @transform_2, window_bounds = array<i64: 1, 128>}, {transform_indices = @transform_3, window_bounds = array<i64: 32, 128>}, {transform_indices = @transform_4, window_bounds = array<i64: 32, 128>}]} {
    %c0 = arith.constant 0 : index
    %c0_0 = arith.constant 0 : index
    %0 = vector.load %arg2[%c0, %c0_0] : memref<32x512xbf16, #tpu.memory_space<vmem>>, vector<32x512xbf16>
    %c0_1 = arith.constant 0 : index
    %c0_2 = arith.constant 0 : index
    %1 = vector.load %arg3[%c0_1, %c0_2] : memref<512x128xbf16, #tpu.memory_space<vmem>>, vector<512x128xbf16>
    %cst = arith.constant dense<0.000000e+00> : vector<32x128xf32>
    %2 = tpu.matmul %0, %1, %cst {dimension_numbers = #tpu.dot_dimension_numbers<[1], [0], [0], [1], [0, 0, 1, 1], [], []>} : vector<32x512xbf16>, vector<512x128xbf16>, vector<32x128xf32> -> vector<32x128xf32>
    %c0_3 = arith.constant 0 : index
    %c0_4 = arith.constant 0 : index
    %3 = vector.load %arg4[%c0_3, %c0_4] : memref<1x128xf32, #tpu.memory_space<vmem>>, vector<1x128xf32>
    %4 = vector.broadcast %3 : vector<1x128xf32> to vector<32x128xf32>
    %5 = arith.addf %2, %4 : vector<32x128xf32>
    %c0_5 = arith.constant 0 : index
    %c0_6 = arith.constant 0 : index
    %6 = vector.load %arg5[%c0_5, %c0_6] : memref<32x128xf32, #tpu.memory_space<vmem>>, vector<32x128xf32>
    %7 = arith.addf %6, %5 : vector<32x128xf32>
    %c0_7 = arith.constant 0 : index
    %c0_8 = arith.constant 0 : index
    %8 = vector.load %arg6[%c0_7, %c0_8] : memref<32x128xf32, #tpu.memory_space<vmem>>, vector<32x128xf32>
    tpu.vector_store %arg6[%c0_7, %c0_8], %7 {strides = array<i32>} : memref<32x128xf32, #tpu.memory_space<vmem>>, vector<32x128xf32>,
    return
  }
  func.func @transform_0(%arg0: i32, %arg1: i32) -> (i32, i32) {
    %c0_i32 = arith.constant 0 : i32
    %c0_i32_0 = arith.constant 0 : i32
    return %arg0, %c0_i32 : i32, i32
  }
  func.func @transform_1(%arg0: i32, %arg1: i32) -> (i32, i32) {
    %c0_i32 = arith.constant 0 : i32
    %c0_i32_0 = arith.constant 0 : i32
    return %c0_i32, %arg1 : i32, i32
  }
  func.func @transform_2(%arg0: i32, %arg1: i32) -> (i32, i32) {
    %c0_i32 = arith.constant 0 : i32
    %c0_i32_0 = arith.constant 0 : i32
    return %c0_i32, %arg1 : i32, i32
  }
  func.func @transform_3(%arg0: i32, %arg1: i32) -> (i32, i32) {
    %c0_i32 = arith.constant 0 : i32
    return %arg0, %arg1 : i32, i32
  }
  func.func @transform_4(%arg0: i32, %arg1: i32) -> (i32, i32) {
    %c0_i32 = arith.constant 0 : i32
    return %arg0, %arg1 : i32, i32
  }
}

module attributes {stable_mosaic.version = 11 : i64} {
  func.func @_mlm_kernel(%arg0: i32, %arg1: memref<32x128xf32, #tpu.memory_space<vmem>>, %arg2: memref<128x128xbf16, #tpu.memory_space<vmem>>, %arg3: memref<1x128xf32, #tpu.memory_space<vmem>>, %arg4: memref<1x128xf32, #tpu.memory_space<vmem>>, %arg5: memref<1x128xf32, #tpu.memory_space<vmem>>, %arg6: memref<32x128xbf16, #tpu.memory_space<vmem>>) attributes {dimension_semantics = [#tpu.dimension_semantics<parallel>], iteration_bounds = array<i64: 1>, scalar_prefetch = 0 : i64, scratch_operands = 0 : i64, tpu.core_type = #tpu.core_type<tc>, window_params = [{transform_indices = @transform_0, window_bounds = array<i64: 32, 128>}, {pipeline_mode = #tpu.pipeline_mode<synchronous>, transform_indices = @transform_1, window_bounds = array<i64: 128, 128>}, {pipeline_mode = #tpu.pipeline_mode<synchronous>, transform_indices = @transform_2, window_bounds = array<i64: 1, 128>}, {pipeline_mode = #tpu.pipeline_mode<synchronous>, transform_indices = @transform_3, window_bounds = array<i64: 1, 128>}, {pipeline_mode = #tpu.pipeline_mode<synchronous>, transform_indices = @transform_4, window_bounds = array<i64: 1, 128>}, {transform_indices = @transform_5, window_bounds = array<i64: 32, 128>}]} {
    %c0 = arith.constant 0 : index
    %c0_0 = arith.constant 0 : index
    %0 = vector.load %arg1[%c0, %c0_0] : memref<32x128xf32, #tpu.memory_space<vmem>>, vector<32x128xf32>
    %1 = arith.truncf %0 : vector<32x128xf32> to vector<32x128xbf16>
    %c0_1 = arith.constant 0 : index
    %c0_2 = arith.constant 0 : index
    %2 = vector.load %arg2[%c0_1, %c0_2] : memref<128x128xbf16, #tpu.memory_space<vmem>>, vector<128x128xbf16>
    %cst = arith.constant dense<0.000000e+00> : vector<32x128xf32>
    %3 = tpu.matmul %1, %2, %cst {dimension_numbers = #tpu.dot_dimension_numbers<[1], [0], [0], [1], [0, 0, 1, 1], [], []>} : vector<32x128xbf16>, vector<128x128xbf16>, vector<32x128xf32> -> vector<32x128xf32>
    %c0_3 = arith.constant 0 : index
    %c0_4 = arith.constant 0 : index
    %4 = vector.load %arg3[%c0_3, %c0_4] : memref<1x128xf32, #tpu.memory_space<vmem>>, vector<1x128xf32>
    %5 = vector.broadcast %4 : vector<1x128xf32> to vector<32x128xf32>
    %6 = arith.addf %3, %5 : vector<32x128xf32>
    %cst_5 = arith.constant 5.000000e-01 : f32
    %7 = vector.broadcast %cst_5 : f32 to vector<32x128xf32>
    %8 = arith.mulf %7, %6 : vector<32x128xf32>
    %cst_6 = arith.constant 0.707106769 : f32
    %9 = vector.broadcast %cst_6 : f32 to vector<32x128xf32>
    %10 = arith.mulf %6, %9 : vector<32x128xf32>
    %11 = math.erf %10 : vector<32x128xf32>
    %cst_7 = arith.constant 1.000000e+00 : f32
    %12 = vector.broadcast %cst_7 : f32 to vector<32x128xf32>
    %13 = arith.addf %12, %11 : vector<32x128xf32>
    %14 = arith.mulf %8, %13 : vector<32x128xf32>
    %c0_8 = arith.constant 0 : index
    %c0_9 = arith.constant 0 : index
    %15 = vector.load %arg4[%c0_8, %c0_9] : memref<1x128xf32, #tpu.memory_space<vmem>>, vector<1x128xf32>
    %c0_10 = arith.constant 0 : index
    %c0_11 = arith.constant 0 : index
    %16 = vector.load %arg5[%c0_10, %c0_11] : memref<1x128xf32, #tpu.memory_space<vmem>>, vector<1x128xf32>
    %cst_12 = arith.constant dense<0.000000e+00> : vector<32xf32>
    %17 = vector.multi_reduction <add>, %14, %cst_12 [1] : vector<32x128xf32> to vector<32xf32>
    %18 = vector.shape_cast %17 : vector<32xf32> to vector<32x1xf32>
    %cst_13 = arith.constant 1.280000e+02 : f32
    %19 = vector.broadcast %cst_13 : f32 to vector<32x1xf32>
    %20 = arith.divf %18, %19 : vector<32x1xf32>
    %21 = vector.broadcast %20 : vector<32x1xf32> to vector<32x128xf32>
    %22 = arith.subf %14, %21 : vector<32x128xf32>
    %23 = arith.mulf %22, %22 : vector<32x128xf32>
    %cst_14 = arith.constant dense<0.000000e+00> : vector<32xf32>
    %24 = vector.multi_reduction <add>, %23, %cst_14 [1] : vector<32x128xf32> to vector<32xf32>
    %25 = vector.shape_cast %24 : vector<32xf32> to vector<32x1xf32>
    %cst_15 = arith.constant 1.280000e+02 : f32
    %26 = vector.broadcast %cst_15 : f32 to vector<32x1xf32>
    %27 = arith.divf %25, %26 : vector<32x1xf32>
    %cst_16 = arith.constant 9.99999974E-6 : f32
    %28 = vector.broadcast %cst_16 : f32 to vector<32x1xf32>
    %29 = arith.addf %27, %28 : vector<32x1xf32>
    %30 = math.rsqrt %29 : vector<32x1xf32>
    %31 = vector.broadcast %30 : vector<32x1xf32> to vector<32x128xf32>
    %32 = vector.broadcast %15 : vector<1x128xf32> to vector<32x128xf32>
    %33 = arith.mulf %31, %32 : vector<32x128xf32>
    %34 = arith.mulf %22, %33 : vector<32x128xf32>
    %35 = vector.broadcast %16 : vector<1x128xf32> to vector<32x128xf32>
    %36 = arith.addf %34, %35 : vector<32x128xf32>
    %37 = arith.truncf %36 : vector<32x128xf32> to vector<32x128xbf16>
    %c0_17 = arith.constant 0 : index
    %c0_18 = arith.constant 0 : index
    %38 = vector.load %arg6[%c0_17, %c0_18] : memref<32x128xbf16, #tpu.memory_space<vmem>>, vector<32x128xbf16>
    tpu.vector_store %arg6[%c0_17, %c0_18], %37 {strides = array<i32>} : memref<32x128xbf16, #tpu.memory_space<vmem>>, vector<32x128xbf16>,
    return
  }
  func.func @transform_0(%arg0: i32) -> (i32, i32) {
    %c0_i32 = arith.constant 0 : i32
    %c0_i32_0 = arith.constant 0 : i32
    return %arg0, %c0_i32 : i32, i32
  }
  func.func @transform_1(%arg0: i32) -> (i32, i32) {
    %c0_i32 = arith.constant 0 : i32
    %c0_i32_0 = arith.constant 0 : i32
    %c0_i32_1 = arith.constant 0 : i32
    return %c0_i32, %c0_i32_0 : i32, i32
  }
  func.func @transform_2(%arg0: i32) -> (i32, i32) {
    %c0_i32 = arith.constant 0 : i32
    %c0_i32_0 = arith.constant 0 : i32
    %c0_i32_1 = arith.constant 0 : i32
    return %c0_i32, %c0_i32_0 : i32, i32
  }
  func.func @transform_3(%arg0: i32) -> (i32, i32) {
    %c0_i32 = arith.constant 0 : i32
    %c0_i32_0 = arith.constant 0 : i32
    %c0_i32_1 = arith.constant 0 : i32
    return %c0_i32, %c0_i32_0 : i32, i32
  }
  func.func @transform_4(%arg0: i32) -> (i32, i32) {
    %c0_i32 = arith.constant 0 : i32
    %c0_i32_0 = arith.constant 0 : i32
    %c0_i32_1 = arith.constant 0 : i32
    return %c0_i32, %c0_i32_0 : i32, i32
  }
  func.func @transform_5(%arg0: i32) -> (i32, i32) {
    %c0_i32 = arith.constant 0 : i32
    %c0_i32_0 = arith.constant 0 : i32
    return %arg0, %c0_i32 : i32, i32
  }
}

</mosaic_0001>

<bundles_post_ra>
// kernel: maskgit_forward.13
= control target key start
LH: loop header
LB: loop body
LE: loop exit
PB: predicated region body
PF: predicated region fallthrough
CT: control target
= control target key end

     0   :  { %v142_v4 = vmov 128.0   ;;  %s208_s0 = inlined_call_operand.vmem [shape: f32[32,128], index: 0, kind: input, shape index: {}]   ;;  %s209_s1 = inlined_call_operand.vmem [shape: f32[1,128], index: 1, kind: input, shape index: {}]   ;;  %s210_s2 = inlined_call_operand.vmem [shape: f32[1,128], index: 2, kind: input, shape index: {}]   ;;  %s211_s3 = inlined_call_operand.vmem [shape: f32[32,128], index: 3, kind: output, shape index: {}]  }
   0x1   :  { %v16_v0 = vld [vmem:[%s208_s0 + $0x10] sm:$0xff]  ;;  %v14_v1 = vld [vmem:[%s208_s0] sm:$0xff]  ;;  %v17_v2 = vld [vmem:[%s208_s0 + $0x18] sm:$0xff]  ;;  %132 = vrcp.f32 %v142_v4 }
   0x2   :  { %24 = vadd.xlane.f32.xlu1 %v16_v0  ;;  %20 = vadd.xlane.f32.xlu0 %v14_v1  ;;  %v15_v3 = vld [vmem:[%s208_s0 + $0x8] sm:$0xff]  ;;  %v130_v49 = vld [vmem:[%s209_s1] ss:$0 sm:$0xff] }
   0x3   :  { %v131_v58 = vld [vmem:[%s210_s2] ss:$0 sm:$0xff] }
   0x7   :  { %v133_v5 = vpop.eup %132 }
   0x8   :  { %v29_v6 = vmul.f32 128.0, %v133_v5  ;;  %vm33_vm0 = vweird.f32 %v133_v5 }
   0xa   :  { %26 = vadd.xlane.f32.xlu1 %v17_v2  ;;  %22 = vadd.xlane.f32.xlu0 %v15_v3  ;;  %v30_v7 = vsub.f32 1.0, %v29_v6 }
   0xc   :  { %v31_v8 = vmul.f32 %v133_v5, %v30_v7 }
   0xe   :  { %v32_v9 = vadd.f32 %v133_v5, %v31_v8 }
  0x10   :  { %v34_v10 = vsel %vm33_vm0, %v133_v5, %v32_v9 }
  0x75   :  { %v25_v11 = vpop.xlane.xlu1 %24  ;;  %v21_v12 = vpop.xlane.xlu0 %20 }
  0x76   :  { %v37_v13 = vmul.f32 %v34_v10, %v25_v11  ;;  %v35_v14 = vmul.f32 %v34_v10, %v21_v12 }
  0x78   :  { %v175_v15 = vsub.f32 %v16_v0, %v37_v13  ;;  %v39_v16 = vsub.f32 %v14_v1, %v35_v14 }
  0x7a   :  { %v45_v17 = vmul.f32 %v175_v15, %v175_v15  ;;  %v43_v18 = vmul.f32 %v39_v16, %v39_v16 }
  0x7c   :  { %51 = vadd.xlane.f32.xlu0 %v45_v17  ;;  %47 = vadd.xlane.f32.xlu2 %v43_v18 }
  0x7d   :  { %v27_v19 = vpop.xlane.xlu1 %26  ;;  %v23_v20 = vpop.xlane.xlu0 %22 }
  0x7e   :  { %v38_v21 = vmul.f32 %v34_v10, %v27_v19  ;;  %v36_v22 = vmul.f32 %v34_v10, %v23_v20 }
  0x80   :  { %v179_v23 = vsub.f32 %v17_v2, %v38_v21  ;;  %v181_v24 = vsub.f32 %v15_v3, %v36_v22 }
  0x82   :  { %v46_v25 = vmul.f32 %v179_v23, %v179_v23  ;;  %v44_v26 = vmul.f32 %v181_v24, %v181_v24 }
  0x84   :  { %53 = vadd.xlane.f32.xlu1 %v46_v25  ;;  %49 = vadd.xlane.f32.xlu2 %v44_v26 }
  0xef   :  { %v48_v27 = vpop.xlane.xlu2 %47  ;;  %v52_v28 = vpop.xlane.xlu0 %51 }
  0xf0   :  { %v55_v29 = vmul.f32 %v48_v27, %v34_v10  ;;  %v57_v30 = vmul.f32 %v52_v28, %v34_v10 }
  0xf2   :  { %v59_v31 = vadd.f32 1e-05, %v55_v29  ;;  %v61_v32 = vadd.f32 1e-05, %v57_v30 }
  0xf4   :  { %134 = vrsqrt.f32 %v59_v31  ;;  %vm69_vm3 = vweird.f32 %v59_v31  ;;  %vm89_vm5 = vweird.f32 %v61_v32 }
  0xf5   :  { %136 = vrsqrt.f32 %v61_v32 }
  0xf7   :  { %v54_v33 = vpop.xlane.xlu1 %53  ;;  %v50_v34 = vpop.xlane.xlu2 %49 }
  0xf8   :  { %v58_v35 = vmul.f32 %v54_v33, %v34_v10  ;;  %v56_v36 = vmul.f32 %v50_v34, %v34_v10 }
  0xfa   :  { %v135_v37 = vpop.eup %134  ;;  %v62_v38 = vadd.f32 1e-05, %v58_v35  ;;  %v60_v39 = vadd.f32 1e-05, %v56_v36 }
  0xfb   :  { %v137_v40 = vpop.eup %136  ;;  %v64_v41 = vmul.f32 %v135_v37, %v59_v31  ;;  %vm70_vm1 = vweird.f32 %v135_v37 }
  0xfc   :  { %v84_v42 = vmul.f32 %v137_v40, %v61_v32  ;;  %138 = vrsqrt.f32 %v62_v38  ;;  %vm90_vm2 = vweird.f32 %v137_v40  ;;  %vm71_vm4 = vmor %vm69_vm3, %vm70_vm1  ;;  %vm99_vm9 = vweird.f32 %v62_v38 }
  0xfd   :  { %v65_v43 = vmul.f32 %v135_v37, %v64_v41  ;;  %140 = vrsqrt.f32 %v60_v39  ;;  %vm91_vm6 = vmor %vm89_vm5, %vm90_vm2  ;;  %vm79_vm11 = vweird.f32 %v60_v39 }
  0xfe   :  { %v85_v44 = vmul.f32 %v137_v40, %v84_v42 }
  0xff   :  { %v66_v45 = vmul.f32 0.5, %v65_v43 }
 0x100   :  { %v86_v46 = vmul.f32 0.5, %v85_v44 }
 0x101   :  { %v67_v47 = vsub.f32 1.5, %v66_v45 }
 0x102   :  { %v139_v48 = vpop.eup %138  ;;  %v87_v50 = vsub.f32 1.5, %v86_v46 }
 0x103   :  { %v141_v51 = vpop.eup %140  ;;  %v68_v52 = vmul.f32 %v135_v37, %v67_v47  ;;  %v94_v53 = vmul.f32 %v139_v48, %v62_v38  ;;  %vm100_vm7 = vweird.f32 %v139_v48 }
 0x104   :  { %v88_v54 = vmul.f32 %v137_v40, %v87_v50  ;;  %v74_v55 = vmul.f32 %v141_v51, %v60_v39  ;;  %vm80_vm8 = vweird.f32 %v141_v51  ;;  %vm101_vm10 = vmor %vm99_vm9, %vm100_vm7 }
 0x105   :  { %v72_v56 = vsel %vm71_vm4, %v135_v37, %v68_v52  ;;  %v95_v57 = vmul.f32 %v139_v48, %v94_v53  ;;  %vm81_vm12 = vmor %vm79_vm11, %vm80_vm8 }
 0x106   :  { %v106_v59 = vmul.f32 %v130_v49, %v72_v56  ;;  %v92_v60 = vsel %vm91_vm6, %v137_v40, %v88_v54  ;;  %v75_v61 = vmul.f32 %v141_v51, %v74_v55 }
 0x107   :  { %v108_v62 = vmul.f32 %v130_v49, %v92_v60  ;;  %v96_v63 = vmul.f32 0.5, %v95_v57 }
 0x108   :  { %v110_v0 = vmul.f32 %v106_v59, %v39_v16  ;;  %v76_v1 = vmul.f32 0.5, %v75_v61 }
 0x109   :  { %v112_v2 = vmul.f32 %v108_v62, %v175_v15  ;;  %v97_v3 = vsub.f32 1.5, %v96_v63 }
 0x10a   :  { %v117_v4 = vadd.f32 %v131_v58, %v110_v0  ;;  %v77_v5 = vsub.f32 1.5, %v76_v1 }
 0x10b   :  { %v119_v6 = vadd.f32 %v131_v58, %v112_v2  ;;  %v98_v7 = vmul.f32 %v139_v48, %v97_v3 }
 0x10c   :  { %121 = vst [vmem:[%s211_s3] sm:$0xff] %v117_v4  ;;  %v78_v8 = vmul.f32 %v141_v51, %v77_v5 }
 0x10d   :  { %123 = vst [vmem:[%s211_s3 + $0x10] sm:$0xff] %v119_v6  ;;  %v102_v9 = vsel %vm101_vm10, %v139_v48, %v98_v7 }
 0x10e   :  { %v109_v10 = vmul.f32 %v130_v49, %v102_v9  ;;  %v82_v11 = vsel %vm81_vm12, %v141_v51, %v78_v8 }
 0x10f   :  { %v107_v12 = vmul.f32 %v130_v49, %v82_v11 }
 0x110   :  { %v113_v13 = vmul.f32 %v109_v10, %v179_v23 }
 0x111   :  { %v111_v14 = vmul.f32 %v107_v12, %v181_v24 }
 0x112   :  { %v120_v15 = vadd.f32 %v131_v58, %v113_v13 }
 0x113   :  { %v118_v16 = vadd.f32 %v131_v58, %v111_v14 }
 0x114   :  { %124 = vst [vmem:[%s211_s3 + $0x18] sm:$0xff] %v120_v15 }
 0x115   :  { %122 = vst [vmem:[%s211_s3 + $0x8] sm:$0xff] %v118_v16 }

// kernel: maskgit_forward.15
= control target key start
LH: loop header
LB: loop body
LE: loop exit
PB: predicated region body
PF: predicated region fallthrough
CT: control target
= control target key end

     0   :  { %s709_s6 = smov 0   ;;  %s860_s0 = inlined_call_operand.vmem [shape: bf16[2,16,384], index: 0, kind: input, shape index: {}]   ;;  %s861_s1 = inlined_call_operand.vmem [shape: bf16[2,16,128], index: 1, kind: output, shape index: {}]  }
   0x1 LB: > { %s610_s7 = sadd.s32 4294967295, %s694_s6   ;;  %p614_p0 = scmp.ge.s32.totalorder %s694_s6, 1  ;;  %s694_s6 = sphi %s709_s6, %s11_s6  }
   0x2   : > { %p87_p1 = scmp.lt.s32.totalorder %s694_s6, 3 }
   0x4   : > { %p88_p2 = pnand %p614_p0, %p87_p1 }
   0x5   : > { %p107_p3 = scmp.lt.s32.totalorder (!%p88_p2), %s610_s7, 1  ;;  %s696_s12 = smov (!%p88_p2), 96  }
   0x6   : > { %91 = sbr.rel (%p88_p2) target bundleno = 1127 (0x467), region = 24  ;;  %s697_s13 = smov (!%p88_p2), 64  }
   0x7   : > { %s698_s14 = smov (!%p88_p2), 32  }
   0xb   : > { %s869_s7 = smov (!%p107_p3, %s610_s7), 1  ;;  %vm130_vm0 = vcmask 261120   ;;  %vm153_vm1 = vcmask 130048   ;;  %vm228_vm10 = vcmask 257024  }
   0xc   : > { %s644_s8 = smul.u32 24, %s869_s7  ;;  %s640_s15 = sshll.u32 %s869_s7, 3 }
   0xd   : > { %s759_s18 = scalar_lea.vmem %s861_s1, %s640_s15 }
   0xe   : > { %s723_s11 = scalar_lea.vmem %s860_s0, %s644_s8 }
   0xf   : > { %v641_v0 = vld [vmem:[%s723_s11 + $0x4] sm:$0xf]  ;;  %v622_v1 = vld [vmem:[%s723_s11 + $0xc] sm:$0xf0]  ;;  %v620_v4 = vld [vmem:[%s723_s11] sm:$0xf] }
  0x10   : > { %v625_v2 = vor.u32 %v641_v0, %v622_v1  ;;  %v642_v5 = vld [vmem:[%s723_s11 + $0x8] sm:$0xf0]  ;;  %v629_v26 = vld [vmem:[%s723_s11 + $0x8] sm:$0xf]  ;;  %v643_v27 = vld [vmem:[%s723_s11 + $0x10] sm:$0xf0] }
  0x11   : > { %v621_v6 = vor.u32 %v642_v5, %v620_v4  ;;  %v745_v28 = vor.u32 %v643_v27, %v629_v26 }
  0x12   : > { %v135_v3 = vsel %vm130_vm0, %v625_v2, 0  ;;  %233 = vrot.lane.b32.xlu2 %v625_v2, %s696_s12 }
  0x13   : > { %144 = vmatpush.bf16.xpose.msra.mxu0 %v135_v3  ;;  %219 = vmatpush.bf16.msra.mxu1 %v745_v28 }
  0x1a   : > { %626 = vmatmul.msk.bf16.vlgmr.msra.gmra.mxu0 %vm130_vm0, %v621_v6  ;;  %231 = vrot.lane.b32.xlu2 %v621_v6, %s696_s12 }
  0x22   : > { %339 = vrot.lane.b32.xlu2 %v621_v6, %s697_s13 }
  0x2a   : > { %447 = vrot.lane.b32.xlu2 %v621_v6, %s698_s14 }
  0x6c   : > { %v234_v13 = vpop.permute.xlu2 %233 }
  0x6d   : > { %v239_v14 = vsel %vm130_vm0, %v234_v13, 0 }
  0x6e   : > { %248 = vmatpush.bf16.xpose.msra.mxu2 %v239_v14 }
  0x74   : > { %v232_v15 = vpop.permute.xlu2 %231 }
  0x75   : > { %632 = vmatmul.msk.bf16.vlgmr.msra.gmra.mxu2 %vm130_vm0, %v232_v15 }
  0x7c   : > { %v340_v62 = vpop.permute.xlu2 %339 }
  0x84   : > { %v448_v1 = vpop.permute.xlu2 %447 }
  0x97   : > { %v146_v7 = vpop.f32.mrf.mxu0 }
  0x98   : > { %v151_v8 = vmul.f32 0.17677669, %v146_v7 }
  0x9a   : > { %v154_v9 = vsel %vm153_vm1, %v151_v8, -inf }
  0x9b   : > { %155 = vmax.xlane.f32.xlu0 %v154_v9 }
  0x9f   : > { %v148_v10 = vpop.f32.mrf.mxu0 }
  0xa0   : > { %v152_v11 = vmul.f32 0.17677669, %v148_v10 }
  0xa2   : > { %v157_v12 = vsel %vm153_vm1, %v152_v11, -inf }
  0xa3   : > { %158 = vmax.xlane.f32.xlu0 %v157_v12 }
  0xb7   : > { %341 = vrot.lane.b32.xlu0 %v625_v2, %s697_s13 }
  0xf8   : > { %v250_v32 = vpop.f32.mrf.mxu2 }
  0xf9   : > { %v255_v37 = vmul.f32 0.17677669, %v250_v32 }
  0xfb   : > { %v257_v42 = vsel %vm153_vm1, %v255_v37, -inf }
  0xfc   : > { %258 = vmax.xlane.f32.xlu2 %v257_v42 }
 0x100   : > { %v252_v38 = vpop.f32.mrf.mxu2 }
 0x101   : > { %v256_v39 = vmul.f32 0.17677669, %v252_v38 }
 0x103   : > { %v260_v41 = vsel %vm153_vm1, %v256_v39, -inf }
 0x104   : > { %261 = vmax.xlane.f32.xlu0 %v260_v41 }
 0x10e   : > { %v156_v16 = vpop.xlane.xlu0 %155 }
 0x10f   : > { %v160_v17 = vsub.f32 %v151_v8, %v156_v16 }
 0x111   : > { %v162_v18 = vmul.f32 1.442695, %v160_v17 }
 0x113   : > { %656 = vpow2.f32 %v162_v18 }
 0x116   : > { %v159_v19 = vpop.xlane.xlu0 %158 }
 0x117   : > { %v161_v20 = vsub.f32 %v152_v11, %v159_v19 }
 0x119   : > { %v657_v21 = vpop.eup %656  ;;  %v164_v22 = vmul.f32 1.442695, %v161_v20 }
 0x11a   : > { %v166_v23 = vsel %vm153_vm1, %v657_v21, 0.0 }
 0x11b   : > { %658 = vpow2.f32 %v164_v22  ;;  %167 = vadd.xlane.f32.xlu1 %v166_v23 }
 0x121   : > { %v659_v24 = vpop.eup %658 }
 0x122   : > { %v169_v25 = vsel %vm153_vm1, %v659_v24, 0.0 }
 0x123   : > { %170 = vadd.xlane.f32.xlu1 %v169_v25 }
 0x129   : > { %v342_v29 = vpop.permute.xlu0 %341 }
 0x12a   : > { %v347_v30 = vsel %vm130_vm0, %v342_v29, 0 }
 0x12b   : > { %356 = vmatpush.bf16.xpose.msrb.mxu1 %v347_v30 }
 0x13c   : > { %449 = vrot.lane.b32.xlu1 %v625_v2, %s698_s14 }
 0x16f   : > { %v259_v6 = vpop.xlane.xlu2 %258 }
 0x170   : > { %v263_v9 = vsub.f32 %v255_v37, %v259_v6 }
 0x172   : > { %v265_v13 = vmul.f32 1.442695, %v263_v9 }
 0x177   : > { %v262_v3 = vpop.xlane.xlu0 %261 }
 0x178   : > { %v264_v5 = vsub.f32 %v256_v39, %v262_v3 }
 0x17a   : > { %v267_v7 = vmul.f32 1.442695, %v264_v5 }
 0x18e   : > { %v168_v31 = vpop.xlane.xlu1 %167 }
 0x18f   : > { %660 = vrcp.f32 %v168_v31  ;;  %v183_v46 = vand.u32 2147483648, %v168_v31  ;;  %vm177_vm3 = vweird.f32 %v168_v31  ;;  %v181_v47 = vand.u32 2147483647, %v168_v31 }
 0x191   : > { %v184_v53 = vor.u32 1.1754944e-38, %v183_v46  ;;  %vm182_vm6 = vcmp.eq.f32.partialorder %v181_v47, 8.507059e+37 }
 0x195   : > { %v661_v33 = vpop.eup %660 }
 0x196   : > { %v173_v34 = vmul.f32 %v661_v33, %v168_v31  ;;  %v171_v35 = vpop.xlane.xlu1 %170  ;;  %vm178_vm2 = vweird.f32 %v661_v33 }
 0x197   : > { %662 = vrcp.f32 %v171_v35  ;;  %vm179_vm4 = vmor %vm177_vm3, %vm178_vm2  ;;  %v197_v49 = vand.u32 2147483648, %v171_v35  ;;  %v195_v51 = vand.u32 2147483647, %v171_v35  ;;  %vm191_vm7 = vweird.f32 %v171_v35 }
 0x198   : > { %v174_v36 = vsub.f32 1.0, %v173_v34  ;;  %664 = vpow2.f32 %v267_v7 }
 0x199   : > { %v198_v55 = vor.u32 1.1754944e-38, %v197_v49  ;;  %vm196_vm9 = vcmp.eq.f32.partialorder %v195_v51, 8.507059e+37  ;;  %666 = vpow2.f32 %v265_v13 }
 0x19a   : > { %v175_v40 = vmul.f32 %v661_v33, %v174_v36 }
 0x19c   : > { %v176_v44 = vadd.f32 %v661_v33, %v175_v40 }
 0x19d   : > { %v663_v43 = vpop.eup %662 }
 0x19e   : > { %v187_v45 = vmul.f32 %v663_v43, %v171_v35  ;;  %vm192_vm5 = vweird.f32 %v663_v43  ;;  %v180_v52 = vsel %vm179_vm4, %v661_v33, %v176_v44  ;;  %v764_v16 = vpop.eup %664 }
 0x19f   : > { %vm193_vm8 = vmor %vm191_vm7, %vm192_vm5  ;;  %v185_v56 = vsel %vm182_vm6, %v184_v53, %v180_v52  ;;  %v272_v19 = vsel %vm153_vm1, %v764_v16, 0.0  ;;  %v769_v20 = vpop.eup %666 }
 0x1a0   : > { %v188_v48 = vsub.f32 1.0, %v187_v45  ;;  %v200_v59 = vmul.f32 %v657_v21, %v185_v56  ;;  %v269_v23 = vsel %vm153_vm1, %v769_v20, 0.0 }
 0x1a2   : > { %v189_v50 = vmul.f32 %v663_v43, %v188_v48 }
 0x1a4   : > { %v190_v54 = vadd.f32 %v663_v43, %v189_v50 }
 0x1a6   : > { %v194_v57 = vsel %vm193_vm8, %v663_v43, %v190_v54 }
 0x1a7   : > { %v199_v58 = vsel %vm196_vm9, %v198_v55, %v194_v57 }
 0x1a8   : > { %v201_v60 = vmul.f32 %v659_v24, %v199_v58 }
 0x1aa   : > { %v202_v61 = vpack.c.bf16 %v201_v60, %v200_v59 }
 0x1ac   : > { %631 = vmatmul.msk.bf16.vlgmr.msra.gmra.mxu1 %vm153_vm1, %v202_v61 }
 0x1ae   : > { %v450_v63 = vpop.permute.xlu1 %449 }
 0x1af   : > { %v455_v0 = vsel %vm130_vm0, %v450_v63, 0 }
 0x1b0   : > { %464 = vmatpush.bf16.xpose.msrb.mxu0 %v455_v0 }
 0x1b7   : > { %636 = vmatmul.msk.bf16.vlgmr.msrb.gmra.mxu0 %vm130_vm0, %v448_v1 }
 0x1bc   : > { %634 = vmatmul.msk.bf16.vlgmr.msrb.gmra.mxu1 %vm130_vm0, %v340_v62 }
 0x229   : > { %v221_v2 = vpop.f32.mrf.mxu1 }
 0x22a   : > { %v226_v4 = vpack.c.bf16 %v221_v2, %v221_v2 }
 0x22c   : > { %229 = vst.msk [vmem:[%s759_s18] sm:$0xf] %vm228_vm10, %v226_v4 }
 0x231   : > { %v223_v8 = vpop.f32.mrf.mxu1 }
 0x232   : > { %v227_v10 = vpack.c.bf16 %v223_v8, %v223_v8 }
 0x234   : > { %230 = vst.msk [vmem:[%s759_s18 + $0x4] sm:$0xf] %vm228_vm10, %v227_v10  ;;  %v466_v11 = vpop.f32.mrf.mxu0 }
 0x235   : > { %v471_v12 = vmul.f32 0.17677669, %v466_v11 }
 0x237   : > { %v473_v14 = vsel %vm153_vm1, %v471_v12, -inf }
 0x238   : > { %474 = vmax.xlane.f32.xlu0 %v473_v14 }
 0x239   : > { %v358_v15 = vpop.f32.mrf.mxu1 }
 0x23a   : > { %v363_v17 = vmul.f32 0.17677669, %v358_v15 }
 0x23c   : > { %v365_v18 = vsel %vm153_vm1, %v363_v17, -inf  ;;  %v468_v25 = vpop.f32.mrf.mxu0 }
 0x23d   : > { %366 = vmax.xlane.f32.xlu1 %v365_v18  ;;  %v472_v26 = vmul.f32 0.17677669, %v468_v25 }
 0x23f   : > { %v476_v27 = vsel %vm153_vm1, %v472_v26, -inf }
 0x240   : > { %273 = vadd.xlane.f32.xlu0 %v272_v19 }
 0x241   : > { %v360_v21 = vpop.f32.mrf.mxu1 }
 0x242   : > { %v364_v22 = vmul.f32 0.17677669, %v360_v21 }
 0x244   : > { %v368_v24 = vsel %vm153_vm1, %v364_v22, -inf }
 0x245   : > { %270 = vadd.xlane.f32.xlu1 %v269_v23  ;;  %369 = vmax.xlane.f32.xlu2 %v368_v24 }
 0x24d   : > { %477 = vmax.xlane.f32.xlu2 %v476_v27 }
 0x2ab   : > { %v475_v29 = vpop.xlane.xlu0 %474 }
 0x2ac   : > { %v479_v30 = vsub.f32 %v471_v12, %v475_v29 }
 0x2ae   : > { %v481_v31 = vmul.f32 1.442695, %v479_v30 }
 0x2b0   : > { %668 = vpow2.f32 %v481_v31  ;;  %v367_v37 = vpop.xlane.xlu1 %366 }
 0x2b1   : > { %v371_v40 = vsub.f32 %v363_v17, %v367_v37 }
 0x2b3   : > { %v373_v44 = vmul.f32 1.442695, %v371_v40  ;;  %v274_v49 = vpop.xlane.xlu0 %273 }
 0x2b4   : > { %v300_v2 = vand.u32 2147483648, %v274_v49  ;;  %vm294_vm13 = vweird.f32 %v274_v49  ;;  %v298_v7 = vand.u32 2147483647, %v274_v49 }
 0x2b6   : > { %v775_v32 = vpop.eup %668  ;;  %v301_v14 = vor.u32 1.1754944e-38, %v300_v2  ;;  %vm299_vm7 = vcmp.eq.f32.partialorder %v298_v7, 8.507059e+37 }
 0x2b7   : > { %v485_v33 = vsel %vm153_vm1, %v775_v32, 0.0 }
 0x2b8   : > { %v370_v34 = vpop.xlane.xlu2 %369  ;;  %486 = vadd.xlane.f32.xlu0 %v485_v33  ;;  %v271_v50 = vpop.xlane.xlu1 %270 }
 0x2b9   : > { %v372_v35 = vsub.f32 %v364_v22, %v370_v34  ;;  %v286_v3 = vand.u32 2147483648, %v271_v50  ;;  %vm280_vm12 = vweird.f32 %v271_v50  ;;  %v284_v4 = vand.u32 2147483647, %v271_v50 }
 0x2bb   : > { %v375_v36 = vmul.f32 1.442695, %v372_v35  ;;  %v287_v15 = vor.u32 1.1754944e-38, %v286_v3  ;;  %vm285_vm3 = vcmp.eq.f32.partialorder %v284_v4, 8.507059e+37 }
 0x2bd   : > { %670 = vpow2.f32 %v375_v36 }
 0x2c0   : > { %v478_v38 = vpop.xlane.xlu2 %477 }
 0x2c1   : > { %v480_v39 = vsub.f32 %v472_v26, %v478_v38 }
 0x2c3   : > { %v483_v41 = vmul.f32 1.442695, %v480_v39  ;;  %v779_v42 = vpop.eup %670 }
 0x2c4   : > { %v380_v43 = vsel %vm153_vm1, %v779_v42, 0.0 }
 0x2c5   : > { %672 = vpow2.f32 %v483_v41  ;;  %381 = vadd.xlane.f32.xlu1 %v380_v43 }
 0x2c6   : > { %674 = vpow2.f32 %v373_v44 }
 0x2c7   : > { %676 = vrcp.f32 %v271_v50 }
 0x2c8   : > { %678 = vrcp.f32 %v274_v49 }
 0x2cb   : > { %v783_v45 = vpop.eup %672 }
 0x2cc   : > { %v488_v46 = vsel %vm153_vm1, %v783_v45, 0.0  ;;  %414 = vrot.lane.b32.xlu0 %v745_v28, %s697_s13  ;;  %v789_v47 = vpop.eup %674 }
 0x2cd   : > { %489 = vadd.xlane.f32.xlu2 %v488_v46  ;;  %v377_v48 = vsel %vm153_vm1, %v789_v47, 0.0  ;;  %v677_v52 = vpop.eup %676 }
 0x2ce   : > { %v679_v53 = vpop.eup %678  ;;  %v276_v54 = vmul.f32 %v677_v52, %v271_v50  ;;  %vm281_vm11 = vweird.f32 %v677_v52 }
 0x2cf   : > { %v290_v56 = vmul.f32 %v679_v53, %v274_v49  ;;  %vm295_vm14 = vweird.f32 %v679_v53  ;;  %vm800_vm15 = vmor %vm280_vm12, %vm281_vm11 }
 0x2d0   : > { %v277_v57 = vsub.f32 1.0, %v276_v54  ;;  %vm811_vm2 = vmor %vm294_vm13, %vm295_vm14 }
 0x2d1   : > { %v291_v59 = vsub.f32 1.0, %v290_v56 }
 0x2d2   : > { %v278_v61 = vmul.f32 %v677_v52, %v277_v57 }
 0x2d4   : > { %v279_v0 = vadd.f32 %v677_v52, %v278_v61 }
 0x2d5   : > { %378 = vadd.xlane.f32.xlu2 %v377_v48 }
 0x2d6   : > { %v283_v13 = vsel %vm800_vm15, %v677_v52, %v279_v0 }
 0x2d7   : > { %v288_v25 = vsel %vm285_vm3, %v287_v15, %v283_v13 }
 0x2d8   : > { %v303_v38 = vmul.f32 %v769_v20, %v288_v25 }
 0x2de   : > { %306 = vrot.lane.b32.xlu1 %v745_v28, %s696_s12 }
 0x2ed   : > { %522 = vrot.lane.b32.xlu2 %v745_v28, %s698_s14  ;;  %v292_v28 = vmul.f32 %v679_v53, %v291_v59 }
 0x2ef   : > { %v293_v6 = vadd.f32 %v679_v53, %v292_v28 }
 0x2f1   : > { %v297_v26 = vsel %vm811_vm2, %v679_v53, %v293_v6 }
 0x2f2   : > { %v302_v34 = vsel %vm299_vm7, %v301_v14, %v297_v26 }
 0x2f3   : > { %v304_v48 = vmul.f32 %v764_v16, %v302_v34 }
 0x2f5   : > { %v305_v53 = vpack.c.bf16 %v304_v48, %v303_v38 }
 0x32b   : > { %v487_v51 = vpop.xlane.xlu0 %486 }
 0x32c   : > { %680 = vrcp.f32 %v487_v51  ;;  %v502_v17 = vand.u32 2147483648, %v487_v51  ;;  %vm496_vm4 = vweird.f32 %v487_v51  ;;  %v500_v19 = vand.u32 2147483647, %v487_v51 }
 0x32e   : > { %v503_v31 = vor.u32 1.1754944e-38, %v502_v17  ;;  %vm501_vm8 = vcmp.eq.f32.partialorder %v500_v19, 8.507059e+37 }
 0x332   : > { %v681_v55 = vpop.eup %680 }
 0x333   : > { %v492_v58 = vmul.f32 %v681_v55, %v487_v51  ;;  %vm497_vm0 = vweird.f32 %v681_v55 }
 0x334   : > { %vm815_vm5 = vmor %vm496_vm4, %vm497_vm0 }
 0x335   : > { %v493_v62 = vsub.f32 1.0, %v492_v58 }
 0x337   : > { %v494_v1 = vmul.f32 %v681_v55, %v493_v62 }
 0x338   : > { %v797_v60 = vpop.xlane.xlu1 %381 }
 0x339   : > { %v495_v10 = vadd.f32 %v681_v55, %v494_v1  ;;  %vm402_vm0 = vweird.f32 %v797_v60  ;;  %v406_v58 = vand.u32 2147483647, %v797_v60 }
 0x33b   : > { %v499_v27 = vsel %vm815_vm5, %v681_v55, %v495_v10  ;;  %vm407_vm4 = vcmp.eq.f32.partialorder %v406_v58, 8.507059e+37  ;;  %vm444_vm5 = vcmask 781824  }
 0x33c   : > { %v504_v39 = vsel %vm501_vm8, %v503_v31, %v499_v27 }
 0x33d   : > { %v519_v51 = vmul.f32 %v775_v32, %v504_v39 }
 0x33e   : > { %v415_v44 = vpop.permute.xlu0 %414 }
 0x340   : > { %v490_v63 = vpop.xlane.xlu2 %489 }
 0x341   : > { %682 = vrcp.f32 %v490_v63  ;;  %v516_v24 = vand.u32 2147483648, %v490_v63  ;;  %v514_v30 = vand.u32 2147483647, %v490_v63  ;;  %vm510_vm9 = vweird.f32 %v490_v63 }
 0x342   : > { %684 = vrcp.f32 %v797_v60 }
 0x343   : > { %v517_v37 = vor.u32 1.1754944e-38, %v516_v24  ;;  %vm515_vm11 = vcmp.eq.f32.partialorder %v514_v30, 8.507059e+37 }
 0x347   : > { %v683_v5 = vpop.eup %682 }
 0x348   : > { %v804_v9 = vpop.eup %684  ;;  %v506_v11 = vmul.f32 %v683_v5, %v490_v63  ;;  %v806_v12 = vpop.xlane.xlu2 %378  ;;  %vm511_vm6 = vweird.f32 %v683_v5 }
 0x349   : > { %686 = vrcp.f32 %v806_v12  ;;  %v398_v23 = vmul.f32 %v804_v9, %v797_v60  ;;  %vm512_vm10 = vmor %vm510_vm9, %vm511_vm6  ;;  %v394_v57 = vand.u32 2147483648, %v806_v12  ;;  %vm403_vm13 = vweird.f32 %v804_v9 }
 0x34a   : > { %v507_v21 = vsub.f32 1.0, %v506_v11  ;;  %vm388_vm14 = vweird.f32 %v806_v12  ;;  %v392_v32 = vand.u32 2147483647, %v806_v12  ;;  %vm404_vm2 = vmor %vm402_vm0, %vm403_vm13  ;;  %vm552_vm6 = vcmask 1044224  }
 0x34b   : > { %v399_v36 = vsub.f32 1.0, %v398_v23  ;;  %v395_v61 = vor.u32 1.1754944e-38, %v394_v57 }
 0x34c   : > { %v508_v29 = vmul.f32 %v683_v5, %v507_v21  ;;  %vm393_vm3 = vcmp.eq.f32.partialorder %v392_v32, 8.507059e+37 }
 0x34d   : > { %v400_v20 = vmul.f32 %v804_v9, %v399_v36 }
 0x34e   : > { %v509_v33 = vadd.f32 %v683_v5, %v508_v29 }
 0x34f   : > { %v687_v35 = vpop.eup %686  ;;  %v401_v16 = vadd.f32 %v804_v9, %v400_v20 }
 0x350   : > { %v513_v40 = vsel %vm512_vm10, %v683_v5, %v509_v33  ;;  %v384_v41 = vmul.f32 %v687_v35, %v806_v12  ;;  %v523_v43 = vpop.permute.xlu2 %522  ;;  %v307_v46 = vpop.permute.xlu1 %306  ;;  %vm389_vm12 = vweird.f32 %v687_v35 }
 0x351   : > { %535 = vmatpush.bf16.msrb.mxu2 %v523_v43  ;;  %v518_v49 = vsel %vm515_vm11, %v517_v37, %v513_v40  ;;  %319 = vmatpush.bf16.msra.mxu3 %v307_v46  ;;  %vm390_vm15 = vmor %vm388_vm14, %vm389_vm12  ;;  %v405_v62 = vsel %vm404_vm2, %v804_v9, %v401_v16 }
 0x352   : > { %v385_v50 = vsub.f32 1.0, %v384_v41  ;;  %v520_v52 = vmul.f32 %v783_v45, %v518_v49  ;;  %v408_v45 = vand.u32 2147483648, %v797_v60 }
 0x354   : > { %v386_v54 = vmul.f32 %v687_v35, %v385_v50  ;;  %v521_v55 = vpack.c.bf16 %v520_v52, %v519_v51  ;;  %633 = vmatmul.msk.bf16.vlgmr.msra.gmra.mxu3 %vm153_vm1, %v305_v53  ;;  %v409_v63 = vor.u32 1.1754944e-38, %v408_v45 }
 0x355   : > { %427 = vmatpush.bf16.msrb.mxu3 %v415_v44 }
 0x356   : > { %v387_v56 = vadd.f32 %v687_v35, %v386_v54  ;;  %637 = vmatmul.msk.bf16.vlgmr.msrb.gmra.mxu2 %vm153_vm1, %v521_v55  ;;  %v410_v0 = vsel %vm407_vm4, %v409_v63, %v405_v62 }
 0x357   : > { %v412_v2 = vmul.f32 %v779_v42, %v410_v0 }
 0x358   : > { %v391_v59 = vsel %vm390_vm15, %v687_v35, %v387_v56 }
 0x359   : > { %v396_v28 = vsel %vm393_vm3, %v395_v61, %v391_v59 }
 0x35a   : > { %v411_v1 = vmul.f32 %v789_v47, %v396_v28 }
 0x35c   : > { %v413_v3 = vpack.c.bf16 %v412_v2, %v411_v1 }
 0x364   : > { %635 = vmatmul.msk.bf16.vlgmr.msrb.gmra.mxu3 %vm153_vm1, %v413_v3  ;;  %vm336_vm1 = vcmask 519424  }
 0x3d7   : > { %v321_v4 = vpop.f32.mrf.mxu3 }
 0x3d8   : > { %v326_v5 = vpack.c.bf16 %v321_v4, %v321_v4 }
 0x3d9   : > { %v537_v7 = vpop.f32.mrf.mxu2 }
 0x3da   : > { %330 = vrot.lane.b32.xlu0 %v326_v5, %s698_s14  ;;  %v542_v9 = vpack.c.bf16 %v537_v7, %v537_v7 }
 0x3df   : > { %v323_v60 = vpop.f32.mrf.mxu3 }
 0x3e0   : > { %v327_v6 = vpack.c.bf16 %v323_v60, %v323_v60 }
 0x3e1   : > { %v539_v42 = vpop.f32.mrf.mxu2 }
 0x3e2   : > { %332 = vrot.lane.b32.xlu1 %v327_v6, %s698_s14  ;;  %v543_v11 = vpack.c.bf16 %v539_v42, %v539_v42 }
 0x3e7   : > { %v429_v8 = vpop.f32.mrf.mxu3 }
 0x3e8   : > { %v434_v10 = vpack.c.bf16 %v429_v8, %v429_v8 }
 0x3ea   : > { %546 = vrot.lane.b32.xlu1 %v542_v9, %s696_s12  ;;  %438 = vrot.lane.b32.xlu2 %v434_v10, %s697_s13 }
 0x3ef   : > { %v431_v47 = vpop.f32.mrf.mxu3 }
 0x3f0   : > { %v435_v12 = vpack.c.bf16 %v431_v47, %v431_v47 }
 0x3f2   : > { %548 = vrot.lane.b32.xlu2 %v543_v11, %s696_s12  ;;  %440 = vrot.lane.b32.xlu0 %v435_v12, %s697_s13 }
 0x444   : > { %v439_v14 = vpop.permute.xlu2 %438 }
 0x44c   : > { %v331_v13 = vpop.permute.xlu0 %330  ;;  %v549_v19 = vpop.permute.xlu2 %548 }
 0x44d   : > { %337 = vst.msk [vmem:[%s759_s18] sm:$0xf] %vm336_vm1, %v331_v13 }
 0x44e   : > { %445 = vst.msk [vmem:[%s759_s18] sm:$0xf] %vm444_vm5, %v439_v14 }
 0x454   : > { %v333_v15 = vpop.permute.xlu1 %332 }
 0x455   : > { %338 = vst.msk [vmem:[%s759_s18 + $0x4] sm:$0xf] %vm336_vm1, %v333_v15 }
 0x45c   : > { %v547_v17 = vpop.permute.xlu1 %546 }
 0x45d   : > { %553 = vst.msk [vmem:[%s759_s18] sm:$0xf] %vm552_vm6, %v547_v17 }
 0x464   : > { %v441_v18 = vpop.permute.xlu0 %440 }
 0x465   : > { %446 = vst.msk [vmem:[%s759_s18 + $0x4] sm:$0xf] %vm444_vm5, %v441_v18 }
 0x466   : > { %554 = vst.msk [vmem:[%s759_s18 + $0x4] sm:$0xf] %vm552_vm6, %v549_v19 }
 0x467 PF: > { %s11_s6 = sadd.s32 1, %s694_s6  }
 0x468   : > { %p8_p4 = scmp.ge.s32.totalorder %s11_s6, 4  }
 0x46a   :  { %10 = sbr.rel (!%p8_p4) target bundleno = 1 (0x1), region = 54 }

// kernel: maskgit_forward.14
= control target key start
LH: loop header
LB: loop body
LE: loop exit
PB: predicated region body
PF: predicated region fallthrough
CT: control target
= control target key end

     0   :  { %s931_s18 = smov 0   ;;  %s933_s19 = smov 0   ;;  %s1076_s0 = inlined_call_operand.vmem [shape: f32[32,128], index: 0, kind: input, shape index: {}]   ;;  %s1077_s1 = inlined_call_operand.vmem [shape: f32[1,128], index: 1, kind: input, shape index: {}]   ;;  %s1078_s2 = inlined_call_operand.vmem [shape: f32[1,128], index: 2, kind: input, shape index: {}]   ;;  %s1079_s3 = inlined_call_operand.vmem [shape: bf16[128,384], index: 3, kind: input, shape index: {}]   ;;  %s1080_s4 = inlined_call_operand.vmem [shape: f32[1,384], index: 4, kind: input, shape index: {}]   ;;  %s1081_s5 = inlined_call_operand.vmem [shape: bf16[32,384], index: 5, kind: output, shape index: {}]  }
   0x1   :  { %s935_s20 = smov 0   ;;  %s937_s21 = smov 0  }
   0x2   :  { %s939_s22 = smov 0  }
   0x3 LB: > { %s24_s23 = sadd.s32 1, %s894_s21  ;;  %s733_s24 = sadd.s32 4294967295, %s898_s22   ;;  %s898_s22 = sphi %s939_s22, %s15_s22   ;;  %s894_s21 = sphi %s937_s21, %s1086_s21   ;;  %s890_s20 = sphi %s935_s20, %s1085_s20   ;;  %s886_s19 = sphi %s933_s19, %s1084_s19   ;;  %s882_s18 = sphi %s931_s18, %s1083_s18  }
   0x4   : > { %p25_p0 = scmp.ge.s32.totalorder %s24_s23, 3  ;;  %p109_p1 = scmp.ne.s32.totalorder %s886_s19, %s882_s18 }
   0x5   : > { %p110_p2 = scmp.eq.s32.totalorder %s898_s22, 0  ;;  %p167_p4 = scmp.eq.s32.totalorder %s733_s24, 2 }
   0x6   : > { %s1088_s23 = smov (%p25_p0, %s24_s23), 0  ;;  %s102_s26 = sadd.s32 1, %s886_s19 }
   0x7   : > { %p111_p3 = por %p110_p2, %p109_p1  ;;  %s99_s25 = ssub.s32 %s894_s21, %s1088_s23 }
   0x8   : > { %p100_p5 = scmp.eq.s32.totalorder %s99_s25, 0  ;;  %p966_p6 = por %p167_p4, %p109_p1 }
   0x9   : > { %p737_p7 = scmp.ge.s32.totalorder %s898_s22, 3 }
   0xa   : > { %s971_s28 = scalar_select %p100_p5, %s886_s19, %s102_s26  }
   0xb   : > { %204 = sbr.rel (%p737_p7) target bundleno = 36 (0x24), region = 28 }
  0x10   : > { %207 = sbr.rel (!%p111_p3) target bundleno = 36 (0x24), region = 32  ;;  %s209_s29 = sand.u32 (%p111_p3), 1, %s886_s19  }
  0x11   : > { %s739_s30 = sshll.u32 (%p111_p3), %s894_s21, 2  ;;  %s738_s6 = sshll.u32 (%p111_p3), %s209_s29, 6 }
  0x12   : > { %s979_s9 = scalar_lea.vmem (%p111_p3), %s1079_s3, %s739_s30  ;;  %s211_s10 = scalar_lea.vmem (%p111_p3), [#allocation2], %s738_s6 }
  0x13   : > { %v230_v0 = vld [vmem:[%s979_s9] sm:$0xf] (%p111_p3)  ;;  %v232_v1 = vld [vmem:[%s979_s9 + $0xc] sm:$0xf] (%p111_p3)  ;;  %v234_v2 = vld [vmem:[%s979_s9 + $0x18] sm:$0xf] (%p111_p3) }
  0x14   : > { %231 = vst [vmem:[%s211_s10] sm:$0xf] (%p111_p3), %v230_v0  ;;  %v236_v3 = vld [vmem:[%s979_s9 + $0x24] sm:$0xf] (%p111_p3)  ;;  %v238_v4 = vld [vmem:[%s979_s9 + $0x30] sm:$0xf] (%p111_p3) }
  0x15   : > { %233 = vst [vmem:[%s211_s10 + $0x4] sm:$0xf] %v232_v1  ;;  %v240_v5 = vld [vmem:[%s979_s9 + $0x3c] sm:$0xf]  ;;  %v242_v6 = vld [vmem:[%s979_s9 + $0x48] sm:$0xf] }
  0x16   : > { %235 = vst [vmem:[%s211_s10 + $0x8] sm:$0xf] %v234_v2  ;;  %v244_v7 = vld [vmem:[%s979_s9 + $0x54] sm:$0xf]  ;;  %v246_v8 = vld [vmem:[%s979_s9 + $0x60] sm:$0xf] }
  0x17   : > { %237 = vst [vmem:[%s211_s10 + $0xc] sm:$0xf] %v236_v3  ;;  %v248_v9 = vld [vmem:[%s979_s9 + $0x6c] sm:$0xf]  ;;  %v250_v10 = vld [vmem:[%s979_s9 + $0x78] sm:$0xf] }
  0x18   : > { %239 = vst [vmem:[%s211_s10 + $0x10] sm:$0xf] %v238_v4  ;;  %v252_v11 = vld [vmem:[%s979_s9 + $0x84] sm:$0xf]  ;;  %v254_v12 = vld [vmem:[%s979_s9 + $0x90] sm:$0xf] }
  0x19   : > { %241 = vst [vmem:[%s211_s10 + $0x14] sm:$0xf] %v240_v5  ;;  %v256_v13 = vld [vmem:[%s979_s9 + $0x9c] sm:$0xf]  ;;  %v258_v14 = vld [vmem:[%s979_s9 + $0xa8] sm:$0xf] }
  0x1a   : > { %243 = vst [vmem:[%s211_s10 + $0x18] sm:$0xf] %v242_v6  ;;  %v260_v15 = vld [vmem:[%s979_s9 + $0xb4] sm:$0xf] }
  0x1b   : > { %245 = vst [vmem:[%s211_s10 + $0x1c] sm:$0xf] %v244_v7 }
  0x1c   : > { %247 = vst [vmem:[%s211_s10 + $0x20] sm:$0xf] %v246_v8 }
  0x1d   : > { %249 = vst [vmem:[%s211_s10 + $0x24] sm:$0xf] %v248_v9 }
  0x1e   : > { %251 = vst [vmem:[%s211_s10 + $0x28] sm:$0xf] %v250_v10 }
  0x1f   : > { %253 = vst [vmem:[%s211_s10 + $0x2c] sm:$0xf] %v252_v11 }
  0x20   : > { %255 = vst [vmem:[%s211_s10 + $0x30] sm:$0xf] %v254_v12 }
  0x21   : > { %257 = vst [vmem:[%s211_s10 + $0x34] sm:$0xf] %v256_v13 }
  0x22   : > { %259 = vst [vmem:[%s211_s10 + $0x38] sm:$0xf] %v258_v14 }
  0x23   : > { %261 = vst [vmem:[%s211_s10 + $0x3c] sm:$0xf] %v260_v15 }
  0x24 PF: > { %p740_p8 = scmp.ge.s32.totalorder %s898_s22, 1  ;;  %p322_p9 = scmp.lt.s32.totalorder %s898_s22, 4 }
  0x26   : > { %p323_p10 = pnand %p740_p8, %p322_p9 }
  0x27   : > { %p369_p11 = scmp.lt.s32.totalorder (!%p323_p10), %s890_s20, 2  ;;  %s329_s6 = sand.u32 (!%p323_p10), 1, %s882_s18  }
  0x28   : > { %326 = sbr.rel (%p323_p10) target bundleno = 472 (0x1d8), region = 77  ;;  %s741_s7 = sshll.u32 (!%p323_p10), %s329_s6, 6 }
  0x29   : > { %s331_s8 = scalar_lea.vmem (!%p323_p10), [#allocation2], %s741_s7  ;;  %s742_s15 = sshll.u32 (!%p323_p10), %s329_s6, 4 }
  0x2a   : > { %s362_s16 = scalar_lea.vmem (!%p323_p10), [#allocation3], %s742_s15 }
  0x2d   : > { %v375_v16 = vld [vmem:[%s1076_s0 + $0x10] sm:$0xff]  ;;  %v373_v17 = vld [vmem:[%s1076_s0] sm:$0xff]  ;;  %v376_v18 = vld [vmem:[%s1076_s0 + $0x18] sm:$0xff]  ;;  %v900_v20 = vmov 128.0   ;;  %s1029_s25 = scalar_select %p369_p11, %s890_s20, 2 }
  0x2e   : > { %383 = vadd.xlane.f32.xlu1 %v375_v16  ;;  %379 = vadd.xlane.f32.xlu0 %v373_v17  ;;  %v374_v19 = vld [vmem:[%s1076_s0 + $0x8] sm:$0xff]  ;;  %850 = vrcp.f32 %v900_v20  ;;  %v786_v43 = vld [vmem:[%s331_s8 + $0x38] sm:$0xff]  ;;  %v785_v44 = vld [vmem:[%s331_s8 + $0x30] sm:$0xff]  ;;  %s776_s17 = sshll.u32 (%p966_p6), %s890_s20, 2 }
  0x2f   : > { %s371_s30 = scalar_lea.vmem %s1080_s4, %s1029_s25  ;;  %550 = vmatpush.bf16.msra.mxu0 %v786_v43  ;;  %798 = vmatpush.bf16.msra.mxu1 %v786_v43  ;;  %v784_v45 = vld [vmem:[%s331_s8 + $0x28] sm:$0xff]  ;;  %v783_v46 = vld [vmem:[%s331_s8 + $0x20] sm:$0xff]  ;;  %v782_v47 = vld [vmem:[%s331_s8 + $0x18] sm:$0xff]  ;;  %s588_s25 = scalar_lea.vmem (%p966_p6), %s1081_s5, %s776_s17 }
  0x30   : > { %v781_v48 = vld [vmem:[%s331_s8 + $0x10] sm:$0xff]  ;;  %v780_v49 = vld [vmem:[%s331_s8 + $0x8] sm:$0xff]  ;;  %v779_v54 = vld [vmem:[%s331_s8] sm:$0xff] }
  0x33   : > { %551 = vmatpush.bf16.msra.mxu0 %v785_v44  ;;  %799 = vmatpush.bf16.msra.mxu1 %v785_v44 }
  0x34   : > { %v851_v21 = vpop.eup %850 }
  0x35   : > { %v388_v22 = vmul.f32 128.0, %v851_v21  ;;  %vm392_vm0 = vweird.f32 %v851_v21 }
  0x36   : > { %385 = vadd.xlane.f32.xlu1 %v376_v18  ;;  %381 = vadd.xlane.f32.xlu0 %v374_v19 }
  0x37   : > { %v389_v23 = vsub.f32 1.0, %v388_v22  ;;  %552 = vmatpush.bf16.msra.mxu0 %v784_v45  ;;  %800 = vmatpush.bf16.msra.mxu1 %v784_v45 }
  0x39   : > { %v390_v24 = vmul.f32 %v851_v21, %v389_v23 }
  0x3b   : > { %v391_v25 = vadd.f32 %v851_v21, %v390_v24  ;;  %553 = vmatpush.bf16.msra.mxu0 %v783_v46  ;;  %801 = vmatpush.bf16.msra.mxu1 %v783_v46 }
  0x3d   : > { %v393_v26 = vsel %vm392_vm0, %v851_v21, %v391_v25 }
  0x3f   : > { %554 = vmatpush.bf16.msra.mxu0 %v782_v47  ;;  %802 = vmatpush.bf16.msra.mxu1 %v782_v47 }
  0x43   : > { %555 = vmatpush.bf16.msra.mxu0 %v781_v48  ;;  %803 = vmatpush.bf16.msra.mxu1 %v781_v48 }
  0x47   : > { %556 = vmatpush.bf16.msra.mxu0 %v780_v49  ;;  %804 = vmatpush.bf16.msra.mxu1 %v780_v49 }
  0x4b   : > { %557 = vmatpush.bf16.msra.mxu0 %v779_v54  ;;  %805 = vmatpush.bf16.msra.mxu1 %v779_v54 }
  0xa1   : > { %v384_v27 = vpop.xlane.xlu1 %383  ;;  %v380_v28 = vpop.xlane.xlu0 %379 }
  0xa2   : > { %v396_v29 = vmul.f32 %v393_v26, %v384_v27  ;;  %v394_v30 = vmul.f32 %v393_v26, %v380_v28 }
  0xa4   : > { %v1011_v31 = vsub.f32 %v375_v16, %v396_v29  ;;  %v1013_v32 = vsub.f32 %v373_v17, %v394_v30  ;;  %v847_v17 = vld [vmem:[%s1077_s1] ss:$0 sm:$0xff] }
  0xa5   : > { %v848_v30 = vld [vmem:[%s1078_s2] ss:$0 sm:$0xff] }
  0xa6   : > { %v404_v33 = vmul.f32 %v1011_v31, %v1011_v31  ;;  %v402_v34 = vmul.f32 %v1013_v32, %v1013_v32 }
  0xa8   : > { %410 = vadd.xlane.f32.xlu0 %v404_v33  ;;  %406 = vadd.xlane.f32.xlu2 %v402_v34 }
  0xa9   : > { %v386_v35 = vpop.xlane.xlu1 %385  ;;  %v382_v36 = vpop.xlane.xlu0 %381 }
  0xaa   : > { %v397_v37 = vmul.f32 %v393_v26, %v386_v35  ;;  %v395_v38 = vmul.f32 %v393_v26, %v382_v36 }
  0xac   : > { %v1019_v39 = vsub.f32 %v376_v18, %v397_v37  ;;  %v1021_v40 = vsub.f32 %v374_v19, %v395_v38 }
  0xae   : > { %v405_v41 = vmul.f32 %v1019_v39, %v1019_v39  ;;  %v403_v42 = vmul.f32 %v1021_v40, %v1021_v40 }
  0xb0   : > { %412 = vadd.xlane.f32.xlu1 %v405_v41  ;;  %408 = vadd.xlane.f32.xlu2 %v403_v42 }
 0x11b   : > { %v407_v50 = vpop.xlane.xlu2 %406  ;;  %v411_v51 = vpop.xlane.xlu0 %410 }
 0x11c   : > { %v414_v52 = vmul.f32 %v407_v50, %v393_v26  ;;  %v416_v53 = vmul.f32 %v411_v51, %v393_v26 }
 0x11e   : > { %v418_v55 = vadd.f32 1e-05, %v414_v52  ;;  %v420_v56 = vadd.f32 1e-05, %v416_v53 }
 0x120   : > { %852 = vrsqrt.f32 %v418_v55  ;;  %vm448_vm3 = vweird.f32 %v420_v56  ;;  %vm428_vm4 = vweird.f32 %v418_v55 }
 0x121   : > { %854 = vrsqrt.f32 %v420_v56 }
 0x123   : > { %v413_v57 = vpop.xlane.xlu1 %412  ;;  %v409_v58 = vpop.xlane.xlu2 %408 }
 0x124   : > { %v417_v59 = vmul.f32 %v413_v57, %v393_v26  ;;  %v415_v60 = vmul.f32 %v409_v58, %v393_v26 }
 0x126   : > { %v853_v61 = vpop.eup %852  ;;  %v421_v62 = vadd.f32 1e-05, %v417_v59  ;;  %v419_v63 = vadd.f32 1e-05, %v415_v60 }
 0x127   : > { %v855_v0 = vpop.eup %854  ;;  %v423_v1 = vmul.f32 %v853_v61, %v418_v55  ;;  %vm429_vm2 = vweird.f32 %v853_v61 }
 0x128   : > { %v443_v2 = vmul.f32 %v855_v0, %v420_v56  ;;  %856 = vrsqrt.f32 %v421_v62  ;;  %vm449_vm1 = vweird.f32 %v855_v0  ;;  %vm430_vm6 = vmor %vm428_vm4, %vm429_vm2  ;;  %vm458_vm9 = vweird.f32 %v421_v62 }
 0x129   : > { %v424_v3 = vmul.f32 %v853_v61, %v423_v1  ;;  %858 = vrsqrt.f32 %v419_v63  ;;  %vm450_vm5 = vmor %vm448_vm3, %vm449_vm1  ;;  %vm438_vm11 = vweird.f32 %v419_v63 }
 0x12a   : > { %v444_v4 = vmul.f32 %v855_v0, %v443_v2 }
 0x12b   : > { %v425_v5 = vmul.f32 0.5, %v424_v3 }
 0x12c   : > { %v445_v6 = vmul.f32 0.5, %v444_v4 }
 0x12d   : > { %v426_v7 = vsub.f32 1.5, %v425_v5 }
 0x12e   : > { %v857_v8 = vpop.eup %856  ;;  %v446_v9 = vsub.f32 1.5, %v445_v6 }
 0x12f   : > { %v859_v10 = vpop.eup %858  ;;  %v453_v11 = vmul.f32 %v857_v8, %v421_v62  ;;  %v427_v12 = vmul.f32 %v853_v61, %v426_v7  ;;  %vm459_vm7 = vweird.f32 %v857_v8 }
 0x130   : > { %v447_v13 = vmul.f32 %v855_v0, %v446_v9  ;;  %v433_v14 = vmul.f32 %v859_v10, %v419_v63  ;;  %vm439_vm8 = vweird.f32 %v859_v10  ;;  %vm460_vm10 = vmor %vm458_vm9, %vm459_vm7 }
 0x131   : > { %v454_v15 = vmul.f32 %v857_v8, %v453_v11  ;;  %v431_v21 = vsel %vm430_vm6, %v853_v61, %v427_v12  ;;  %vm440_vm12 = vmor %vm438_vm11, %vm439_vm8 }
 0x132   : > { %v434_v16 = vmul.f32 %v859_v10, %v433_v14  ;;  %v451_v19 = vsel %vm450_vm5, %v855_v0, %v447_v13  ;;  %v465_v26 = vmul.f32 %v847_v17, %v431_v21 }
 0x133   : > { %v455_v18 = vmul.f32 0.5, %v454_v15  ;;  %v467_v24 = vmul.f32 %v847_v17, %v451_v19 }
 0x134   : > { %v435_v20 = vmul.f32 0.5, %v434_v16  ;;  %v469_v36 = vmul.f32 %v465_v26, %v1013_v32 }
 0x135   : > { %v456_v22 = vsub.f32 1.5, %v455_v18  ;;  %v471_v34 = vmul.f32 %v467_v24, %v1011_v31  ;;  %v849_v31 = vld [vmem:[%s371_s30] ss:$0 sm:$0xff] }
 0x136   : > { %v436_v23 = vsub.f32 1.5, %v435_v20  ;;  %v476_v43 = vadd.f32 %v848_v30, %v469_v36 }
 0x137   : > { %v457_v25 = vmul.f32 %v857_v8, %v456_v22  ;;  %v478_v41 = vadd.f32 %v848_v30, %v471_v34 }
 0x138   : > { %v437_v27 = vmul.f32 %v859_v10, %v436_v23 }
 0x139   : > { %v461_v28 = vsel %vm460_vm10, %v857_v8, %v457_v25 }
 0x13a   : > { %v441_v29 = vsel %vm440_vm12, %v859_v10, %v437_v27  ;;  %v468_v33 = vmul.f32 %v847_v17, %v461_v28 }
 0x13b   : > { %v466_v35 = vmul.f32 %v847_v17, %v441_v29 }
 0x13c   : > { %v472_v37 = vmul.f32 %v468_v33, %v1019_v39 }
 0x13d   : > { %v470_v38 = vmul.f32 %v466_v35, %v1021_v40 }
 0x13e   : > { %v479_v42 = vadd.f32 %v848_v30, %v472_v37 }
 0x13f   : > { %v477_v44 = vadd.f32 %v848_v30, %v470_v38 }
 0x140   : > { %v481_v45 = vpack.c.bf16 %v479_v42, %v478_v41 }
 0x141   : > { %v480_v46 = vpack.c.bf16 %v477_v44, %v476_v43 }
 0x142   : > { %563 = vmatmul.bf16.vlgmr.msra.gmra.mxu1 %v481_v45 }
 0x143   : > { %558 = vmatmul.bf16.vlgmr.msra.gmra.mxu0 %v480_v46 }
 0x1bf   : > { %v564_v47 = vpop.f32.mrf.mxu1 }
 0x1c0   : > { %v559_v48 = vpop.f32.mrf.mxu0  ;;  %v565_v39 = vadd.f32 %v849_v31, %v564_v47 }
 0x1c1   : > { %v560_v50 = vadd.f32 %v849_v31, %v559_v48 }
 0x1c7   : > { %v566_v32 = vpop.f32.mrf.mxu1 }
 0x1c8   : > { %v561_v40 = vpop.f32.mrf.mxu0  ;;  %v567_v49 = vadd.f32 %v849_v31, %v566_v32 }
 0x1c9   : > { %v562_v51 = vadd.f32 %v849_v31, %v561_v40  ;;  %583 = sbr.rel (!%p966_p6) target bundleno = 472 (0x1d8), region = 85 }
 0x1ca   : > { %v795_v52 = vpack.c.bf16 %v567_v49, %v565_v39 }
 0x1cb   : > { %v790_v53 = vpack.c.bf16 %v562_v51, %v560_v50 }
 0x1cc   : > { %797 = vst [vmem:[%s362_s16 + $0x8] sm:$0xff] %v795_v52  }
 0x1cd   : > { %791 = vst [vmem:[%s362_s16] sm:$0xff] %v790_v53  }
 0x1d3   : > { %v609_v56 = vld [vmem:[%s362_s16 + $0x8] sm:$0xf]  ;;  %v611_v57 = vld [vmem:[%s362_s16 + $0xc] sm:$0xf] }
 0x1d4   : > { %v605_v54 = vld [vmem:[%s362_s16] sm:$0xf]  ;;  %v607_v55 = vld [vmem:[%s362_s16 + $0x4] sm:$0xf]  ;;  %610 = vst [vmem:[%s588_s25 + $0x18] sm:$0xf] %v609_v56 }
 0x1d5   : > { %606 = vst [vmem:[%s588_s25] sm:$0xf] %v605_v54 }
 0x1d6   : > { %608 = vst [vmem:[%s588_s25 + $0xc] sm:$0xf] %v607_v55 }
 0x1d7   : > { %612 = vst [vmem:[%s588_s25 + $0x24] sm:$0xf] %v611_v57 }
 0x1d8 PF: > { %s15_s22 = sadd.s32 1, %s898_s22   ;;  %s1083_s18 = smov %s886_s19 }
 0x1d9   : > { %p12_p12 = scmp.ge.s32.totalorder %s15_s22, 5   ;;  %s1084_s19 = smov %s971_s28 }
 0x1da   : > { %s1085_s20 = smov %s894_s21  ;;  %s1086_s21 = smov %s1088_s23 }
 0x1db   :  { %14 = sbr.rel (!%p12_p12) target bundleno = 3 (0x3), region = 163 }

// kernel: maskgit_forward.16
= control target key start
LH: loop header
LB: loop body
LE: loop exit
PB: predicated region body
PF: predicated region fallthrough
CT: control target
= control target key end

     0   :  { %s277_s1 = inlined_call_operand.vmem [shape: bf16[128,128], index: 1, kind: input, shape index: {}]   ;;  %s278_s2 = inlined_call_operand.vmem [shape: f32[1,128], index: 2, kind: input, shape index: {}]   ;;  %s279_s0 = inlined_call_operand.vmem [shape: bf16[32,128], index: 0, kind: input, shape index: {}]   ;;  %s280_s3 = inlined_call_operand.vmem [shape: f32[32,128], index: 3, kind: input, shape index: {}]   ;;  %s281_s4 = inlined_call_operand.vmem [shape: f32[32,128], index: 4, kind: output, shape index: {}]  }
   0x1   :  { %v185_v0 = vld [vmem:[%s277_s1 + $0x38] sm:$0xff]  ;;  %v184_v1 = vld [vmem:[%s277_s1 + $0x30] sm:$0xff]  ;;  %v183_v2 = vld [vmem:[%s277_s1 + $0x28] sm:$0xff] }
   0x2   :  { %101 = vmatpush.bf16.msra.mxu0 %v185_v0  ;;  %186 = vmatpush.bf16.msra.mxu1 %v185_v0  ;;  %v182_v3 = vld [vmem:[%s277_s1 + $0x20] sm:$0xff]  ;;  %v181_v4 = vld [vmem:[%s277_s1 + $0x18] sm:$0xff]  ;;  %v180_v5 = vld [vmem:[%s277_s1 + $0x10] sm:$0xff] }
   0x3   :  { %v179_v6 = vld [vmem:[%s277_s1 + $0x8] sm:$0xff]  ;;  %v178_v7 = vld [vmem:[%s277_s1] sm:$0xff]  ;;  %v122_v14 = vld [vmem:[%s280_s3 + $0x10] sm:$0xff] }
   0x4   :  { %v176_v8 = vld [vmem:[%s279_s0] sm:$0xff]  ;;  %v177_v9 = vld [vmem:[%s279_s0 + $0x8] sm:$0xff]  ;;  %v123_v22 = vld [vmem:[%s280_s3 + $0x18] sm:$0xff] }
   0x5   :  { %v194_v10 = vld [vmem:[%s278_s2] ss:$0 sm:$0xff]  ;;  %v121_v20 = vld [vmem:[%s280_s3 + $0x8] sm:$0xff] }
   0x6   :  { %102 = vmatpush.bf16.msra.mxu0 %v184_v1  ;;  %187 = vmatpush.bf16.msra.mxu1 %v184_v1  ;;  %v120_v12 = vld [vmem:[%s280_s3] sm:$0xff] }
   0xa   :  { %103 = vmatpush.bf16.msra.mxu0 %v183_v2  ;;  %188 = vmatpush.bf16.msra.mxu1 %v183_v2 }
   0xe   :  { %104 = vmatpush.bf16.msra.mxu0 %v182_v3  ;;  %189 = vmatpush.bf16.msra.mxu1 %v182_v3 }
  0x12   :  { %105 = vmatpush.bf16.msra.mxu0 %v181_v4  ;;  %190 = vmatpush.bf16.msra.mxu1 %v181_v4 }
  0x16   :  { %106 = vmatpush.bf16.msra.mxu0 %v180_v5  ;;  %191 = vmatpush.bf16.msra.mxu1 %v180_v5 }
  0x1a   :  { %107 = vmatpush.bf16.msra.mxu0 %v179_v6  ;;  %192 = vmatpush.bf16.msra.mxu1 %v179_v6 }
  0x1e   :  { %108 = vmatpush.bf16.msra.mxu0 %v178_v7  ;;  %193 = vmatpush.bf16.msra.mxu1 %v178_v7 }
  0x21   :  { %109 = vmatmul.bf16.vlgmr.msra.gmra.mxu0 %v176_v8  ;;  %114 = vmatmul.bf16.vlgmr.msra.gmra.mxu1 %v177_v9 }
  0x9e   :  { %v110_v11 = vpop.f32.mrf.mxu0  ;;  %v115_v13 = vpop.f32.mrf.mxu1 }
  0x9f   :  { %v111_v15 = vadd.f32 %v194_v10, %v110_v11  ;;  %v116_v16 = vadd.f32 %v194_v10, %v115_v13 }
  0xa1   :  { %v124_v17 = vadd.f32 %v120_v12, %v111_v15  ;;  %v126_v18 = vadd.f32 %v122_v14, %v116_v16 }
  0xa3   :  { %128 = vst [vmem:[%s281_s4] sm:$0xff] %v124_v17 }
  0xa4   :  { %130 = vst [vmem:[%s281_s4 + $0x10] sm:$0xff] %v126_v18 }
  0xa6   :  { %v112_v19 = vpop.f32.mrf.mxu0  ;;  %v117_v21 = vpop.f32.mrf.mxu1 }
  0xa7   :  { %v113_v23 = vadd.f32 %v194_v10, %v112_v19  ;;  %v118_v24 = vadd.f32 %v194_v10, %v117_v21 }
  0xa9   :  { %v125_v25 = vadd.f32 %v121_v20, %v113_v23  ;;  %v127_v26 = vadd.f32 %v123_v22, %v118_v24 }
  0xab   :  { %129 = vst [vmem:[%s281_s4 + $0x8] sm:$0xff] %v125_v25 }
  0xac   :  { %131 = vst [vmem:[%s281_s4 + $0x18] sm:$0xff] %v127_v26 }

// kernel: maskgit_forward.25
= control target key start
LH: loop header
LB: loop body
LE: loop exit
PB: predicated region body
PF: predicated region fallthrough
CT: control target
= control target key end

     0   :  { %s1054_s0 = inlined_call_operand.vmem [shape: bf16[2,16,128], index: 0, kind: input, shape index: {}]   ;;  %s1055_s1 = inlined_call_operand.vmem [shape: bf16[128,256], index: 1, kind: input, shape index: {}]   ;;  %s1056_s2 = inlined_call_operand.vmem [shape: f32[16,256], index: 2, kind: input, shape index: {}]   ;;  %s1057_s3 = inlined_call_operand.hbm [shape: f32[2,16,256], index: 3, kind: output, shape index: {}]  }
   0x1   :  { %1059 = sst [smem:[#allocation8_spill]] %s1055_s1 }
   0x2   :  { %1060 = sst [smem:[#allocation9_spill]] %s1056_s2 }
   0x3   :  { %8 = vsyncpa [#allocation5], 0 }
   0x4   :  { %10 = vsyncpa [#allocation5 + $0x1], 0  ;;  %s873_s12 = smov 0   ;;  %s875_s13 = smov 0  }
   0x5   :  { %s877_s14 = smov 0   ;;  %s879_s15 = smov 0  }
   0x6   :  { %s881_s16 = smov 0   ;;  %s883_s17 = smov 0  }
   0x7   :  { %s885_s18 = smov 0   ;;  %s887_s19 = smov 0  }
   0x8   :  { %s889_s20 = smov 0   ;;  %s891_s21 = smov 0  }
   0x9 LB: > { %s583_s22 = sadd.s32 4294967295, %s848_s21   ;;  %s584_s23 = sadd.s32 4294967294, %s848_s21   ;;  %s848_s21 = sphi %s891_s21, %s16_s21   ;;  %s844_s20 = sphi %s889_s20, %s1076_s20   ;;  %s840_s19 = sphi %s887_s19, %s1075_s19   ;;  %s836_s18 = sphi %s885_s18, %s1074_s18   ;;  %s832_s17 = sphi %s883_s17, %s1073_s17   ;;  %s828_s16 = sphi %s881_s16, %s1072_s16   ;;  %s824_s15 = sphi %s879_s15, %s1071_s15   ;;  %s820_s14 = sphi %s877_s14, %s1070_s14   ;;  %s816_s13 = sphi %s875_s13, %s1069_s13   ;;  %s812_s12 = sphi %s873_s12, %s1068_s12  }
   0xa   : > { %s25_s24 = sadd.s32 1, %s840_s19  ;;  %s28_s25 = sadd.s32 1, %s844_s20 }
   0xb   : > { %p26_p0 = scmp.ge.s32.totalorder %s25_s24, 2  ;;  %s61_s26 = sadd.s32 1, %s828_s16 }
   0xc   : > { %p68_p1 = scmp.ne.s32.totalorder %s828_s16, %s824_s15  ;;  %p69_p2 = scmp.eq.s32.totalorder %s848_s21, 0 }
   0xd   : > { %s1078_s24 = smov (%p26_p0, %s25_s24), 0  ;;  %s1080_s25 = smov (!%p26_p0, %s28_s25), %s844_s20 }
   0xe   : > { %s58_s27 = ssub.s32 %s840_s19, %s1078_s24  ;;  %p936_p3 = por %p69_p2, %p68_p1 }
   0xf   : > { %p30_p4 = scmp.ge.s32.totalorder %s1080_s25, 2  ;;  %p59_p5 = scmp.eq.s32.totalorder %s58_s27, 0 }
  0x10   : > { %s115_s29 = sadd.s32 1, %s820_s14  ;;  %p125_p6 = scmp.ne.s32.totalorder %s820_s14, %s816_s13 }
  0x11   : > { %s1082_s25 = smov (%p30_p4, %s1080_s25), 0  ;;  %p126_p7 = scmp.eq.s32.totalorder %s583_s22, 3 }
  0x12   : > { %1062 = sst [smem:[#allocation7_spill]] %s1082_s25  ;;  %s110_s4 = ssub.s32 %s844_s20, %s1082_s25 }
  0x13   : > { %s946_s30 = scalar_select %p59_p5, %s828_s16, %s61_s26  }
  0x14   : > { %s112_s5 = sor.u32 %s110_s4, %s58_s27  ;;  %p131_p8 = scmp.ne.s32.totalorder %s816_s13, %s812_s12 }
  0x15   : > { %p113_p9 = scmp.eq.s32.totalorder %s112_s5, 0  ;;  %p952_p10 = por %p126_p7, %p125_p6 }
  0x16   : > { %p132_p11 = scmp.eq.s32.totalorder %s584_s23, 3  ;;  %p586_p13 = scmp.ge.s32.totalorder %s848_s21, 4 }
  0x17   : > { %s957_s7 = scalar_select %p113_p9, %s820_s14, %s115_s29  }
  0x18   : > { %p959_p12 = por %p132_p11, %p131_p8  ;;  %148 = sbr.rel (%p586_p13) target bundleno = 67 (0x43), region = 16 }
  0x1d   : > { %159 = sbr.rel (!%p936_p3) target bundleno = 55 (0x37), region = 24  ;;  %s161_s9 = sand.u32 (%p936_p3), 1, %s828_s16  }
  0x1e   : > { %s588_s10 = sshll.u32 (%p936_p3), %s840_s19, 2  ;;  %s587_s11 = sshll.u32 (%p936_p3), %s161_s9, 6 }
  0x1f   : > { %s1065_s1 = sld [smem:[#allocation8_spill]] (%p936_p3)  ;;  %s163_s27 = scalar_lea.vmem (%p936_p3), [#allocation2], %s587_s11 }
  0x25   : > { %s971_s23 = scalar_lea.vmem %s1065_s1, %s588_s10 }
  0x26   : > { %v182_v0 = vld [vmem:[%s971_s23] sm:$0xf]  ;;  %v184_v1 = vld [vmem:[%s971_s23 + $0x8] sm:$0xf]  ;;  %v186_v2 = vld [vmem:[%s971_s23 + $0x10] sm:$0xf] }
  0x27   : > { %183 = vst [vmem:[%s163_s27] sm:$0xf] %v182_v0  ;;  %v188_v3 = vld [vmem:[%s971_s23 + $0x18] sm:$0xf]  ;;  %v190_v4 = vld [vmem:[%s971_s23 + $0x20] sm:$0xf] }
  0x28   : > { %185 = vst [vmem:[%s163_s27 + $0x4] sm:$0xf] %v184_v1  ;;  %v192_v5 = vld [vmem:[%s971_s23 + $0x28] sm:$0xf]  ;;  %v194_v6 = vld [vmem:[%s971_s23 + $0x30] sm:$0xf] }
  0x29   : > { %187 = vst [vmem:[%s163_s27 + $0x8] sm:$0xf] %v186_v2  ;;  %v196_v7 = vld [vmem:[%s971_s23 + $0x38] sm:$0xf]  ;;  %v198_v8 = vld [vmem:[%s971_s23 + $0x40] sm:$0xf] }
  0x2a   : > { %189 = vst [vmem:[%s163_s27 + $0xc] sm:$0xf] %v188_v3  ;;  %v200_v9 = vld [vmem:[%s971_s23 + $0x48] sm:$0xf]  ;;  %v202_v10 = vld [vmem:[%s971_s23 + $0x50] sm:$0xf] }
  0x2b   : > { %191 = vst [vmem:[%s163_s27 + $0x10] sm:$0xf] %v190_v4  ;;  %v204_v11 = vld [vmem:[%s971_s23 + $0x58] sm:$0xf]  ;;  %v206_v12 = vld [vmem:[%s971_s23 + $0x60] sm:$0xf] }
  0x2c   : > { %193 = vst [vmem:[%s163_s27 + $0x14] sm:$0xf] %v192_v5  ;;  %v208_v13 = vld [vmem:[%s971_s23 + $0x68] sm:$0xf]  ;;  %v210_v14 = vld [vmem:[%s971_s23 + $0x70] sm:$0xf] }
  0x2d   : > { %195 = vst [vmem:[%s163_s27 + $0x18] sm:$0xf] %v194_v6  ;;  %v212_v15 = vld [vmem:[%s971_s23 + $0x78] sm:$0xf] }
  0x2e   : > { %197 = vst [vmem:[%s163_s27 + $0x1c] sm:$0xf] %v196_v7 }
  0x2f   : > { %199 = vst [vmem:[%s163_s27 + $0x20] sm:$0xf] %v198_v8 }
  0x30   : > { %201 = vst [vmem:[%s163_s27 + $0x24] sm:$0xf] %v200_v9 }
  0x31   : > { %203 = vst [vmem:[%s163_s27 + $0x28] sm:$0xf] %v202_v10 }
  0x32   : > { %205 = vst [vmem:[%s163_s27 + $0x2c] sm:$0xf] %v204_v11 }
  0x33   : > { %207 = vst [vmem:[%s163_s27 + $0x30] sm:$0xf] %v206_v12 }
  0x34   : > { %209 = vst [vmem:[%s163_s27 + $0x34] sm:$0xf] %v208_v13 }
  0x35   : > { %211 = vst [vmem:[%s163_s27 + $0x38] sm:$0xf] %v210_v14 }
  0x36   : > { %213 = vst [vmem:[%s163_s27 + $0x3c] sm:$0xf] %v212_v15 }
  0x37 PF: > { %269 = sbr.rel (!%p936_p3) target bundleno = 67 (0x43), region = 65  ;;  %s271_s29 = sand.u32 (%p936_p3), 1, %s828_s16  }
  0x38   : > { %s590_s4 = sshll.u32 (%p936_p3), %s840_s19, 3  ;;  %s589_s5 = sshll.u32 (%p936_p3), %s271_s29, 4 }
  0x39   : > { %s1066_s2 = sld [smem:[#allocation9_spill]] (%p936_p3)  ;;  %s273_s22 = scalar_lea.vmem (%p936_p3), [#allocation3], %s589_s5 }
  0x3f   : > { %s275_s11 = scalar_lea.vmem %s1066_s2, %s590_s4 }
  0x40   : > { %v306_v16 = vld [vmem:[%s275_s11] sm:$0xff]  ;;  %v308_v17 = vld [vmem:[%s275_s11 + $0x10] sm:$0xff] }
  0x41   : > { %307 = vst [vmem:[%s273_s22] sm:$0xff] %v306_v16 }
  0x42   : > { %309 = vst [vmem:[%s273_s22 + $0x8] sm:$0xff] %v308_v17 }
  0x43 PF: > { %p591_p0 = scmp.ge.s32.totalorder %s848_s21, 1  ;;  %p314_p1 = scmp.lt.s32.totalorder %s848_s21, 5 }
  0x45   : > { %p315_p2 = pnand %p591_p0, %p314_p1 }
  0x46   : > { %s321_s28 = sand.u32 (!%p315_p2), 1, %s824_s15   ;;  %p360_p3 = scmp.lt.s32.totalorder (!%p315_p2), %s836_s18, 1 }
  0x47   : > { %318 = sbr.rel (%p315_p2) target bundleno = 249 (0xf9), region = 103  ;;  %s592_s26 = sshll.u32 (!%p315_p2), %s321_s28, 6 }
  0x48   : > { %s323_s23 = scalar_lea.vmem (!%p315_p2), [#allocation2], %s592_s26  ;;  %s593_s9 = sshll.u32 (!%p315_p2), %s321_s28, 4 }
  0x49   : > { %s634_s10 = sshll.u32 (!%p315_p2), %s836_s18, 2  ;;  %s357_s11 = sand.u32 (!%p315_p2), 1, %s816_s13  }
  0x4a   : > { %s466_s22 = sadd.s32 (!%p315_p2), %s832_s17, %s634_s10  ;;  %s594_s26 = sshll.u32 (!%p315_p2), %s357_s11, 4 }
  0x4b   : > { %s330_s1 = scalar_lea.vmem (!%p315_p2), [#allocation3], %s593_s9  ;;  %s635_s2 = sshll.u32 (!%p315_p2), %s466_s22, 3 }
  0x4c   : > { %v647_v18 = vld [vmem:[%s323_s23 + $0x38] sm:$0xff]  ;;  %v646_v19 = vld [vmem:[%s323_s23 + $0x30] sm:$0xff]  ;;  %v645_v20 = vld [vmem:[%s323_s23 + $0x28] sm:$0xff]  ;;  %s361_s27 = scalar_select %p360_p3, %s836_s18, 1 }
  0x4d   : > { %439 = vmatpush.bf16.msra.mxu0 %v647_v18  ;;  %v644_v21 = vld [vmem:[%s323_s23 + $0x20] sm:$0xff]  ;;  %v643_v22 = vld [vmem:[%s323_s23 + $0x18] sm:$0xff]  ;;  %v642_v23 = vld [vmem:[%s323_s23 + $0x10] sm:$0xff]  ;;  %s359_s29 = scalar_lea.vmem [#allocation4], %s594_s26  ;;  %s456_s17 = scalar_lea.sflag [#allocation5], %s357_s11 }
  0x4e   : > { %v641_v24 = vld [vmem:[%s323_s23 + $0x8] sm:$0xff]  ;;  %s638_s15 = sshll.u32 %s361_s27, 3  ;;  %v640_v25 = vld [vmem:[%s323_s23] sm:$0xff]  ;;  %s468_s23 = scalar_lea.hbm %s1057_s3, %s635_s2 }
  0x4f   : > { %s364_s5 = scalar_lea.vmem %s1054_s0, %s638_s15  ;;  %v383_v27 = vld [vmem:[%s330_s1] sm:$0xff]  ;;  %s469_s15 = sshll.u32 %s359_s29, 4  ;;  %v384_v30 = vld [vmem:[%s330_s1 + $0x8] sm:$0xff]  ;;  %s470_s15 = int_to_ptr.vmem [resolvable:$true] %s469_s15 }
  0x50   : > { %v639_v26 = vld [vmem:[%s364_s5] sm:$0xff]  ;;  %s471_s4 = sshll.u32 %s468_s23, 4  ;;  %s758_s5 = scalar_lea.hbm %s1057_s3, 64  ;;  %s472_s4 = int_to_ptr.hbm [resolvable:$true] %s471_s4 }
  0x51   : > { %440 = vmatpush.bf16.msra.mxu0 %v646_v19  ;;  %s752_s18 = sshra.s32 %s472_s4, 4  ;;  %s753_s18 = int_to_ptr.hbm [resolvable:$true] %s752_s18 }
  0x52   : > { %s754_s28 = scalar_lea.hbm %s753_s18, 16  ;;  %p759_p7 = scmp.lt.s32.totalorder %s753_s18, %s1057_s3 }
  0x53   : > { %p755_p4 = scmp.ne.s32.totalorder %s753_s18, %s754_s28  ;;  %p760_p8 = scmp.lt.s32.totalorder %s758_s5, %s754_s28 }
  0x55   : > { %441 = vmatpush.bf16.msra.mxu0 %v645_v20  ;;  %p756_p5 = pnand %p755_p4, %p952_p10  ;;  %p761_p9 = por %p760_p8, %p759_p7 }
  0x57   : > { %p757_p6 = pneg %p756_p5 }
  0x59   : > { %442 = vmatpush.bf16.msra.mxu0 %v644_v21  ;;  %p762_p11 = pnand %p761_p9, %p757_p6 }
  0x5d   : > { %443 = vmatpush.bf16.msra.mxu0 %v643_v22 }
  0x61   : > { %444 = vmatpush.bf16.msra.mxu0 %v642_v23 }
  0x65   : > { %445 = vmatpush.bf16.msra.mxu0 %v641_v24 }
  0x69   : > { %446 = vmatpush.bf16.msra.mxu0 %v640_v25 }
  0x6c   : > { %447 = vmatmul.bf16.vlgmr.msra.gmra.mxu0 %v639_v26 }
  0xe9   : > { %v448_v28 = vpop.f32.mrf.mxu0 }
  0xea   : > { %v449_v29 = vadd.f32 %v448_v28, %v383_v27 }
  0xec   : > { %453 = vst [vmem:[%s359_s29] sm:$0xff] %v449_v29 }
  0xf1   : > { %v450_v31 = vpop.f32.mrf.mxu0 }
  0xf2   : > { %v451_v32 = vadd.f32 %v450_v31, %v384_v30 }
  0xf4   : > { %454 = vst [vmem:[%s359_s29 + $0x8] sm:$0xff] %v451_v32 }
  0xf5   : > { %765 = shalt.err (!%p762_p11)
}
  0xf6   : > { %s850_s1 = smov 128   ;;  %s851_s11 = smov 256  }
  0xf7   : > { %s852_s22 = smov 8  }
  0xf8   : > { %648 = dma.vmem_to_hbm [thread:$0]  (%p952_p10), %s470_s15, 256, %s472_s4, %s456_s17, %s850_s1, %s851_s11, %s852_s22  }
  0xf9 PF: > { %p654_p13 = scmp.ge.s32.totalorder %s848_s21, 2  ;;  %s486_s26 = sand.u32 1, %s812_s12  }
  0xfa   : > { %s487_s27 = scalar_lea.sflag [#allocation5], %s486_s26 }
  0xfb   : > { %p651_p0 = pnand %p654_p13, %p959_p12 }
  0xfd   : > { %p652_p1 = pneg %p651_p0 }
  0xff   : > { %807 = dma.done.wait (%p652_p1), %s487_s27, 256  }
 0x100   : > { %809 = vsyncadd (%p652_p1), %s487_s27, 4294967040  ;;  %s16_s21 = sadd.s32 1, %s848_s21   ;;  %s1067_s6 = sld [smem:[#allocation7_spill]] }
 0x101   : > { %p13_p2 = scmp.ge.s32.totalorder %s16_s21, 6   ;;  %s1068_s12 = smov %s816_s13 }
 0x102   : > { %s1069_s13 = smov %s820_s14  ;;  %s1070_s14 = smov %s957_s7 }
 0x103   : > { %s1071_s15 = smov %s828_s16  ;;  %s1072_s16 = smov %s946_s30 }
 0x104   : > { %s1073_s17 = smov %s840_s19  ;;  %s1074_s18 = smov %s844_s20 }
 0x105   : > { %s1075_s19 = smov %s1078_s24  ;;  %15 = sbr.rel (!%p13_p2) target bundleno = 9 (0x9), region = 162 }
 0x106   : > { %s1076_s20 = smov %s1067_s6 }
 0x10a   :  { %493 = vsyncpa [#allocation5], 1 }
 0x10b   :  { %495 = vsyncpa [#allocation5 + $0x1], 1 }

// kernel: maskgit_forward.17
= control target key start
LH: loop header
LB: loop body
LE: loop exit
PB: predicated region body
PF: predicated region fallthrough
CT: control target
= control target key end

     0   :  { %s1395_s18 = smov 0   ;;  %s1397_s19 = smov 0   ;;  %s1822_s0 = inlined_call_operand.vmem [shape: f32[32,128], index: 0, kind: input, shape index: {}]   ;;  %s1823_s1 = inlined_call_operand.vmem [shape: f32[1,128], index: 1, kind: input, shape index: {}]   ;;  %s1824_s2 = inlined_call_operand.vmem [shape: f32[1,128], index: 2, kind: input, shape index: {}]   ;;  %s1825_s3 = inlined_call_operand.vmem [shape: bf16[128,512], index: 3, kind: input, shape index: {}]   ;;  %s1826_s4 = inlined_call_operand.vmem [shape: f32[1,512], index: 4, kind: input, shape index: {}]   ;;  %s1827_s5 = inlined_call_operand.vmem [shape: bf16[32,512], index: 5, kind: output, shape index: {}]  }
   0x1   :  { %s1399_s20 = smov 0   ;;  %s1401_s21 = smov 0  }
   0x2   :  { %s1403_s22 = smov 0  }
   0x3 LB: > { %s24_s23 = sadd.s32 1, %s1358_s21  ;;  %s1132_s24 = sadd.s32 4294967295, %s1362_s22   ;;  %s1362_s22 = sphi %s1403_s22, %s15_s22   ;;  %s1358_s21 = sphi %s1401_s21, %s1836_s21   ;;  %s1354_s20 = sphi %s1399_s20, %s1835_s20   ;;  %s1350_s19 = sphi %s1397_s19, %s1834_s19   ;;  %s1346_s18 = sphi %s1395_s18, %s1833_s18  }
   0x4   : > { %p25_p0 = scmp.ge.s32.totalorder %s24_s23, 2  ;;  %p109_p1 = scmp.ne.s32.totalorder %s1350_s19, %s1346_s18 }
   0x5   : > { %p110_p2 = scmp.eq.s32.totalorder %s1362_s22, 0  ;;  %p167_p4 = scmp.eq.s32.totalorder %s1132_s24, 1 }
   0x6   : > { %s1838_s23 = smov (%p25_p0, %s24_s23), 0  ;;  %s102_s26 = sadd.s32 1, %s1350_s19 }
   0x7   : > { %p111_p3 = por %p110_p2, %p109_p1  ;;  %s99_s25 = ssub.s32 %s1358_s21, %s1838_s23 }
   0x8   : > { %p100_p5 = scmp.eq.s32.totalorder %s99_s25, 0  ;;  %p1430_p6 = por %p167_p4, %p109_p1 }
   0x9   : > { %p1136_p7 = scmp.ge.s32.totalorder %s1362_s22, 2 }
   0xa   : > { %s1435_s28 = scalar_select %p100_p5, %s1350_s19, %s102_s26  }
   0xb   : > { %204 = sbr.rel (%p1136_p7) target bundleno = 36 (0x24), region = 28 }
  0x10   : > { %207 = sbr.rel (!%p111_p3) target bundleno = 36 (0x24), region = 32  ;;  %s209_s29 = sand.u32 (%p111_p3), 1, %s1350_s19  }
  0x11   : > { %s1221_s30 = sshll.u32 (%p111_p3), %s1358_s21, 3  ;;  %s1137_s6 = sshll.u32 (%p111_p3), %s209_s29, 7 }
  0x12   : > { %s1443_s9 = scalar_lea.vmem (%p111_p3), %s1825_s3, %s1221_s30  ;;  %s211_s10 = scalar_lea.vmem (%p111_p3), [#allocation2], %s1137_s6 }
  0x13   : > { %v273_v0 = vld [vmem:[%s1443_s9] sm:$0xff] (%p111_p3)  ;;  %v275_v1 = vld [vmem:[%s1443_s9 + $0x10] sm:$0xff] (%p111_p3) }
  0x14   : > { %v277_v2 = vld [vmem:[%s1443_s9 + $0x20] sm:$0xff] (%p111_p3)  ;;  %274 = vst [vmem:[%s211_s10] sm:$0xff] (%p111_p3), %v273_v0  ;;  %v279_v3 = vld [vmem:[%s1443_s9 + $0x30] sm:$0xff] (%p111_p3) }
  0x15   : > { %276 = vst [vmem:[%s211_s10 + $0x8] sm:$0xff] %v275_v1  ;;  %v281_v4 = vld [vmem:[%s1443_s9 + $0x40] sm:$0xff]  ;;  %v283_v5 = vld [vmem:[%s1443_s9 + $0x50] sm:$0xff] }
  0x16   : > { %278 = vst [vmem:[%s211_s10 + $0x10] sm:$0xff] %v277_v2  ;;  %v285_v6 = vld [vmem:[%s1443_s9 + $0x60] sm:$0xff]  ;;  %v287_v7 = vld [vmem:[%s1443_s9 + $0x70] sm:$0xff] }
  0x17   : > { %280 = vst [vmem:[%s211_s10 + $0x18] sm:$0xff] %v279_v3  ;;  %v289_v8 = vld [vmem:[%s1443_s9 + $0x80] sm:$0xff]  ;;  %v291_v9 = vld [vmem:[%s1443_s9 + $0x90] sm:$0xff] }
  0x18   : > { %282 = vst [vmem:[%s211_s10 + $0x20] sm:$0xff] %v281_v4  ;;  %v293_v10 = vld [vmem:[%s1443_s9 + $0xa0] sm:$0xff]  ;;  %v295_v11 = vld [vmem:[%s1443_s9 + $0xb0] sm:$0xff] }
  0x19   : > { %284 = vst [vmem:[%s211_s10 + $0x28] sm:$0xff] %v283_v5  ;;  %v297_v12 = vld [vmem:[%s1443_s9 + $0xc0] sm:$0xff]  ;;  %v299_v13 = vld [vmem:[%s1443_s9 + $0xd0] sm:$0xff] }
  0x1a   : > { %286 = vst [vmem:[%s211_s10 + $0x30] sm:$0xff] %v285_v6  ;;  %v301_v14 = vld [vmem:[%s1443_s9 + $0xe0] sm:$0xff]  ;;  %v303_v15 = vld [vmem:[%s1443_s9 + $0xf0] sm:$0xff] }
  0x1b   : > { %288 = vst [vmem:[%s211_s10 + $0x38] sm:$0xff] %v287_v7 }
  0x1c   : > { %290 = vst [vmem:[%s211_s10 + $0x40] sm:$0xff] %v289_v8 }
  0x1d   : > { %292 = vst [vmem:[%s211_s10 + $0x48] sm:$0xff] %v291_v9 }
  0x1e   : > { %294 = vst [vmem:[%s211_s10 + $0x50] sm:$0xff] %v293_v10 }
  0x1f   : > { %296 = vst [vmem:[%s211_s10 + $0x58] sm:$0xff] %v295_v11 }
  0x20   : > { %298 = vst [vmem:[%s211_s10 + $0x60] sm:$0xff] %v297_v12 }
  0x21   : > { %300 = vst [vmem:[%s211_s10 + $0x68] sm:$0xff] %v299_v13 }
  0x22   : > { %302 = vst [vmem:[%s211_s10 + $0x70] sm:$0xff] %v301_v14 }
  0x23   : > { %304 = vst [vmem:[%s211_s10 + $0x78] sm:$0xff] %v303_v15 }
  0x24 PF: > { %p1140_p8 = scmp.ge.s32.totalorder %s1362_s22, 1  ;;  %p317_p9 = scmp.lt.s32.totalorder %s1362_s22, 3 }
  0x26   : > { %p318_p10 = pnand %p1140_p8, %p317_p9 }
  0x27   : > { %s324_s25 = sand.u32 (!%p318_p10), 1, %s1346_s18   ;;  %s1143_s9 = sshll.u32 (!%p318_p10), %s1354_s20, 1 }
  0x28   : > { %321 = sbr.rel (%p318_p10) target bundleno = 573 (0x23d), region = 74  ;;  %s1141_s26 = sshll.u32 (!%p318_p10), %s324_s25, 7 }
  0x29   : > { %s1500_s29 = scalar_lea.vmem (!%p318_p10), [#allocation2], %s1141_s26  ;;  %p367_p11 = scmp.lt.s32.totalorder (!%p318_p10), %s1143_s9, 3 }
  0x2a   : > { %s1142_s13 = sshll.u32 (!%p318_p10), %s324_s25, 5 }
  0x2b   : > { %s1726_s18 = scalar_lea.vmem (!%p318_p10), [#allocation3], %s1142_s13 }
  0x2d   : > { %v375_v16 = vld [vmem:[%s1822_s0 + $0x10] sm:$0xff]  ;;  %v373_v17 = vld [vmem:[%s1822_s0] sm:$0xff]  ;;  %v376_v18 = vld [vmem:[%s1822_s0 + $0x18] sm:$0xff]  ;;  %v1364_v20 = vmov 128.0   ;;  %s1840_s9 = smov (!%p367_p11, %s1143_s9), 3  ;;  %s1238_s14 = sshll.u32 (%p1430_p6), %s1354_s20, 3 }
  0x2e   : > { %383 = vadd.xlane.f32.xlu0 %v375_v16  ;;  %379 = vadd.xlane.f32.xlu1 %v373_v17  ;;  %v374_v19 = vld [vmem:[%s1822_s0 + $0x8] sm:$0xff]  ;;  %1298 = vrcp.f32 %v1364_v20  ;;  %v1202_v43 = vld [vmem:[%s1500_s29 + $0x70] sm:$0xf]  ;;  %v1237_v44 = vld [vmem:[%s1500_s29 + $0x74] sm:$0xf0]  ;;  %s369_s12 = scalar_lea.vmem %s1826_s4, %s1840_s9  ;;  %s994_s17 = scalar_lea.vmem (%p1430_p6), %s1827_s5, %s1238_s14 }
  0x2f   : > { %v1236_v45 = vld [vmem:[%s1500_s29 + $0x74] sm:$0xf]  ;;  %v1203_v46 = vor.u32 %v1237_v44, %v1202_v43  ;;  %v1204_v47 = vld [vmem:[%s1500_s29 + $0x78] sm:$0xf0]  ;;  %v1194_v49 = vld [vmem:[%s1500_s29 + $0x60] sm:$0xf] }
  0x30   : > { %v1207_v48 = vor.u32 %v1236_v45, %v1204_v47  ;;  %v1235_v50 = vld [vmem:[%s1500_s29 + $0x64] sm:$0xf0]  ;;  %v1234_v51 = vld [vmem:[%s1500_s29 + $0x64] sm:$0xf]  ;;  %v1196_v53 = vld [vmem:[%s1500_s29 + $0x68] sm:$0xf0] }
  0x31   : > { %584 = vmatpush.bf16.msra.mxu0 %v1203_v46  ;;  %1239 = vmatpush.bf16.msra.mxu2 %v1203_v46  ;;  %v1195_v52 = vor.u32 %v1235_v50, %v1194_v49  ;;  %v1199_v54 = vor.u32 %v1234_v51, %v1196_v53  ;;  %v1186_v55 = vld [vmem:[%s1500_s29 + $0x50] sm:$0xf]  ;;  %v1233_v56 = vld [vmem:[%s1500_s29 + $0x54] sm:$0xf0]  ;;  %v1232_v57 = vld [vmem:[%s1500_s29 + $0x54] sm:$0xf] }
  0x32   : > { %603 = vmatpush.bf16.msra.mxu1 %v1207_v48  ;;  %1247 = vmatpush.bf16.msra.mxu3 %v1207_v48  ;;  %v1187_v58 = vor.u32 %v1233_v56, %v1186_v55  ;;  %v1188_v59 = vld [vmem:[%s1500_s29 + $0x58] sm:$0xf0]  ;;  %v1178_v61 = vld [vmem:[%s1500_s29 + $0x40] sm:$0xf]  ;;  %v1231_v62 = vld [vmem:[%s1500_s29 + $0x44] sm:$0xf0] }
  0x33   : > { %v1191_v60 = vor.u32 %v1232_v57, %v1188_v59  ;;  %v1230_v63 = vld [vmem:[%s1500_s29 + $0x44] sm:$0xf]  ;;  %v1179_v0 = vor.u32 %v1231_v62, %v1178_v61  ;;  %v1180_v1 = vld [vmem:[%s1500_s29 + $0x48] sm:$0xf0]  ;;  %v1170_v3 = vld [vmem:[%s1500_s29 + $0x30] sm:$0xf] }
  0x34   : > { %v1299_v21 = vpop.eup %1298  ;;  %v1183_v2 = vor.u32 %v1230_v63, %v1180_v1  ;;  %v1229_v4 = vld [vmem:[%s1500_s29 + $0x34] sm:$0xf0]  ;;  %v1228_v5 = vld [vmem:[%s1500_s29 + $0x34] sm:$0xf]  ;;  %v1172_v7 = vld [vmem:[%s1500_s29 + $0x38] sm:$0xf0] }
  0x35   : > { %v388_v22 = vmul.f32 128.0, %v1299_v21  ;;  %vm392_vm0 = vweird.f32 %v1299_v21  ;;  %585 = vmatpush.bf16.msra.mxu0 %v1195_v52  ;;  %1240 = vmatpush.bf16.msra.mxu2 %v1195_v52  ;;  %v1171_v6 = vor.u32 %v1229_v4, %v1170_v3  ;;  %v1175_v8 = vor.u32 %v1228_v5, %v1172_v7  ;;  %v1162_v9 = vld [vmem:[%s1500_s29 + $0x20] sm:$0xf]  ;;  %v1227_v10 = vld [vmem:[%s1500_s29 + $0x24] sm:$0xf0] }
  0x36   : > { %385 = vadd.xlane.f32.xlu0 %v376_v18  ;;  %381 = vadd.xlane.f32.xlu1 %v374_v19  ;;  %v1226_v11 = vld [vmem:[%s1500_s29 + $0x24] sm:$0xf]  ;;  %v1163_v12 = vor.u32 %v1227_v10, %v1162_v9  ;;  %v1164_v13 = vld [vmem:[%s1500_s29 + $0x28] sm:$0xf0]  ;;  %v1154_v15 = vld [vmem:[%s1500_s29 + $0x10] sm:$0xf] }
  0x37   : > { %v389_v23 = vsub.f32 1.0, %v388_v22  ;;  %604 = vmatpush.bf16.msra.mxu1 %v1199_v54  ;;  %1248 = vmatpush.bf16.msra.mxu3 %v1199_v54  ;;  %v1167_v14 = vor.u32 %v1226_v11, %v1164_v13  ;;  %v1146_v20 = vld [vmem:[%s1500_s29] sm:$0xf] }
  0x38   : > { %v1296_v61 = vld [vmem:[%s1823_s1] ss:$0 sm:$0xff] }
  0x39   : > { %v390_v24 = vmul.f32 %v1299_v21, %v389_v23  ;;  %586 = vmatpush.bf16.msra.mxu0 %v1187_v58  ;;  %1241 = vmatpush.bf16.msra.mxu2 %v1187_v58  ;;  %v1222_v23 = vld [vmem:[%s1500_s29 + $0x4] sm:$0xf]  ;;  %v1297_v10 = vld [vmem:[%s1824_s2] ss:$0 sm:$0xff] }
  0x3b   : > { %v391_v25 = vadd.f32 %v1299_v21, %v390_v24  ;;  %605 = vmatpush.bf16.msra.mxu1 %v1191_v60  ;;  %1249 = vmatpush.bf16.msra.mxu3 %v1191_v60  ;;  %v1148_v24 = vld [vmem:[%s1500_s29 + $0x8] sm:$0xf0] }
  0x3d   : > { %v1475_v26 = vsel %vm392_vm0, %v1299_v21, %v391_v25  ;;  %587 = vmatpush.bf16.msra.mxu0 %v1179_v0  ;;  %1242 = vmatpush.bf16.msra.mxu2 %v1179_v0  ;;  %v1223_v21 = vld [vmem:[%s1500_s29 + $0x4] sm:$0xf0] }
  0x3f   : > { %606 = vmatpush.bf16.msra.mxu1 %v1183_v2  ;;  %1250 = vmatpush.bf16.msra.mxu3 %v1183_v2 }
  0x41   : > { %588 = vmatpush.bf16.msra.mxu0 %v1171_v6  ;;  %1243 = vmatpush.bf16.msra.mxu2 %v1171_v6 }
  0x43   : > { %607 = vmatpush.bf16.msra.mxu1 %v1175_v8  ;;  %1251 = vmatpush.bf16.msra.mxu3 %v1175_v8 }
  0x45   : > { %589 = vmatpush.bf16.msra.mxu0 %v1163_v12  ;;  %1244 = vmatpush.bf16.msra.mxu2 %v1163_v12 }
  0x47   : > { %608 = vmatpush.bf16.msra.mxu1 %v1167_v14  ;;  %1252 = vmatpush.bf16.msra.mxu3 %v1167_v14 }
  0xa1   : > { %v384_v27 = vpop.xlane.xlu0 %383  ;;  %v380_v28 = vpop.xlane.xlu1 %379 }
  0xa2   : > { %v396_v29 = vmul.f32 %v1475_v26, %v384_v27  ;;  %v394_v30 = vmul.f32 %v1475_v26, %v380_v28 }
  0xa4   : > { %v1479_v31 = vsub.f32 %v373_v17, %v394_v30  ;;  %v1481_v32 = vsub.f32 %v375_v16, %v396_v29  ;;  %v1225_v16 = vld [vmem:[%s1500_s29 + $0x14] sm:$0xf0]  ;;  %v1224_v17 = vld [vmem:[%s1500_s29 + $0x14] sm:$0xf]  ;;  %v1147_v30 = vor.u32 %v1223_v21, %v1146_v20 }
  0xa6   : > { %v404_v33 = vmul.f32 %v1481_v32, %v1481_v32  ;;  %v402_v34 = vmul.f32 %v1479_v31, %v1479_v31 }
  0xa8   : > { %410 = vadd.xlane.f32.xlu2 %v404_v33  ;;  %406 = vadd.xlane.f32.xlu0 %v402_v34  ;;  %v1151_v33 = vor.u32 %v1222_v23, %v1148_v24 }
  0xa9   : > { %v386_v35 = vpop.xlane.xlu0 %385  ;;  %v382_v36 = vpop.xlane.xlu1 %381 }
  0xaa   : > { %v397_v37 = vmul.f32 %v1475_v26, %v386_v35  ;;  %v395_v38 = vmul.f32 %v1475_v26, %v382_v36 }
  0xac   : > { %v1489_v39 = vsub.f32 %v376_v18, %v397_v37  ;;  %v1491_v40 = vsub.f32 %v374_v19, %v395_v38  ;;  %v1155_v18 = vor.u32 %v1225_v16, %v1154_v15  ;;  %v1156_v19 = vld [vmem:[%s1500_s29 + $0x18] sm:$0xf0] }
  0xad   : > { %v1159_v22 = vor.u32 %v1224_v17, %v1156_v19 }
  0xae   : > { %v405_v41 = vmul.f32 %v1489_v39, %v1489_v39  ;;  %v403_v42 = vmul.f32 %v1491_v40, %v1491_v40  ;;  %590 = vmatpush.bf16.msra.mxu0 %v1155_v18  ;;  %1245 = vmatpush.bf16.msra.mxu2 %v1155_v18 }
  0xaf   : > { %609 = vmatpush.bf16.msra.mxu1 %v1159_v22  ;;  %1253 = vmatpush.bf16.msra.mxu3 %v1159_v22 }
  0xb0   : > { %412 = vadd.xlane.f32.xlu2 %v405_v41  ;;  %408 = vadd.xlane.f32.xlu1 %v403_v42 }
  0xb2   : > { %591 = vmatpush.bf16.msra.mxu0 %v1147_v30  ;;  %1246 = vmatpush.bf16.msra.mxu2 %v1147_v30 }
  0xb3   : > { %610 = vmatpush.bf16.msra.mxu1 %v1151_v33  ;;  %1254 = vmatpush.bf16.msra.mxu3 %v1151_v33 }
 0x11b   : > { %v411_v25 = vpop.xlane.xlu2 %410  ;;  %v407_v27 = vpop.xlane.xlu0 %406 }
 0x11c   : > { %v416_v28 = vmul.f32 %v411_v25, %v1475_v26  ;;  %v414_v29 = vmul.f32 %v407_v27, %v1475_v26 }
 0x11e   : > { %v420_v34 = vadd.f32 1e-05, %v416_v28  ;;  %v418_v35 = vadd.f32 1e-05, %v414_v29 }
 0x120   : > { %1300 = vrsqrt.f32 %v420_v34  ;;  %vm428_vm2 = vweird.f32 %v418_v35  ;;  %vm448_vm4 = vweird.f32 %v420_v34 }
 0x121   : > { %1302 = vrsqrt.f32 %v418_v35 }
 0x123   : > { %v413_v36 = vpop.xlane.xlu2 %412  ;;  %v409_v37 = vpop.xlane.xlu1 %408 }
 0x124   : > { %v417_v38 = vmul.f32 %v413_v36, %v1475_v26  ;;  %v415_v41 = vmul.f32 %v409_v37, %v1475_v26 }
 0x126   : > { %v1301_v42 = vpop.eup %1300  ;;  %v421_v43 = vadd.f32 1e-05, %v417_v38  ;;  %v419_v44 = vadd.f32 1e-05, %v415_v41 }
 0x127   : > { %v1303_v45 = vpop.eup %1302  ;;  %v443_v46 = vmul.f32 %v1301_v42, %v420_v34  ;;  %vm449_vm1 = vweird.f32 %v1301_v42 }
 0x128   : > { %v423_v47 = vmul.f32 %v1303_v45, %v418_v35  ;;  %1304 = vrsqrt.f32 %v421_v43  ;;  %vm429_vm3 = vweird.f32 %v1303_v45  ;;  %vm450_vm5 = vmor %vm448_vm4, %vm449_vm1  ;;  %vm438_vm8 = vweird.f32 %v419_v44 }
 0x129   : > { %v444_v48 = vmul.f32 %v1301_v42, %v443_v46  ;;  %1306 = vrsqrt.f32 %v419_v44  ;;  %vm430_vm6 = vmor %vm428_vm2, %vm429_vm3  ;;  %vm458_vm10 = vweird.f32 %v421_v43 }
 0x12a   : > { %v424_v49 = vmul.f32 %v1303_v45, %v423_v47 }
 0x12b   : > { %v445_v50 = vmul.f32 0.5, %v444_v48 }
 0x12c   : > { %v425_v51 = vmul.f32 0.5, %v424_v49 }
 0x12d   : > { %v446_v52 = vsub.f32 1.5, %v445_v50 }
 0x12e   : > { %v1305_v53 = vpop.eup %1304  ;;  %v426_v54 = vsub.f32 1.5, %v425_v51 }
 0x12f   : > { %v1307_v55 = vpop.eup %1306  ;;  %v447_v56 = vmul.f32 %v1301_v42, %v446_v52  ;;  %v453_v57 = vmul.f32 %v1305_v53, %v421_v43  ;;  %vm459_vm7 = vweird.f32 %v1305_v53 }
 0x130   : > { %v427_v26 = vmul.f32 %v1303_v45, %v426_v54  ;;  %v433_v58 = vmul.f32 %v1307_v55, %v419_v44  ;;  %vm439_vm9 = vweird.f32 %v1307_v55  ;;  %vm460_vm11 = vmor %vm458_vm10, %vm459_vm7 }
 0x131   : > { %v454_v59 = vmul.f32 %v1305_v53, %v453_v57  ;;  %v451_v63 = vsel %vm450_vm5, %v1301_v42, %v447_v56  ;;  %vm440_vm12 = vmor %vm438_vm8, %vm439_vm9 }
 0x132   : > { %v434_v60 = vmul.f32 %v1307_v55, %v433_v58  ;;  %v431_v1 = vsel %vm430_vm6, %v1303_v45, %v427_v26  ;;  %v467_v4 = vmul.f32 %v1296_v61, %v451_v63 }
 0x133   : > { %v455_v62 = vmul.f32 0.5, %v454_v59  ;;  %v465_v6 = vmul.f32 %v1296_v61, %v431_v1 }
 0x134   : > { %v435_v0 = vmul.f32 0.5, %v434_v60  ;;  %v471_v12 = vmul.f32 %v467_v4, %v1481_v32 }
 0x135   : > { %v456_v2 = vsub.f32 1.5, %v455_v62  ;;  %v469_v14 = vmul.f32 %v465_v6, %v1479_v31  ;;  %v498_v31 = vld [vmem:[%s369_s12] sm:$0x3] }
 0x136   : > { %v436_v3 = vsub.f32 1.5, %v435_v0  ;;  %v478_v17 = vadd.f32 %v1297_v10, %v471_v12  ;;  %v1552_v32 = vperm.slane %v498_v31, 0 }
 0x137   : > { %v457_v5 = vmul.f32 %v1305_v53, %v456_v2  ;;  %v476_v19 = vadd.f32 %v1297_v10, %v469_v14 }
 0x138   : > { %v437_v7 = vmul.f32 %v1307_v55, %v436_v3 }
 0x139   : > { %v461_v8 = vsel %vm460_vm11, %v1305_v53, %v457_v5 }
 0x13a   : > { %v441_v9 = vsel %vm440_vm12, %v1307_v55, %v437_v7  ;;  %v468_v11 = vmul.f32 %v1296_v61, %v461_v8 }
 0x13b   : > { %v466_v13 = vmul.f32 %v1296_v61, %v441_v9 }
 0x13c   : > { %v472_v15 = vmul.f32 %v468_v11, %v1489_v39  ;;  %v1554_v39 = vperm.slane %v498_v31, 1 }
 0x13d   : > { %v470_v16 = vmul.f32 %v466_v13, %v1491_v40 }
 0x13e   : > { %v479_v18 = vadd.f32 %v1297_v10, %v472_v15 }
 0x13f   : > { %v477_v20 = vadd.f32 %v1297_v10, %v470_v16 }
 0x140   : > { %v481_v21 = vpack.c.bf16 %v479_v18, %v478_v17 }
 0x141   : > { %v480_v22 = vpack.c.bf16 %v477_v20, %v476_v19 }
 0x142   : > { %597 = vmatmul.bf16.vlgmr.msra.gmra.mxu2 %v481_v21  ;;  %616 = vmatmul.bf16.vlgmr.msra.gmra.mxu3 %v481_v21 }
 0x143   : > { %592 = vmatmul.bf16.vlgmr.msra.gmra.mxu0 %v480_v22  ;;  %611 = vmatmul.bf16.vlgmr.msra.gmra.mxu1 %v480_v22 }
 0x1c0   : > { %v593_v40 = vpop.f32.mrf.mxu0  ;;  %v612_v23 = vpop.f32.mrf.mxu1 }
 0x1c1   : > { %v1557_v24 = vadd.f32 %v593_v40, %v1552_v32  ;;  %v1560_v25 = vadd.f32 %v612_v23, %v1554_v39 }
 0x1c3   : > { %v1563_v27 = vmul.f32 0.70710677, %v1557_v24  ;;  %v1566_v28 = vmul.f32 0.70710677, %v1560_v25 }
 0x1c5   : > { %v638_v29 = vmul.f32 %v1563_v27, %v1563_v27  ;;  %v678_v30 = vmul.f32 %v1566_v28, %v1566_v28  ;;  %v598_v33 = vpop.f32.mrf.mxu2  ;;  %v617_v34 = vpop.f32.mrf.mxu3 }
 0x1c6   : > { %v1573_v35 = vadd.f32 %v598_v33, %v1552_v32  ;;  %v1576_v36 = vadd.f32 %v617_v34, %v1554_v39 }
 0x1c7   : > { %v1578_v37 = vmin.f32 %v638_v29, 16.0  ;;  %v1580_v38 = vmin.f32 %v678_v30, 16.0 }
 0x1c8   : > { %v1583_v41 = vmul.f32 0.70710677, %v1573_v35  ;;  %v1586_v42 = vmul.f32 0.70710677, %v1576_v36  ;;  %v595_v7 = vpop.f32.mrf.mxu0 }
 0x1c9   : > { %v640_v43 = vmul.f32 2.1237322e-06, %v1578_v37  ;;  %v651_v44 = vmul.f32 3.8918573e-05, %v1578_v37  ;;  %v680_v45 = vmul.f32 2.1237322e-06, %v1580_v38  ;;  %v1616_v19 = vadd.f32 %v595_v7, %v1552_v32 }
 0x1ca   : > { %v691_v46 = vmul.f32 3.8918573e-05, %v1580_v38  ;;  %v798_v47 = vmul.f32 %v1583_v41, %v1583_v41  ;;  %v838_v48 = vmul.f32 %v1586_v42, %v1586_v42 }
 0x1cb   : > { %v641_v49 = vadd.f32 0.00028619796, %v640_v43  ;;  %v652_v50 = vadd.f32 0.001143296, %v651_v44  ;;  %v681_v51 = vadd.f32 0.00028619796, %v680_v45 }
 0x1cc   : > { %v692_v52 = vadd.f32 0.001143296, %v691_v46  ;;  %v1596_v53 = vmin.f32 %v798_v47, 16.0  ;;  %v1598_v54 = vmin.f32 %v838_v48, 16.0 }
 0x1cd   : > { %v642_v55 = vmul.f32 %v641_v49, %v1578_v37  ;;  %v653_v56 = vmul.f32 %v652_v50, %v1578_v37  ;;  %v682_v57 = vmul.f32 %v681_v51, %v1580_v38  ;;  %v1628_v50 = vmul.f32 0.70710677, %v1616_v19 }
 0x1ce   : > { %v693_v26 = vmul.f32 %v692_v52, %v1580_v38  ;;  %v800_v58 = vmul.f32 2.1237322e-06, %v1596_v53  ;;  %v811_v59 = vmul.f32 3.8918573e-05, %v1596_v53  ;;  %v840_v60 = vmul.f32 2.1237322e-06, %v1598_v54 }
 0x1cf   : > { %v643_v61 = vadd.f32 0.0036580483, %v642_v55  ;;  %v654_v62 = vadd.f32 0.014752088, %v653_v56  ;;  %v683_v63 = vadd.f32 0.0036580483, %v682_v57 }
 0x1d0   : > { %v694_v0 = vadd.f32 0.014752088, %v693_v26  ;;  %v801_v1 = vadd.f32 0.00028619796, %v800_v58  ;;  %v812_v2 = vadd.f32 0.001143296, %v811_v59 }
 0x1d1   : > { %v644_v3 = vmul.f32 %v643_v61, %v1578_v37  ;;  %v655_v4 = vmul.f32 %v654_v62, %v1578_v37  ;;  %v684_v5 = vmul.f32 %v683_v63, %v1580_v38  ;;  %v841_v6 = vadd.f32 0.00028619796, %v840_v60  ;;  %v614_v63 = vpop.f32.mrf.mxu1 }
 0x1d2   : > { %v695_v8 = vmul.f32 %v694_v0, %v1580_v38  ;;  %v802_v9 = vmul.f32 %v801_v1, %v1596_v53  ;;  %v813_v10 = vmul.f32 %v812_v2, %v1596_v53  ;;  %v851_v11 = vmul.f32 3.8918573e-05, %v1598_v54  ;;  %v600_v1 = vpop.f32.mrf.mxu2 }
 0x1d3   : > { %v645_v12 = vadd.f32 0.05243302, %v644_v3  ;;  %v656_v13 = vadd.f32 0.112945676, %v655_v4  ;;  %v685_v14 = vadd.f32 0.05243302, %v684_v5  ;;  %v842_v15 = vmul.f32 %v841_v6, %v1598_v54 }
 0x1d4   : > { %v696_v16 = vadd.f32 0.112945676, %v695_v8  ;;  %v803_v17 = vadd.f32 0.0036580483, %v802_v9  ;;  %v814_v18 = vadd.f32 0.014752088, %v813_v10  ;;  %v718_v62 = vmul.f32 %v1628_v50, %v1628_v50 }
 0x1d5   : > { %v646_v20 = vmul.f32 %v645_v12, %v1578_v37  ;;  %v657_v21 = vmul.f32 %v656_v13, %v1578_v37  ;;  %v686_v22 = vmul.f32 %v685_v14, %v1580_v38  ;;  %v843_v31 = vadd.f32 0.0036580483, %v842_v15 }
 0x1d6   : > { %v697_v40 = vmul.f32 %v696_v16, %v1580_v38  ;;  %v804_v23 = vmul.f32 %v803_v17, %v1596_v53  ;;  %v815_v29 = vmul.f32 %v814_v18, %v1596_v53  ;;  %v852_v30 = vadd.f32 0.001143296, %v851_v11 }
 0x1d7   : > { %v647_v33 = vadd.f32 0.18741608, %v646_v20  ;;  %v658_v34 = vadd.f32 0.4994258, %v657_v21  ;;  %v687_v43 = vadd.f32 0.18741608, %v686_v22  ;;  %v844_v49 = vmul.f32 %v843_v31, %v1598_v54 }
 0x1d8   : > { %v698_v44 = vadd.f32 0.4994258, %v697_v40  ;;  %v816_v45 = vadd.f32 0.112945676, %v815_v29  ;;  %v853_v46 = vmul.f32 %v852_v30, %v1598_v54  ;;  %v805_v48 = vadd.f32 0.05243302, %v804_v23 }
 0x1d9   : > { %v659_v47 = vmul.f32 %v658_v34, %v1578_v37  ;;  %v648_v51 = vmul.f32 %v647_v33, %v1578_v37  ;;  %v688_v26 = vmul.f32 %v687_v43, %v1580_v38  ;;  %v845_v61 = vadd.f32 0.05243302, %v844_v49 }
 0x1da   : > { %v699_v52 = vmul.f32 %v698_v44, %v1580_v38  ;;  %v817_v55 = vmul.f32 %v816_v45, %v1596_v53  ;;  %v854_v56 = vadd.f32 0.014752088, %v853_v46  ;;  %v806_v0 = vmul.f32 %v805_v48, %v1596_v53 }
 0x1db   : > { %v660_v57 = vadd.f32 1.0, %v659_v47  ;;  %v649_v37 = vadd.f32 1.1283791, %v648_v51  ;;  %v1642_v2 = vmul.f32 0.5, %v1557_v24  ;;  %v689_v38 = vadd.f32 1.1283791, %v688_v26 }
 0x1dc   : > { %v1634_v58 = vadd.f32 1.0, %v699_v52  ;;  %v818_v59 = vadd.f32 0.4994258, %v817_v55  ;;  %v855_v60 = vmul.f32 %v854_v56, %v1598_v54  ;;  %v1645_v3 = vmul.f32 0.5, %v1560_v25 }
 0x1dd   : > { %1308 = vrcp.f32 %v660_v57  ;;  %v1649_v6 = vadd.f32 %v614_v63, %v1554_v39  ;;  %v670_v7 = vand.u32 2147483647, %v660_v57  ;;  %v846_v8 = vmul.f32 %v845_v61, %v1598_v54 }
 0x1de   : > { %1310 = vrcp.f32 %v1634_v58  ;;  %v819_v4 = vmul.f32 %v818_v59, %v1596_v53  ;;  %v856_v5 = vadd.f32 0.112945676, %v855_v60  ;;  %v1652_v9 = vmin.f32 %v718_v62, 16.0 }
 0x1df   : > { %v1655_v10 = vadd.f32 %v600_v1, %v1552_v32  ;;  %v650_v24 = vmul.f32 %v649_v37, %v1563_v27  ;;  %v807_v11 = vadd.f32 0.18741608, %v806_v0  ;;  %vm666_vm13 = vweird.f32 %v660_v57 }
 0x1e0   : > { %v1658_v12 = vadd.f32 1.0, %v819_v4  ;;  %v857_v25 = vmul.f32 %v856_v5, %v1598_v54  ;;  %v672_v14 = vand.u32 2147483648, %v660_v57  ;;  %v690_v15 = vmul.f32 %v689_v38, %v1566_v28 }
 0x1e1   : > { %vm706_vm14 = vweird.f32 %v1634_v58  ;;  %v731_v32 = vmul.f32 3.8918573e-05, %v1652_v9  ;;  %v1666_v27 = vmul.f32 0.70710677, %v1649_v6  ;;  %vm1668_vm15 = vcmp.eq.f32.partialorder %v670_v7, 8.507059e+37 }
 0x1e2   : > { %1312 = vrcp.f32 %v1658_v12  ;;  %v710_v21 = vand.u32 2147483647, %v1634_v58  ;;  %v712_v28 = vand.u32 2147483648, %v1634_v58  ;;  %v808_v31 = vmul.f32 %v807_v11, %v1596_v53 }
 0x1e3   : > { %v1309_v13 = vpop.eup %1308  ;;  %v858_v40 = vadd.f32 0.4994258, %v857_v25  ;;  %v720_v23 = vmul.f32 2.1237322e-06, %v1652_v9  ;;  %v673_v29 = vor.u32 1.1754944e-38, %v672_v14  ;;  %v758_v45 = vmul.f32 %v1666_v27, %v1666_v27 }
 0x1e4   : > { %v1311_v16 = vpop.eup %1310  ;;  %v662_v17 = vmul.f32 %v1309_v13, %v660_v57  ;;  %vm667_vm0 = vweird.f32 %v1309_v13  ;;  %v847_v33 = vadd.f32 0.18741608, %v846_v8  ;;  %v732_v44 = vadd.f32 0.001143296, %v731_v32 }
 0x1e5   : > { %v702_v20 = vmul.f32 %v1311_v16, %v1634_v58  ;;  %v859_v43 = vmul.f32 %v858_v40, %v1598_v54  ;;  %vm707_vm1 = vweird.f32 %v1311_v16  ;;  %vm1680_vm2 = vcmp.eq.f32.partialorder %v710_v21, 8.507059e+37  ;;  %vm668_vm3 = vmor %vm666_vm13, %vm667_vm0 }
 0x1e6   : > { %v663_v22 = vsub.f32 1.0, %v662_v17  ;;  %v713_v53 = vor.u32 1.1754944e-38, %v712_v28  ;;  %v809_v51 = vadd.f32 1.1283791, %v808_v31  ;;  %v721_v55 = vadd.f32 0.00028619796, %v720_v23  ;;  %vm708_vm4 = vmor %vm706_vm14, %vm707_vm1 }
 0x1e7   : > { %v703_v30 = vsub.f32 1.0, %v702_v20  ;;  %v1684_v52 = vadd.f32 1.0, %v859_v43  ;;  %v848_v59 = vmul.f32 %v847_v33, %v1598_v54  ;;  %v733_v60 = vmul.f32 %v732_v44, %v1652_v9 }
 0x1e8   : > { %v664_v34 = vmul.f32 %v1309_v13, %v663_v22  ;;  %v1313_v48 = vpop.eup %1312  ;;  %v830_v62 = vand.u32 2147483647, %v1658_v12  ;;  %v1695_v63 = vmin.f32 %v758_v45, 16.0  ;;  %v1700_v1 = vmul.f32 0.70710677, %v1655_v10 }
 0x1e9   : > { %v704_v46 = vmul.f32 %v1311_v16, %v703_v30  ;;  %v822_v26 = vmul.f32 %v1313_v48, %v1658_v12  ;;  %1314 = vrcp.f32 %v1684_v52  ;;  %v832_v58 = vand.u32 2147483648, %v1658_v12 }
 0x1ea   : > { %v665_v49 = vadd.f32 %v1309_v13, %v664_v34  ;;  %v722_v4 = vmul.f32 %v721_v55, %v1652_v9  ;;  %vm827_vm5 = vweird.f32 %v1313_v48  ;;  %v734_v8 = vadd.f32 0.014752088, %v733_v60 }
 0x1eb   : > { %v705_v56 = vadd.f32 %v1311_v16, %v704_v46  ;;  %v823_v0 = vsub.f32 1.0, %v822_v26  ;;  %v810_v25 = vmul.f32 %v809_v51, %v1583_v41  ;;  %vm826_vm6 = vweird.f32 %v1658_v12 }
 0x1ec   : > { %v669_v61 = vsel %vm668_vm3, %v1309_v13, %v665_v49  ;;  %v760_v13 = vmul.f32 2.1237322e-06, %v1695_v63  ;;  %v878_v17 = vmul.f32 %v1700_v1, %v1700_v1  ;;  %vm828_vm7 = vmor %vm826_vm6, %vm827_vm5  ;;  %vm831_vm8 = vcmp.eq.f32.partialorder %v830_v62, 8.507059e+37 }
 0x1ed   : > { %v674_v57 = vsel %vm1668_vm15, %v673_v29, %v669_v61  ;;  %v709_v37 = vsel %vm708_vm4, %v1311_v16, %v705_v56  ;;  %v824_v7 = vmul.f32 %v1313_v48, %v823_v0  ;;  %v735_v16 = vmul.f32 %v734_v8, %v1652_v9  ;;  %v619_v0 = vpop.f32.mrf.mxu3 }
 0x1ee   : > { %v675_v54 = vmul.f32 %v674_v57, %v650_v24  ;;  %v714_v38 = vsel %vm1680_vm2, %v713_v53, %v709_v37  ;;  %v833_v18 = vor.u32 1.1754944e-38, %v832_v58  ;;  %v771_v20 = vmul.f32 3.8918573e-05, %v1695_v63 }
 0x1ef   : > { %v715_v5 = vmul.f32 %v714_v38, %v690_v15  ;;  %v825_v14 = vadd.f32 %v1313_v48, %v824_v7  ;;  %v1315_v32 = vpop.eup %1314  ;;  %v723_v28 = vadd.f32 0.0036580483, %v722_v4  ;;  %v736_v40 = vadd.f32 0.112945676, %v735_v16 }
 0x1f0   : > { %v1208_v11 = vclamps-f32 %v675_v54, 1.0  ;;  %v862_v21 = vmul.f32 %v1315_v32, %v1684_v52  ;;  %v761_v23 = vadd.f32 0.00028619796, %v760_v13  ;;  %v1718_v34 = vmin.f32 %v878_v17, 16.0 }
 0x1f1   : > { %v1209_v24 = vclamps-f32 %v715_v5, 1.0  ;;  %v829_v12 = vsel %vm828_vm7, %v1313_v48, %v825_v14  ;;  %v849_v43 = vadd.f32 1.1283791, %v848_v59  ;;  %v872_v44 = vand.u32 2147483648, %v1684_v52 }
 0x1f2   : > { %v958_v15 = vadd.f32 1.0, %v1208_v11  ;;  %v834_v31 = vsel %vm831_vm8, %v833_v18, %v829_v12  ;;  %v863_v33 = vsub.f32 1.0, %v862_v21  ;;  %v737_v45 = vmul.f32 %v736_v40, %v1652_v9 }
 0x1f3   : > { %v959_v41 = vadd.f32 1.0, %v1209_v24  ;;  %v835_v30 = vmul.f32 %v834_v31, %v810_v25  ;;  %v772_v46 = vadd.f32 0.001143296, %v771_v20  ;;  %vm867_vm9 = vweird.f32 %v1315_v32 }
 0x1f4   : > { %v966_v22 = vmul.f32 %v958_v15, %v1642_v2  ;;  %v864_v53 = vmul.f32 %v1315_v32, %v863_v33  ;;  %v870_v2 = vand.u32 2147483647, %v1684_v52  ;;  %vm866_vm10 = vweird.f32 %v1684_v52 }
 0x1f5   : > { %v967_v29 = vmul.f32 %v959_v41, %v1645_v3  ;;  %v738_v48 = vadd.f32 0.4994258, %v737_v45  ;;  %v762_v3 = vmul.f32 %v761_v23, %v1695_v63  ;;  %v773_v49 = vmul.f32 %v772_v46, %v1695_v63  ;;  %vm868_vm11 = vmor %vm866_vm10, %vm867_vm9 }
 0x1f6   : > { %v1212_v51 = vclamps-f32 %v835_v30, 1.0  ;;  %v865_v55 = vadd.f32 %v1315_v32, %v864_v53  ;;  %v724_v56 = vmul.f32 %v723_v28, %v1652_v9  ;;  %v891_v26 = vmul.f32 3.8918573e-05, %v1718_v34 }
 0x1f7   : > { %v974_v47 = vpack.c.bf16 %v967_v29, %v966_v22  ;;  %v850_v59 = vmul.f32 %v849_v43, %v1586_v42  ;;  %v873_v60 = vor.u32 1.1754944e-38, %v872_v44  ;;  %v739_v52 = vmul.f32 %v738_v48, %v1652_v9 }
 0x1f8   : > { %v774_v61 = vadd.f32 0.014752088, %v773_v49  ;;  %v869_v62 = vsel %vm868_vm11, %v1315_v32, %v865_v55  ;;  %vm871_vm12 = vcmp.eq.f32.partialorder %v870_v2, 8.507059e+37  ;;  %v880_v57 = vmul.f32 2.1237322e-06, %v1718_v34 }
 0x1f9   : > { %978 = vst [vmem:[%s1726_s18] sm:$0xff] %v974_v47  ;;  %v892_v37 = vadd.f32 0.001143296, %v891_v26  ;;  %v874_v54 = vsel %vm871_vm12, %v873_v60, %v869_v62  ;;  %v1734_v38 = vadd.f32 1.0, %v739_v52  ;;  %v763_v58 = vadd.f32 0.0036580483, %v762_v3 }
 0x1fa   : > { %v775_v4 = vmul.f32 %v774_v61, %v1695_v63  ;;  %v962_v5 = vadd.f32 1.0, %v1212_v51  ;;  %v875_v7 = vmul.f32 %v874_v54, %v850_v59  ;;  %v725_v42 = vadd.f32 0.05243302, %v724_v56 }
 0x1fb   : > { %v893_v8 = vmul.f32 %v892_v37, %v1718_v34  ;;  %1316 = vrcp.f32 %v1734_v38  ;;  %v1740_v11 = vadd.f32 %v619_v0, %v1554_v39  ;;  %v626_v25 = vmul.f32 0.5, %v1573_v35 }
 0x1fc   : > { %v1213_v13 = vclamps-f32 %v875_v7, 1.0  ;;  %v776_v24 = vadd.f32 0.112945676, %v775_v4  ;;  %v881_v14 = vadd.f32 0.00028619796, %v880_v57  ;;  %v627_v16 = vmul.f32 0.5, %v1576_v36 }
 0x1fd   : > { %v764_v17 = vmul.f32 %v763_v58, %v1695_v63  ;;  %v894_v32 = vadd.f32 0.014752088, %v893_v8  ;;  %v970_v15 = vmul.f32 %v962_v5, %v626_v25  ;;  %v726_v20 = vmul.f32 %v725_v42, %v1652_v9 }
 0x1fe   : > { %v963_v18 = vadd.f32 1.0, %v1213_v13  ;;  %v777_v41 = vmul.f32 %v776_v24, %v1695_v63  ;;  %v1749_v12 = vmul.f32 0.70710677, %v1740_v11  ;;  %v882_v28 = vmul.f32 %v881_v14, %v1718_v34 }
 0x1ff   : > { %v895_v39 = vmul.f32 %v894_v32, %v1718_v34  ;;  %v765_v22 = vadd.f32 0.05243302, %v764_v17  ;;  %v727_v29 = vadd.f32 0.18741608, %v726_v20  ;;  %vm746_vm14 = vweird.f32 %v1734_v38 }
 0x200   : > { %v971_v35 = vmul.f32 %v963_v18, %v627_v16  ;;  %v778_v21 = vadd.f32 0.4994258, %v777_v41  ;;  %v918_v40 = vmul.f32 %v1749_v12, %v1749_v12  ;;  %v883_v46 = vadd.f32 0.0036580483, %v882_v28 }
 0x201   : > { %v1317_v36 = vpop.eup %1316  ;;  %v896_v31 = vadd.f32 0.112945676, %v895_v39  ;;  %v766_v47 = vmul.f32 %v765_v22, %v1695_v63  ;;  %v728_v3 = vmul.f32 %v727_v29, %v1652_v9  ;;  %v752_v55 = vand.u32 2147483648, %v1734_v38 }
 0x202   : > { %v976_v23 = vpack.c.bf16 %v971_v35, %v970_v15  ;;  %v742_v30 = vmul.f32 %v1317_v36, %v1734_v38  ;;  %v779_v33 = vmul.f32 %v778_v21, %v1695_v63  ;;  %v1757_v44 = vmin.f32 %v918_v40, 16.0 }
 0x203   : > { %v897_v43 = vmul.f32 %v896_v31, %v1718_v34  ;;  %vm747_vm13 = vweird.f32 %v1317_v36  ;;  %v750_v26 = vand.u32 2147483647, %v1734_v38  ;;  %v767_v52 = vadd.f32 0.18741608, %v766_v47 }
 0x204   : > { %980 = vst [vmem:[%s1726_s18 + $0x10] sm:$0xff] %v976_v23  ;;  %v743_v45 = vsub.f32 1.0, %v742_v30  ;;  %v780_v53 = vadd.f32 1.0, %v779_v33  ;;  %v920_v48 = vmul.f32 2.1237322e-06, %v1757_v44  ;;  %vm748_vm15 = vmor %vm746_vm14, %vm747_vm13  ;;  %v884_v61 = vmul.f32 %v883_v46, %v1718_v34 }
 0x205   : > { %v898_v2 = vadd.f32 0.4994258, %v897_v43  ;;  %v931_v51 = vmul.f32 3.8918573e-05, %v1757_v44  ;;  %v729_v62 = vadd.f32 1.1283791, %v728_v3  ;;  %v768_v5 = vmul.f32 %v767_v52, %v1695_v63 }
 0x206   : > { %v744_v49 = vmul.f32 %v1317_v36, %v743_v45  ;;  %1318 = vrcp.f32 %v780_v53  ;;  %v921_v60 = vadd.f32 0.00028619796, %v920_v48  ;;  %v753_v54 = vor.u32 1.1754944e-38, %v752_v55 }
 0x207   : > { %v899_v59 = vmul.f32 %v898_v2, %v1718_v34  ;;  %v932_v9 = vadd.f32 0.001143296, %v931_v51  ;;  %vm751_vm0 = vcmp.eq.f32.partialorder %v750_v26, 8.507059e+37  ;;  %v885_v7 = vadd.f32 0.05243302, %v884_v61 }
 0x208   : > { %v745_v56 = vadd.f32 %v1317_v36, %v744_v49  ;;  %v922_v0 = vmul.f32 %v921_v60, %v1757_v44  ;;  %v730_v8 = vmul.f32 %v729_v62, %v1628_v50  ;;  %v769_v17 = vadd.f32 1.1283791, %v768_v5 }
 0x209   : > { %v1769_v37 = vadd.f32 1.0, %v899_v59  ;;  %v933_v58 = vmul.f32 %v932_v9, %v1757_v44  ;;  %v792_v32 = vand.u32 2147483648, %v780_v53  ;;  %v886_v15 = vmul.f32 %v885_v7, %v1718_v34 }
 0x20a   : > { %v749_v57 = vsel %vm748_vm15, %v1317_v36, %v745_v56  ;;  %v923_v13 = vadd.f32 0.0036580483, %v922_v0  ;;  %v790_v39 = vand.u32 2147483647, %v780_v53  ;;  %vm786_vm2 = vweird.f32 %v780_v53 }
 0x20b   : > { %1320 = vrcp.f32 %v1769_v37  ;;  %v754_v4 = vsel %vm751_vm0, %v753_v54, %v749_v57  ;;  %v934_v42 = vadd.f32 0.014752088, %v933_v58  ;;  %v793_v36 = vor.u32 1.1754944e-38, %v792_v32 }
 0x20c   : > { %v1319_v38 = vpop.eup %1318  ;;  %v755_v14 = vmul.f32 %v754_v4, %v730_v8  ;;  %v924_v63 = vmul.f32 %v923_v13, %v1757_v44  ;;  %v887_v22 = vadd.f32 0.18741608, %v886_v15  ;;  %v770_v23 = vmul.f32 %v769_v17, %v1666_v27 }
 0x20d   : > { %v782_v25 = vmul.f32 %v1319_v38, %v780_v53  ;;  %v935_v24 = vmul.f32 %v934_v42, %v1757_v44  ;;  %vm787_vm1 = vweird.f32 %v1319_v38  ;;  %vm791_vm4 = vcmp.eq.f32.partialorder %v790_v39, 8.507059e+37 }
 0x20e   : > { %v1210_v21 = vclamps-f32 %v755_v14, 1.0  ;;  %vm788_vm3 = vmor %vm786_vm2, %vm787_vm1  ;;  %v925_v30 = vadd.f32 0.05243302, %v924_v63  ;;  %v624_v2 = vmul.f32 0.5, %v1616_v19  ;;  %v888_v53 = vmul.f32 %v887_v22, %v1718_v34 }
 0x20f   : > { %v783_v16 = vsub.f32 1.0, %v782_v25  ;;  %v936_v18 = vadd.f32 0.112945676, %v935_v24  ;;  %v625_v27 = vmul.f32 0.5, %v1649_v6  ;;  %v912_v55 = vand.u32 2147483648, %v1769_v37 }
 0x210   : > { %v960_v46 = vadd.f32 1.0, %v1210_v21  ;;  %v926_v51 = vmul.f32 %v925_v30, %v1757_v44  ;;  %vm906_vm6 = vweird.f32 %v1769_v37  ;;  %v910_v19 = vand.u32 2147483647, %v1769_v37 }
 0x211   : > { %v1321_v20 = vpop.eup %1320  ;;  %v784_v41 = vmul.f32 %v1319_v38, %v783_v16  ;;  %v937_v50 = vmul.f32 %v936_v18, %v1757_v44  ;;  %v889_v59 = vadd.f32 1.1283791, %v888_v53  ;;  %v913_v61 = vor.u32 1.1754944e-38, %v912_v55 }
 0x212   : > { %v902_v35 = vmul.f32 %v1321_v20, %v1769_v37  ;;  %vm907_vm5 = vweird.f32 %v1321_v20  ;;  %v968_v56 = vmul.f32 %v960_v46, %v624_v2  ;;  %v927_v52 = vadd.f32 0.18741608, %v926_v51 }
 0x213   : > { %v785_v28 = vadd.f32 %v1319_v38, %v784_v41  ;;  %v938_v40 = vadd.f32 0.4994258, %v937_v50  ;;  %vm908_vm7 = vmor %vm906_vm6, %vm907_vm5  ;;  %vm911_vm8 = vcmp.eq.f32.partialorder %v910_v19, 8.507059e+37  ;;  %v890_v57 = vmul.f32 %v889_v59, %v1700_v1 }
 0x214   : > { %v903_v31 = vsub.f32 1.0, %v902_v35  ;;  %v928_v0 = vmul.f32 %v927_v52, %v1757_v44  ;;  %v628_v16 = vmul.f32 0.5, %v1655_v10  ;;  %v629_v15 = vmul.f32 0.5, %v1740_v11  ;;  %v1033_v10 = vld [vmem:[%s1726_s18 + $0x10] sm:$0xff] (%p1430_p6) }
 0x215   : > { %v789_v29 = vsel %vm788_vm3, %v1319_v38, %v785_v28  ;;  %v939_v45 = vmul.f32 %v938_v40, %v1757_v44  ;;  %1034 = vst [vmem:[%s994_s17 + $0x20] sm:$0xff] (%p1430_p6), %v1033_v10 }
 0x216   : > { %v794_v33 = vsel %vm791_vm4, %v793_v36, %v789_v29  ;;  %v904_v43 = vmul.f32 %v1321_v20, %v903_v31  ;;  %v929_v37 = vadd.f32 1.1283791, %v928_v0 }
 0x217   : > { %v795_v47 = vmul.f32 %v794_v33, %v770_v23  ;;  %v940_v48 = vadd.f32 1.0, %v939_v45 }
 0x218   : > { %v905_v49 = vadd.f32 %v1321_v20, %v904_v43  ;;  %v930_v13 = vmul.f32 %v929_v37, %v1749_v12  ;;  %v1029_v12 = vld [vmem:[%s1726_s18] sm:$0xff] (%p1430_p6) }
 0x219   : > { %v1211_v3 = vclamps-f32 %v795_v47, 1.0  ;;  %1322 = vrcp.f32 %v940_v48  ;;  %v952_v4 = vand.u32 2147483648, %v940_v48  ;;  %v950_v7 = vand.u32 2147483647, %v940_v48  ;;  %1030 = vst [vmem:[%s994_s17] sm:$0xff] (%p1430_p6), %v1029_v12 }
 0x21a   : > { %v909_v60 = vsel %vm908_vm7, %v1321_v20, %v905_v49  ;;  %vm946_vm10 = vweird.f32 %v940_v48 }
 0x21b   : > { %v961_v26 = vadd.f32 1.0, %v1211_v3  ;;  %v914_v6 = vsel %vm911_vm8, %v913_v61, %v909_v60  ;;  %v953_v25 = vor.u32 1.1754944e-38, %v952_v4  ;;  %vm951_vm12 = vcmp.eq.f32.partialorder %v950_v7, 8.507059e+37 }
 0x21c   : > { %v915_v58 = vmul.f32 %v914_v6, %v890_v57 }
 0x21d   : > { %v969_v34 = vmul.f32 %v961_v26, %v625_v27 }
 0x21e   : > { %v1214_v42 = vclamps-f32 %v915_v58, 1.0 }
 0x21f   : > { %v975_v9 = vpack.c.bf16 %v969_v34, %v968_v56  ;;  %v1323_v62 = vpop.eup %1322 }
 0x220   : > { %v942_v54 = vmul.f32 %v1323_v62, %v940_v48  ;;  %vm947_vm9 = vweird.f32 %v1323_v62  ;;  %v964_v44 = vadd.f32 1.0, %v1214_v42 }
 0x221   : > { %979 = vst [vmem:[%s1726_s18 + $0x8] sm:$0xff] %v975_v9  ;;  %vm948_vm11 = vmor %vm946_vm10, %vm947_vm9 }
 0x222   : > { %v943_v38 = vsub.f32 1.0, %v942_v54  ;;  %v972_v32 = vmul.f32 %v964_v44, %v628_v16 }
 0x224   : > { %v944_v5 = vmul.f32 %v1323_v62, %v943_v38 }
 0x226   : > { %v945_v8 = vadd.f32 %v1323_v62, %v944_v5 }
 0x228   : > { %v949_v24 = vsel %vm948_vm11, %v1323_v62, %v945_v8  ;;  %v1031_v39 = vld [vmem:[%s1726_s18 + $0x8] sm:$0xff] (%p1430_p6) }
 0x229   : > { %v954_v1 = vsel %vm951_vm12, %v953_v25, %v949_v24  ;;  %1032 = vst [vmem:[%s994_s17 + $0x10] sm:$0xff] (%p1430_p6), %v1031_v39 }
 0x22a   : > { %v955_v14 = vmul.f32 %v954_v1, %v930_v13 }
 0x22c   : > { %v1215_v17 = vclamps-f32 %v955_v14, 1.0 }
 0x22e   : > { %v965_v18 = vadd.f32 1.0, %v1215_v17 }
 0x230   : > { %v973_v20 = vmul.f32 %v965_v18, %v629_v15  ;;  %988 = sbr.rel (!%p1430_p6) target bundleno = 573 (0x23d), region = 82 }
 0x232   : > { %v977_v41 = vpack.c.bf16 %v973_v20, %v972_v32 }
 0x234   : > { %981 = vst [vmem:[%s1726_s18 + $0x18] sm:$0xff] %v977_v41 }
 0x23b   : > { %v1035_v11 = vld [vmem:[%s1726_s18 + $0x18] sm:$0xff] }
 0x23c   : > { %1036 = vst [vmem:[%s994_s17 + $0x30] sm:$0xff] %v1035_v11 }
 0x23d PF: > { %s15_s22 = sadd.s32 1, %s1362_s22   ;;  %s1833_s18 = smov %s1350_s19 }
 0x23e   : > { %p12_p12 = scmp.ge.s32.totalorder %s15_s22, 4   ;;  %s1834_s19 = smov %s1435_s28 }
 0x23f   : > { %s1835_s20 = smov %s1358_s21  ;;  %s1836_s21 = smov %s1838_s23 }
 0x240   :  { %14 = sbr.rel (!%p12_p12) target bundleno = 3 (0x3), region = 157 }

// kernel: maskgit_forward.24
= control target key start
LH: loop header
LB: loop body
LE: loop exit
PB: predicated region body
PF: predicated region fallthrough
CT: control target
= control target key end

     0   :  { %s690_s1 = inlined_call_operand.vmem [shape: bf16[128,128], index: 1, kind: input, shape index: {}]   ;;  %s691_s2 = inlined_call_operand.vmem [shape: f32[1,128], index: 2, kind: input, shape index: {}]   ;;  %s692_s0 = inlined_call_operand.vmem [shape: f32[32,128], index: 0, kind: input, shape index: {}]   ;;  %s693_s3 = inlined_call_operand.vmem [shape: f32[1,128], index: 3, kind: input, shape index: {}]   ;;  %s694_s4 = inlined_call_operand.vmem [shape: f32[1,128], index: 4, kind: input, shape index: {}]   ;;  %s695_s5 = inlined_call_operand.vmem [shape: bf16[32,128], index: 5, kind: output, shape index: {}]  }
   0x1   :  { %v447_v0 = vld [vmem:[%s690_s1 + $0x38] sm:$0xff]  ;;  %v446_v1 = vld [vmem:[%s690_s1 + $0x30] sm:$0xff]  ;;  %v445_v2 = vld [vmem:[%s690_s1 + $0x28] sm:$0xff] }
   0x2   :  { %94 = vmatpush.bf16.msra.mxu0 %v447_v0  ;;  %459 = vmatpush.bf16.msra.mxu1 %v447_v0  ;;  %v444_v3 = vld [vmem:[%s690_s1 + $0x20] sm:$0xff]  ;;  %v443_v4 = vld [vmem:[%s690_s1 + $0x18] sm:$0xff]  ;;  %v442_v5 = vld [vmem:[%s690_s1 + $0x10] sm:$0xff] }
   0x3   :  { %v441_v6 = vld [vmem:[%s690_s1 + $0x8] sm:$0xff]  ;;  %v440_v7 = vld [vmem:[%s690_s1] sm:$0xff]  ;;  %v22_v10 = vld [vmem:[%s692_s0 + $0x10] sm:$0xff] }
   0x4   :  { %v20_v8 = vld [vmem:[%s692_s0] sm:$0xff]  ;;  %v21_v9 = vld [vmem:[%s692_s0 + $0x8] sm:$0xff]  ;;  %v23_v11 = vld [vmem:[%s692_s0 + $0x18] sm:$0xff] }
   0x5   :  { %v24_v12 = vpack.c.bf16 %v21_v9, %v20_v8  ;;  %v25_v13 = vpack.c.bf16 %v23_v11, %v22_v10  ;;  %v468_v14 = vld [vmem:[%s691_s2] ss:$0 sm:$0xff] }
   0x6   :  { %95 = vmatpush.bf16.msra.mxu0 %v446_v1  ;;  %460 = vmatpush.bf16.msra.mxu1 %v446_v1 }
   0xa   :  { %96 = vmatpush.bf16.msra.mxu0 %v445_v2  ;;  %461 = vmatpush.bf16.msra.mxu1 %v445_v2 }
   0xe   :  { %97 = vmatpush.bf16.msra.mxu0 %v444_v3  ;;  %462 = vmatpush.bf16.msra.mxu1 %v444_v3 }
  0x12   :  { %98 = vmatpush.bf16.msra.mxu0 %v443_v4  ;;  %463 = vmatpush.bf16.msra.mxu1 %v443_v4 }
  0x16   :  { %99 = vmatpush.bf16.msra.mxu0 %v442_v5  ;;  %464 = vmatpush.bf16.msra.mxu1 %v442_v5 }
  0x1a   :  { %100 = vmatpush.bf16.msra.mxu0 %v441_v6  ;;  %465 = vmatpush.bf16.msra.mxu1 %v441_v6 }
  0x1e   :  { %101 = vmatpush.bf16.msra.mxu0 %v440_v7  ;;  %466 = vmatpush.bf16.msra.mxu1 %v440_v7 }
  0x21   :  { %102 = vmatmul.bf16.vlgmr.msra.gmra.mxu0 %v24_v12  ;;  %107 = vmatmul.bf16.vlgmr.msra.gmra.mxu1 %v25_v13 }
  0x9e   :  { %v103_v15 = vpop.f32.mrf.mxu0  ;;  %v108_v16 = vpop.f32.mrf.mxu1 }
  0x9f   :  { %v559_v17 = vadd.f32 %v468_v14, %v103_v15  ;;  %v561_v18 = vadd.f32 %v468_v14, %v108_v16 }
  0xa1   :  { %v564_v19 = vmul.f32 0.70710677, %v559_v17  ;;  %v567_v20 = vmul.f32 0.70710677, %v561_v18 }
  0xa3   :  { %v121_v21 = vmul.f32 %v564_v19, %v564_v19  ;;  %v201_v22 = vmul.f32 %v567_v20, %v567_v20 }
  0xa5   :  { %v573_v23 = vmin.f32 %v121_v21, 16.0  ;;  %v575_v24 = vmin.f32 %v201_v22, 16.0 }
  0xa6   :  { %v105_v25 = vpop.f32.mrf.mxu0  ;;  %v110_v26 = vpop.f32.mrf.mxu1 }
  0xa7   :  { %v123_v27 = vmul.f32 2.1237322e-06, %v573_v23  ;;  %v203_v28 = vmul.f32 2.1237322e-06, %v575_v24  ;;  %v579_v29 = vadd.f32 %v468_v14, %v105_v25  ;;  %v581_v30 = vadd.f32 %v468_v14, %v110_v26 }
  0xa8   :  { %v214_v31 = vmul.f32 3.8918573e-05, %v575_v24  ;;  %v134_v32 = vmul.f32 3.8918573e-05, %v573_v23 }
  0xa9   :  { %v124_v33 = vadd.f32 0.00028619796, %v123_v27  ;;  %v204_v34 = vadd.f32 0.00028619796, %v203_v28  ;;  %v586_v35 = vmul.f32 0.70710677, %v579_v29 }
  0xaa   :  { %v589_v36 = vmul.f32 0.70710677, %v581_v30  ;;  %v215_v37 = vadd.f32 0.001143296, %v214_v31  ;;  %v135_v40 = vadd.f32 0.001143296, %v134_v32 }
  0xab   :  { %v125_v38 = vmul.f32 %v124_v33, %v573_v23  ;;  %v205_v39 = vmul.f32 %v204_v34, %v575_v24  ;;  %v161_v41 = vmul.f32 %v586_v35, %v586_v35 }
  0xac   :  { %v241_v42 = vmul.f32 %v589_v36, %v589_v36  ;;  %v216_v43 = vmul.f32 %v215_v37, %v575_v24  ;;  %v136_v46 = vmul.f32 %v135_v40, %v573_v23 }
  0xad   :  { %v126_v44 = vadd.f32 0.0036580483, %v125_v38  ;;  %v206_v45 = vadd.f32 0.0036580483, %v205_v39  ;;  %v599_v47 = vmin.f32 %v161_v41, 16.0 }
  0xae   :  { %v601_v48 = vmin.f32 %v241_v42, 16.0  ;;  %v217_v49 = vadd.f32 0.014752088, %v216_v43  ;;  %v137_v52 = vadd.f32 0.014752088, %v136_v46 }
  0xaf   :  { %v127_v50 = vmul.f32 %v126_v44, %v573_v23  ;;  %v207_v51 = vmul.f32 %v206_v45, %v575_v24  ;;  %v163_v53 = vmul.f32 2.1237322e-06, %v599_v47  ;;  %v174_v58 = vmul.f32 3.8918573e-05, %v599_v47 }
  0xb0   :  { %v243_v54 = vmul.f32 2.1237322e-06, %v601_v48  ;;  %v218_v55 = vmul.f32 %v217_v49, %v575_v24  ;;  %v254_v56 = vmul.f32 3.8918573e-05, %v601_v48  ;;  %v138_v57 = vmul.f32 %v137_v52, %v573_v23 }
  0xb1   :  { %v164_v59 = vadd.f32 0.00028619796, %v163_v53  ;;  %v128_v0 = vadd.f32 0.05243302, %v127_v50  ;;  %v208_v1 = vadd.f32 0.05243302, %v207_v51 }
  0xb2   :  { %v244_v60 = vadd.f32 0.00028619796, %v243_v54  ;;  %v219_v61 = vadd.f32 0.112945676, %v218_v55  ;;  %v139_v62 = vadd.f32 0.112945676, %v138_v57 }
  0xb3   :  { %v255_v63 = vadd.f32 0.001143296, %v254_v56  ;;  %v175_v3 = vadd.f32 0.001143296, %v174_v58  ;;  %v165_v7 = vmul.f32 %v164_v59, %v599_v47  ;;  %v129_v12 = vmul.f32 %v128_v0, %v573_v23 }
  0xb4   :  { %v220_v2 = vmul.f32 %v219_v61, %v575_v24  ;;  %v245_v4 = vmul.f32 %v244_v60, %v601_v48  ;;  %v140_v5 = vmul.f32 %v139_v62, %v573_v23  ;;  %v209_v13 = vmul.f32 %v208_v1, %v575_v24 }
  0xb5   :  { %v256_v6 = vmul.f32 %v255_v63, %v601_v48  ;;  %v176_v9 = vmul.f32 %v175_v3, %v599_v47  ;;  %v166_v25 = vadd.f32 0.0036580483, %v165_v7  ;;  %v130_v32 = vadd.f32 0.18741608, %v129_v12 }
  0xb6   :  { %v221_v8 = vadd.f32 0.4994258, %v220_v2  ;;  %v141_v10 = vadd.f32 0.4994258, %v140_v5  ;;  %v246_v16 = vadd.f32 0.0036580483, %v245_v4 }
  0xb7   :  { %v257_v11 = vadd.f32 0.014752088, %v256_v6  ;;  %v177_v15 = vadd.f32 0.014752088, %v176_v9  ;;  %v210_v33 = vadd.f32 0.18741608, %v209_v13  ;;  %v167_v37 = vmul.f32 %v166_v25, %v599_v47 }
  0xb8   :  { %v222_v14 = vmul.f32 %v221_v8, %v575_v24  ;;  %v142_v21 = vmul.f32 %v141_v10, %v573_v23  ;;  %v247_v34 = vmul.f32 %v246_v16, %v601_v48  ;;  %v131_v40 = vmul.f32 %v130_v32, %v573_v23 }
  0xb9   :  { %v258_v22 = vmul.f32 %v257_v11, %v601_v48  ;;  %v178_v31 = vmul.f32 %v177_v15, %v599_v47  ;;  %v211_v41 = vmul.f32 %v210_v33, %v575_v24  ;;  %v168_v46 = vadd.f32 0.05243302, %v167_v37 }
  0xba   :  { %v223_v26 = vadd.f32 1.0, %v222_v14  ;;  %v143_v27 = vadd.f32 1.0, %v142_v21  ;;  %v248_v43 = vadd.f32 0.05243302, %v247_v34  ;;  %v132_v53 = vadd.f32 1.1283791, %v131_v40 }
  0xbb   :  { %v259_v28 = vadd.f32 0.112945676, %v258_v22  ;;  %v179_v39 = vadd.f32 0.112945676, %v178_v31  ;;  %v212_v54 = vadd.f32 1.1283791, %v211_v41  ;;  %v169_v58 = vmul.f32 %v168_v46, %v599_v47 }
  0xbc   :  { %471 = vrcp.f32 %v223_v26  ;;  %v249_v56 = vmul.f32 %v248_v43, %v601_v48  ;;  %v233_v59 = vand.u32 2147483647, %v223_v26  ;;  %v235_v60 = vand.u32 2147483648, %v223_v26 }
  0xbd   :  { %473 = vrcp.f32 %v143_v27  ;;  %v260_v38 = vmul.f32 %v259_v28, %v601_v48  ;;  %v180_v44 = vmul.f32 %v179_v39, %v599_v47  ;;  %v155_v63 = vand.u32 2147483648, %v143_v27 }
  0xbe   :  { %v153_v1 = vand.u32 2147483647, %v143_v27  ;;  %v213_v3 = vmul.f32 %v212_v54, %v567_v20  ;;  %v250_v4 = vadd.f32 0.18741608, %v249_v56  ;;  %vm229_vm2 = vweird.f32 %v223_v26 }
  0xbf   :  { %v261_v42 = vadd.f32 0.4994258, %v260_v38  ;;  %v181_v52 = vadd.f32 0.4994258, %v180_v44  ;;  %v236_v6 = vor.u32 1.1754944e-38, %v235_v60  ;;  %vm149_vm4 = vweird.f32 %v143_v27 }
  0xc0   :  { %v170_v8 = vadd.f32 0.18741608, %v169_v58  ;;  %vm234_vm5 = vcmp.eq.f32.partialorder %v233_v59, 8.507059e+37  ;;  %v156_v10 = vor.u32 1.1754944e-38, %v155_v63  ;;  %v133_v11 = vmul.f32 %v132_v53, %v564_v19 }
  0xc1   :  { %v262_v49 = vmul.f32 %v261_v42, %v601_v48  ;;  %v182_v24 = vmul.f32 %v181_v52, %v599_v47  ;;  %vm154_vm7 = vcmp.eq.f32.partialorder %v153_v1, 8.507059e+37  ;;  %v251_v14 = vmul.f32 %v250_v4, %v601_v48 }
  0xc2   :  { %v472_v45 = vpop.eup %471  ;;  %v171_v25 = vmul.f32 %v170_v8, %v599_v47  ;;  %v113_v28 = vmul.f32 0.5, %v559_v17  ;;  %v115_v31 = vmul.f32 0.5, %v561_v18  ;;  %v116_v58 = vmul.f32 0.5, %v581_v30 }
  0xc3   :  { %v474_v50 = vpop.eup %473  ;;  %v225_v51 = vmul.f32 %v472_v45, %v223_v26  ;;  %v631_v23 = vadd.f32 1.0, %v262_v49  ;;  %vm230_vm0 = vweird.f32 %v472_v45  ;;  %v636_v2 = vadd.f32 1.0, %v182_v24 }
  0xc4   :  { %v145_v55 = vmul.f32 %v474_v50, %v143_v27  ;;  %vm150_vm1 = vweird.f32 %v474_v50  ;;  %vm231_vm3 = vmor %vm229_vm2, %vm230_vm0  ;;  %v252_v33 = vadd.f32 1.1283791, %v251_v14  ;;  %v172_v47 = vadd.f32 1.1283791, %v171_v25 }
  0xc5   :  { %v226_v57 = vsub.f32 1.0, %v225_v51  ;;  %475 = vrcp.f32 %v631_v23  ;;  %vm151_vm6 = vmor %vm149_vm4, %vm150_vm1  ;;  %v275_v37 = vand.u32 2147483648, %v631_v23  ;;  %v273_v40 = vand.u32 2147483647, %v631_v23 }
  0xc6   :  { %v146_v61 = vsub.f32 1.0, %v145_v55  ;;  %477 = vrcp.f32 %v636_v2  ;;  %vm269_vm9 = vweird.f32 %v631_v23  ;;  %v195_v18 = vand.u32 2147483648, %v636_v2 }
  0xc7   :  { %v227_v62 = vmul.f32 %v472_v45, %v226_v57  ;;  %v276_v44 = vor.u32 1.1754944e-38, %v275_v37  ;;  %v193_v46 = vand.u32 2147483647, %v636_v2  ;;  %v253_v49 = vmul.f32 %v252_v33, %v589_v36 }
  0xc8   :  { %v147_v0 = vmul.f32 %v474_v50, %v146_v61  ;;  %vm274_vm12 = vcmp.eq.f32.partialorder %v273_v40, 8.507059e+37  ;;  %vm189_vm13 = vweird.f32 %v636_v2  ;;  %v196_v54 = vor.u32 1.1754944e-38, %v195_v18 }
  0xc9   :  { %v228_v5 = vadd.f32 %v472_v45, %v227_v62  ;;  %v173_v55 = vmul.f32 %v172_v47, %v586_v35  ;;  %vm194_vm15 = vcmp.eq.f32.partialorder %v193_v46, 8.507059e+37  ;;  %v114_v61 = vmul.f32 0.5, %v579_v29 }
  0xca   :  { %v148_v7 = vadd.f32 %v474_v50, %v147_v0  ;;  %v489_v0 = vmov 128.0  }
  0xcb   :  { %v232_v9 = vsel %vm231_vm3, %v472_v45, %v228_v5  ;;  %v476_v20 = vpop.eup %475  ;;  %479 = vrcp.f32 %v489_v0  ;;  %v470_v0 = vld [vmem:[%s694_s4] ss:$0 sm:$0xff] }
  0xcc   :  { %v237_v12 = vsel %vm234_vm5, %v236_v6, %v232_v9  ;;  %v152_v13 = vsel %vm151_vm6, %v474_v50, %v148_v7  ;;  %v265_v22 = vmul.f32 %v476_v20, %v631_v23  ;;  %v478_v27 = vpop.eup %477  ;;  %vm270_vm8 = vweird.f32 %v476_v20 }
  0xcd   :  { %v238_v15 = vmul.f32 %v237_v12, %v213_v3  ;;  %v157_v16 = vsel %vm154_vm7, %v156_v10, %v152_v13  ;;  %v185_v48 = vmul.f32 %v478_v27, %v636_v2  ;;  %vm271_vm10 = vmor %vm269_vm9, %vm270_vm8  ;;  %vm190_vm11 = vweird.f32 %v478_v27 }
  0xce   :  { %v158_v21 = vmul.f32 %v157_v16, %v133_v11  ;;  %v266_v32 = vsub.f32 1.0, %v265_v22  ;;  %vm191_vm14 = vmor %vm189_vm13, %vm190_vm11 }
  0xcf   :  { %v438_v26 = vclamps-f32 %v238_v15, 1.0  ;;  %v186_v42 = vsub.f32 1.0, %v185_v48 }
  0xd0   :  { %v436_v19 = vclamps-f32 %v158_v21, 1.0  ;;  %v267_v39 = vmul.f32 %v476_v20, %v266_v32 }
  0xd1   :  { %v283_v34 = vadd.f32 1.0, %v438_v26  ;;  %v187_v45 = vmul.f32 %v478_v27, %v186_v42  ;;  %v480_v1 = vpop.eup %479 }
  0xd2   :  { %v281_v38 = vadd.f32 1.0, %v436_v19  ;;  %v268_v17 = vadd.f32 %v476_v20, %v267_v39  ;;  %v300_v35 = vmul.f32 128.0, %v480_v1  ;;  %vm304_vm0 = vweird.f32 %v480_v1 }
  0xd3   :  { %v287_v41 = vmul.f32 %v283_v34, %v115_v31  ;;  %v188_v52 = vadd.f32 %v478_v27, %v187_v45 }
  0xd4   :  { %v285_v43 = vmul.f32 %v281_v38, %v113_v28  ;;  %v272_v50 = vsel %vm271_vm10, %v476_v20, %v268_v17  ;;  %v301_v2 = vsub.f32 1.0, %v300_v35 }
  0xd5   :  { %295 = vadd.xlane.f32.xlu1 %v287_v41  ;;  %v277_v51 = vsel %vm274_vm12, %v276_v44, %v272_v50  ;;  %v192_v56 = vsel %vm191_vm14, %v478_v27, %v188_v52 }
  0xd6   :  { %291 = vadd.xlane.f32.xlu0 %v285_v43  ;;  %v278_v53 = vmul.f32 %v277_v51, %v253_v49  ;;  %v197_v23 = vsel %vm194_vm15, %v196_v54, %v192_v56  ;;  %v302_v3 = vmul.f32 %v480_v1, %v301_v2 }
  0xd7   :  { %v198_v24 = vmul.f32 %v197_v23, %v173_v55 }
  0xd8   :  { %v439_v57 = vclamps-f32 %v278_v53, 1.0  ;;  %v303_v4 = vadd.f32 %v480_v1, %v302_v3  ;;  %v469_v53 = vld [vmem:[%s693_s3] ss:$0 sm:$0xff] }
  0xd9   :  { %v437_v59 = vclamps-f32 %v198_v24, 1.0 }
  0xda   :  { %v284_v36 = vadd.f32 1.0, %v439_v57  ;;  %v305_v5 = vsel %vm304_vm0, %v480_v1, %v303_v4 }
  0xdb   :  { %v282_v62 = vadd.f32 1.0, %v437_v59 }
  0xdc   :  { %v288_v60 = vmul.f32 %v284_v36, %v116_v58 }
  0xdd   :  { %v286_v63 = vmul.f32 %v282_v62, %v114_v61 }
  0xde   :  { %297 = vadd.xlane.f32.xlu1 %v288_v60 }
  0xdf   :  { %293 = vadd.xlane.f32.xlu0 %v286_v63 }
 0x148   :  { %v296_v6 = vpop.xlane.xlu1 %295 }
 0x149   :  { %v308_v30 = vmul.f32 %v305_v5, %v296_v6  ;;  %v292_v7 = vpop.xlane.xlu0 %291 }
 0x14a   :  { %v306_v8 = vmul.f32 %v305_v5, %v292_v7 }
 0x14b   :  { %v658_v9 = vsub.f32 %v287_v41, %v308_v30 }
 0x14c   :  { %v660_v29 = vsub.f32 %v285_v43, %v306_v8 }
 0x14d   :  { %v316_v10 = vmul.f32 %v658_v9, %v658_v9 }
 0x14e   :  { %v314_v11 = vmul.f32 %v660_v29, %v660_v29 }
 0x14f   :  { %322 = vadd.xlane.f32.xlu0 %v316_v10 }
 0x150   :  { %318 = vadd.xlane.f32.xlu2 %v314_v11 }
 0x151   :  { %v298_v12 = vpop.xlane.xlu1 %297 }
 0x152   :  { %v309_v13 = vmul.f32 %v305_v5, %v298_v12  ;;  %v294_v14 = vpop.xlane.xlu0 %293 }
 0x153   :  { %v307_v15 = vmul.f32 %v305_v5, %v294_v14 }
 0x154   :  { %v666_v20 = vsub.f32 %v288_v60, %v309_v13 }
 0x155   :  { %v670_v21 = vsub.f32 %v286_v63, %v307_v15 }
 0x156   :  { %v317_v16 = vmul.f32 %v666_v20, %v666_v20 }
 0x157   :  { %v315_v22 = vmul.f32 %v670_v21, %v670_v21 }
 0x158   :  { %324 = vadd.xlane.f32.xlu1 %v317_v16 }
 0x159   :  { %320 = vadd.xlane.f32.xlu2 %v315_v22 }
 0x1c2   :  { %v323_v25 = vpop.xlane.xlu0 %322 }
 0x1c3   :  { %v319_v26 = vpop.xlane.xlu2 %318  ;;  %v328_v27 = vmul.f32 %v323_v25, %v305_v5 }
 0x1c4   :  { %v326_v28 = vmul.f32 %v319_v26, %v305_v5 }
 0x1c5   :  { %v332_v31 = vadd.f32 1e-05, %v328_v27 }
 0x1c6   :  { %v330_v19 = vadd.f32 1e-05, %v326_v28 }
 0x1c7   :  { %481 = vrsqrt.f32 %v332_v31  ;;  %vm360_vm2 = vweird.f32 %v332_v31 }
 0x1c8   :  { %483 = vrsqrt.f32 %v330_v19  ;;  %vm340_vm5 = vweird.f32 %v330_v19 }
 0x1cb   :  { %v325_v33 = vpop.xlane.xlu1 %324 }
 0x1cc   :  { %v329_v48 = vmul.f32 %v325_v33, %v305_v5  ;;  %v321_v47 = vpop.xlane.xlu2 %320 }
 0x1cd   :  { %v482_v32 = vpop.eup %481  ;;  %v327_v42 = vmul.f32 %v321_v47, %v305_v5 }
 0x1ce   :  { %v484_v34 = vpop.eup %483  ;;  %v355_v37 = vmul.f32 %v482_v32, %v332_v31  ;;  %v333_v40 = vadd.f32 1e-05, %v329_v48  ;;  %vm361_vm1 = vweird.f32 %v482_v32 }
 0x1cf   :  { %v335_v38 = vmul.f32 %v484_v34, %v330_v19  ;;  %v331_v17 = vadd.f32 1e-05, %v327_v42  ;;  %vm341_vm3 = vweird.f32 %v484_v34  ;;  %vm362_vm4 = vmor %vm360_vm2, %vm361_vm1 }
 0x1d0   :  { %v356_v39 = vmul.f32 %v482_v32, %v355_v37  ;;  %485 = vrsqrt.f32 %v333_v40  ;;  %vm342_vm6 = vmor %vm340_vm5, %vm341_vm3  ;;  %vm370_vm8 = vweird.f32 %v333_v40 }
 0x1d1   :  { %v336_v41 = vmul.f32 %v484_v34, %v335_v38  ;;  %487 = vrsqrt.f32 %v331_v17  ;;  %vm350_vm11 = vweird.f32 %v331_v17 }
 0x1d2   :  { %v357_v43 = vmul.f32 0.5, %v356_v39 }
 0x1d3   :  { %v337_v18 = vmul.f32 0.5, %v336_v41 }
 0x1d4   :  { %v358_v44 = vsub.f32 1.5, %v357_v43 }
 0x1d5   :  { %v338_v46 = vsub.f32 1.5, %v337_v18 }
 0x1d6   :  { %v486_v45 = vpop.eup %485  ;;  %v359_v49 = vmul.f32 %v482_v32, %v358_v44 }
 0x1d7   :  { %v365_v50 = vmul.f32 %v486_v45, %v333_v40  ;;  %v488_v51 = vpop.eup %487  ;;  %v339_v54 = vmul.f32 %v484_v34, %v338_v46  ;;  %vm371_vm7 = vweird.f32 %v486_v45 }
 0x1d8   :  { %v345_v55 = vmul.f32 %v488_v51, %v331_v17  ;;  %v363_v56 = vsel %vm362_vm4, %v482_v32, %v359_v49  ;;  %vm372_vm9 = vmor %vm370_vm8, %vm371_vm7  ;;  %vm351_vm10 = vweird.f32 %v488_v51 }
 0x1d9   :  { %v366_v52 = vmul.f32 %v486_v45, %v365_v50  ;;  %v343_v58 = vsel %vm342_vm6, %v484_v34, %v339_v54  ;;  %v379_v36 = vmul.f32 %v469_v53, %v363_v56  ;;  %vm352_vm12 = vmor %vm350_vm11, %vm351_vm10 }
 0x1da   :  { %v346_v23 = vmul.f32 %v488_v51, %v345_v55  ;;  %v377_v62 = vmul.f32 %v469_v53, %v343_v58 }
 0x1db   :  { %v367_v57 = vmul.f32 0.5, %v366_v52  ;;  %v383_v1 = vmul.f32 %v379_v36, %v658_v9 }
 0x1dc   :  { %v347_v59 = vmul.f32 0.5, %v346_v23  ;;  %v381_v5 = vmul.f32 %v377_v62, %v660_v29 }
 0x1dd   :  { %v368_v24 = vsub.f32 1.5, %v367_v57  ;;  %v390_v30 = vadd.f32 %v470_v0, %v383_v1 }
 0x1de   :  { %v348_v61 = vsub.f32 1.5, %v347_v59  ;;  %v388_v11 = vadd.f32 %v470_v0, %v381_v5 }
 0x1df   :  { %v369_v60 = vmul.f32 %v486_v45, %v368_v24 }
 0x1e0   :  { %v349_v2 = vmul.f32 %v488_v51, %v348_v61 }
 0x1e1   :  { %v373_v63 = vsel %vm372_vm9, %v486_v45, %v369_v60 }
 0x1e2   :  { %v380_v35 = vmul.f32 %v469_v53, %v373_v63  ;;  %v353_v4 = vsel %vm352_vm12, %v488_v51, %v349_v2 }
 0x1e3   :  { %v378_v6 = vmul.f32 %v469_v53, %v353_v4 }
 0x1e4   :  { %v384_v3 = vmul.f32 %v380_v35, %v666_v20 }
 0x1e5   :  { %v382_v8 = vmul.f32 %v378_v6, %v670_v21 }
 0x1e6   :  { %v391_v7 = vadd.f32 %v470_v0, %v384_v3 }
 0x1e7   :  { %v389_v12 = vadd.f32 %v470_v0, %v382_v8 }
 0x1e8   :  { %v456_v10 = vpack.c.bf16 %v391_v7, %v390_v30 }
 0x1e9   :  { %v451_v9 = vpack.c.bf16 %v389_v12, %v388_v11 }
 0x1ea   :  { %458 = vst [vmem:[%s695_s5 + $0x8] sm:$0xff] %v456_v10  }
 0x1eb   :  { %452 = vst [vmem:[%s695_s5] sm:$0xff] %v451_v9  }

// kernel: maskgit_forward.18
= control target key start
LH: loop header
LB: loop body
LE: loop exit
PB: predicated region body
PF: predicated region fallthrough
CT: control target
= control target key end

     0   :  { %s814_s1 = inlined_call_operand.vmem [shape: bf16[512,128], index: 1, kind: input, shape index: {}]   ;;  %s815_s2 = inlined_call_operand.vmem [shape: f32[1,128], index: 2, kind: input, shape index: {}]   ;;  %s816_s0 = inlined_call_operand.vmem [shape: bf16[32,512], index: 0, kind: input, shape index: {}]   ;;  %s817_s3 = inlined_call_operand.vmem [shape: f32[32,128], index: 3, kind: input, shape index: {}]   ;;  %s818_s4 = inlined_call_operand.vmem [shape: f32[32,128], index: 4, kind: output, shape index: {}]  }
   0x1   :  { %v592_v0 = vld [vmem:[%s814_s1 + $0x38] sm:$0xff]  ;;  %v591_v4 = vld [vmem:[%s814_s1 + $0x30] sm:$0xff]  ;;  %v590_v8 = vld [vmem:[%s814_s1 + $0x28] sm:$0xff] }
   0x2   :  { %v600_v1 = vld [vmem:[%s814_s1 + $0x78] sm:$0xff]  ;;  %325 = vmatpush.bf16.msra.mxu0 %v592_v0  ;;  %v599_v5 = vld [vmem:[%s814_s1 + $0x70] sm:$0xff]  ;;  %v598_v9 = vld [vmem:[%s814_s1 + $0x68] sm:$0xff] }
   0x3   :  { %v608_v2 = vld [vmem:[%s814_s1 + $0xb8] sm:$0xff]  ;;  %344 = vmatpush.bf16.msra.mxu1 %v600_v1  ;;  %v607_v6 = vld [vmem:[%s814_s1 + $0xb0] sm:$0xff]  ;;  %v606_v10 = vld [vmem:[%s814_s1 + $0xa8] sm:$0xff] }
   0x4   :  { %v616_v3 = vld [vmem:[%s814_s1 + $0xf8] sm:$0xff]  ;;  %363 = vmatpush.bf16.msra.mxu2 %v608_v2  ;;  %v615_v7 = vld [vmem:[%s814_s1 + $0xf0] sm:$0xff]  ;;  %v614_v11 = vld [vmem:[%s814_s1 + $0xe8] sm:$0xff] }
   0x5   :  { %382 = vmatpush.bf16.msra.mxu3 %v616_v3  ;;  %v589_v12 = vld [vmem:[%s814_s1 + $0x20] sm:$0xff]  ;;  %v588_v16 = vld [vmem:[%s814_s1 + $0x18] sm:$0xff]  ;;  %v587_v20 = vld [vmem:[%s814_s1 + $0x10] sm:$0xff] }
   0x6   :  { %326 = vmatpush.bf16.msra.mxu0 %v591_v4  ;;  %v597_v13 = vld [vmem:[%s814_s1 + $0x60] sm:$0xff]  ;;  %v596_v17 = vld [vmem:[%s814_s1 + $0x58] sm:$0xff]  ;;  %v595_v21 = vld [vmem:[%s814_s1 + $0x50] sm:$0xff] }
   0x7   :  { %345 = vmatpush.bf16.msra.mxu1 %v599_v5  ;;  %v605_v14 = vld [vmem:[%s814_s1 + $0xa0] sm:$0xff]  ;;  %v604_v18 = vld [vmem:[%s814_s1 + $0x98] sm:$0xff]  ;;  %v603_v22 = vld [vmem:[%s814_s1 + $0x90] sm:$0xff] }
   0x8   :  { %364 = vmatpush.bf16.msra.mxu2 %v607_v6  ;;  %v613_v15 = vld [vmem:[%s814_s1 + $0xe0] sm:$0xff]  ;;  %v612_v19 = vld [vmem:[%s814_s1 + $0xd8] sm:$0xff]  ;;  %v611_v23 = vld [vmem:[%s814_s1 + $0xd0] sm:$0xff] }
   0x9   :  { %383 = vmatpush.bf16.msra.mxu3 %v615_v7  ;;  %v586_v24 = vld [vmem:[%s814_s1 + $0x8] sm:$0xff]  ;;  %v585_v28 = vld [vmem:[%s814_s1] sm:$0xff]  ;;  %v579_v33 = vld [vmem:[%s816_s0 + $0xc] sm:$0xf0] }
   0xa   :  { %327 = vmatpush.bf16.msra.mxu0 %v590_v8  ;;  %v594_v25 = vld [vmem:[%s814_s1 + $0x48] sm:$0xff]  ;;  %v593_v29 = vld [vmem:[%s814_s1 + $0x40] sm:$0xff]  ;;  %v421_v35 = vld [vmem:[%s816_s0 + $0x10] sm:$0xf0] }
   0xb   :  { %346 = vmatpush.bf16.msra.mxu1 %v598_v9  ;;  %v602_v26 = vld [vmem:[%s814_s1 + $0x88] sm:$0xff]  ;;  %v601_v30 = vld [vmem:[%s814_s1 + $0x80] sm:$0xff]  ;;  %v580_v37 = vld [vmem:[%s816_s0 + $0x14] sm:$0xf0] }
   0xc   :  { %365 = vmatpush.bf16.msra.mxu2 %v606_v10  ;;  %v610_v27 = vld [vmem:[%s814_s1 + $0xc8] sm:$0xff]  ;;  %v609_v31 = vld [vmem:[%s814_s1 + $0xc0] sm:$0xff]  ;;  %v429_v39 = vld [vmem:[%s816_s0 + $0x18] sm:$0xf0] }
   0xd   :  { %384 = vmatpush.bf16.msra.mxu3 %v614_v11  ;;  %v419_v32 = vld [vmem:[%s816_s0] sm:$0xf]  ;;  %v577_v34 = vld [vmem:[%s816_s0 + $0x4] sm:$0xf]  ;;  %v427_v36 = vld [vmem:[%s816_s0 + $0x8] sm:$0xf] }
   0xe   :  { %328 = vmatpush.bf16.msra.mxu0 %v589_v12  ;;  %v578_v38 = vld [vmem:[%s816_s0 + $0xc] sm:$0xf]  ;;  %v420_v40 = vor.u32 %v579_v33, %v419_v32  ;;  %v424_v41 = vor.u32 %v577_v34, %v421_v35  ;;  %v428_v42 = vor.u32 %v580_v37, %v427_v36  ;;  %v435_v44 = vld [vmem:[%s816_s0 + $0x20] sm:$0xf]  ;;  %v583_v45 = vld [vmem:[%s816_s0 + $0x2c] sm:$0xf0] }
   0xf   :  { %347 = vmatpush.bf16.msra.mxu1 %v597_v13  ;;  %v432_v43 = vor.u32 %v578_v38, %v429_v39  ;;  %v581_v46 = vld [vmem:[%s816_s0 + $0x24] sm:$0xf]  ;;  %v437_v47 = vld [vmem:[%s816_s0 + $0x30] sm:$0xf0]  ;;  %v443_v48 = vld [vmem:[%s816_s0 + $0x28] sm:$0xf]  ;;  %v436_v52 = vor.u32 %v583_v45, %v435_v44 }
  0x10   :  { %366 = vmatpush.bf16.msra.mxu2 %v605_v14  ;;  %v584_v49 = vld [vmem:[%s816_s0 + $0x34] sm:$0xf0]  ;;  %v582_v50 = vld [vmem:[%s816_s0 + $0x2c] sm:$0xf]  ;;  %v445_v51 = vld [vmem:[%s816_s0 + $0x38] sm:$0xf0]  ;;  %v440_v53 = vor.u32 %v581_v46, %v437_v47 }
  0x11   :  { %385 = vmatpush.bf16.msra.mxu3 %v613_v15  ;;  %v444_v54 = vor.u32 %v584_v49, %v443_v48  ;;  %v448_v55 = vor.u32 %v582_v50, %v445_v51  ;;  %v617_v56 = vld [vmem:[%s815_s2] ss:$0 sm:$0xff]  ;;  %v402_v11 = vld [vmem:[%s817_s3 + $0x8] sm:$0xff] }
  0x12   :  { %329 = vmatpush.bf16.msra.mxu0 %v588_v16  ;;  %v401_v1 = vld [vmem:[%s817_s3] sm:$0xff] }
  0x13   :  { %348 = vmatpush.bf16.msra.mxu1 %v596_v17 }
  0x14   :  { %367 = vmatpush.bf16.msra.mxu2 %v604_v18 }
  0x15   :  { %386 = vmatpush.bf16.msra.mxu3 %v612_v19 }
  0x16   :  { %330 = vmatpush.bf16.msra.mxu0 %v587_v20 }
  0x17   :  { %349 = vmatpush.bf16.msra.mxu1 %v595_v21  ;;  %v403_v21 = vld [vmem:[%s817_s3 + $0x10] sm:$0xff] }
  0x18   :  { %368 = vmatpush.bf16.msra.mxu2 %v603_v22 }
  0x19   :  { %387 = vmatpush.bf16.msra.mxu3 %v611_v23 }
  0x1a   :  { %331 = vmatpush.bf16.msra.mxu0 %v586_v24 }
  0x1b   :  { %350 = vmatpush.bf16.msra.mxu1 %v594_v25 }
  0x1c   :  { %369 = vmatpush.bf16.msra.mxu2 %v602_v26 }
  0x1d   :  { %388 = vmatpush.bf16.msra.mxu3 %v610_v27 }
  0x1e   :  { %332 = vmatpush.bf16.msra.mxu0 %v585_v28 }
  0x1f   :  { %351 = vmatpush.bf16.msra.mxu1 %v593_v29 }
  0x20   :  { %370 = vmatpush.bf16.msra.mxu2 %v601_v30  ;;  %v404_v30 = vld [vmem:[%s817_s3 + $0x18] sm:$0xff] }
  0x21   :  { %389 = vmatpush.bf16.msra.mxu3 %v609_v31  ;;  %333 = vmatmul.bf16.vlgmr.msra.gmra.mxu0 %v420_v40 }
  0x22   :  { %352 = vmatmul.bf16.vlgmr.msra.gmra.mxu1 %v424_v41 }
  0x23   :  { %371 = vmatmul.bf16.vlgmr.msra.gmra.mxu2 %v428_v42 }
  0x24   :  { %390 = vmatmul.bf16.vlgmr.msra.gmra.mxu3 %v432_v43 }
  0x31   :  { %338 = vmatmul.bf16.gmra.mxu0 %v436_v52 }
  0x32   :  { %357 = vmatmul.bf16.gmra.mxu1 %v440_v53 }
  0x33   :  { %376 = vmatmul.bf16.gmra.mxu2 %v444_v54 }
  0x34   :  { %395 = vmatmul.bf16.gmra.mxu3 %v448_v55 }
  0x9e   :  { %v334_v57 = vpop.f32.mrf.mxu0 }
  0x9f   :  { %v353_v58 = vpop.f32.mrf.mxu1  ;;  %v335_v59 = vadd.f32 %v617_v56, %v334_v57 }
  0xa1   :  { %v354_v60 = vadd.f32 %v353_v58, %v335_v59 }
  0xa6   :  { %v372_v61 = vpop.f32.mrf.mxu2  ;;  %v336_v0 = vpop.f32.mrf.mxu0 }
  0xa7   :  { %v391_v62 = vpop.f32.mrf.mxu3  ;;  %v373_v63 = vadd.f32 %v372_v61, %v354_v60  ;;  %v355_v2 = vpop.f32.mrf.mxu1  ;;  %v337_v4 = vadd.f32 %v617_v56, %v336_v0 }
  0xa9   :  { %v392_v3 = vadd.f32 %v391_v62, %v373_v63  ;;  %v356_v6 = vadd.f32 %v355_v2, %v337_v4 }
  0xab   :  { %v405_v5 = vadd.f32 %v401_v1, %v392_v3 }
  0xad   :  { %409 = vst [vmem:[%s818_s4] sm:$0xff] %v405_v5 }
  0xae   :  { %v374_v7 = vpop.f32.mrf.mxu2  ;;  %v339_v10 = vpop.f32.mrf.mxu0 }
  0xaf   :  { %v393_v8 = vpop.f32.mrf.mxu3  ;;  %v375_v9 = vadd.f32 %v374_v7, %v356_v6  ;;  %v340_v12 = vadd.f32 %v617_v56, %v339_v10  ;;  %v358_v14 = vpop.f32.mrf.mxu1 }
  0xb1   :  { %v394_v13 = vadd.f32 %v393_v8, %v375_v9  ;;  %v359_v16 = vadd.f32 %v358_v14, %v340_v12 }
  0xb3   :  { %v406_v15 = vadd.f32 %v402_v11, %v394_v13 }
  0xb5   :  { %410 = vst [vmem:[%s818_s4 + $0x8] sm:$0xff] %v406_v15 }
  0xb6   :  { %v377_v17 = vpop.f32.mrf.mxu2  ;;  %v341_v20 = vpop.f32.mrf.mxu0 }
  0xb7   :  { %v396_v18 = vpop.f32.mrf.mxu3  ;;  %v378_v19 = vadd.f32 %v377_v17, %v359_v16  ;;  %v342_v23 = vadd.f32 %v617_v56, %v341_v20  ;;  %v360_v25 = vpop.f32.mrf.mxu1 }
  0xb9   :  { %v397_v22 = vadd.f32 %v396_v18, %v378_v19  ;;  %v361_v26 = vadd.f32 %v360_v25, %v342_v23 }
  0xbb   :  { %v407_v24 = vadd.f32 %v403_v21, %v397_v22 }
  0xbd   :  { %411 = vst [vmem:[%s818_s4 + $0x10] sm:$0xff] %v407_v24 }
  0xbe   :  { %v379_v27 = vpop.f32.mrf.mxu2 }
  0xbf   :  { %v380_v28 = vadd.f32 %v379_v27, %v361_v26  ;;  %v398_v29 = vpop.f32.mrf.mxu3 }
  0xc1   :  { %v399_v31 = vadd.f32 %v398_v29, %v380_v28 }
  0xc3   :  { %v408_v32 = vadd.f32 %v404_v30, %v399_v31 }
  0xc5   :  { %412 = vst [vmem:[%s818_s4 + $0x18] sm:$0xff] %v408_v32 }

</bundles_post_ra>
